<compile_context>
chip_gen: v7x
topology: tpu7x:2x2x1
jax: 0.10.0
libtpu: 0.0.40
codegen_flags: <defaults>
</compile_context>

<pallas_src>
import functools

import jax
import jax.numpy as jnp
import numpy as np
from jax.experimental import pallas as pl
from jax.experimental.pallas import tpu as pltpu

BN_EPS = 1e-5

_CompilerParams = getattr(pltpu, "CompilerParams",
                          getattr(pltpu, "TPUCompilerParams", None))


def _tpu_vmem_capacity_bytes():
    try:
        return int(pltpu.get_tpu_info().vmem_capacity_bytes)
    except Exception:  # unknown JAX / chip -> assume the smallest (v7x, 64 MiB)
        return 64 * 1024 * 1024


_VMEM_CAP = _tpu_vmem_capacity_bytes()
if _VMEM_CAP >= 96 * 1024 * 1024:            # v5e / v6e (128 MiB physical VMEM)
    _VMEM_LIMIT_BYTES = 100 * 1024 * 1024
    _CONV_TILE_VMEM_BUDGET = 28 * 1024 * 1024
else:                                         # v7x (64 MiB physical VMEM)
    _VMEM_LIMIT_BYTES = 48 * 1024 * 1024
    _CONV_TILE_VMEM_BUDGET = 12 * 1024 * 1024


def _compiler_params(sem):
    if _CompilerParams is None:
        return None
    return _CompilerParams(dimension_semantics=sem,
                           vmem_limit_bytes=_VMEM_LIMIT_BYTES)


# --------------------------------------------------------------------------------------
# Bilinear 2x upsample (align_corners=True): single fused kernel, padded lane-dense output
# --------------------------------------------------------------------------------------
def _interp_matrix(dst, src):
    """(dst, src) numpy matrix; row i holds the align_corners=True lerp weights."""
    m = np.zeros((dst, src), np.float32)
    if dst == 1 or src == 1:
        m[:, 0] = 1.0
        return m
    scale = (src - 1) / (dst - 1)
    for i in range(dst):
        p = i * scale
        i0 = min(int(np.floor(p)), src - 1)
        i1 = min(i0 + 1, src - 1)
        f = p - i0
        m[i, i0] += 1.0 - f
        m[i, i1] += f
    return m


def _upsample_pad_kernel(a_ref, bk_ref, x_ref, o_ref, *, c, ho, wo):
    # x: (H, W*C) lane-dense;  a: (Ho, H);  bk: (W*C, Wo*C) = B^T (x) I_C
    xh = jnp.dot(a_ref[...], x_ref[0], preferred_element_type=jnp.float32)   # (Ho, W*C)
    up = jnp.dot(xh, bk_ref[...], preferred_element_type=jnp.float32)        # (Ho, Wo*C)
    # write the zero border for the consumer conv directly (no XLA pad pass)
    zc = jnp.zeros((ho, c), jnp.float32)
    mid = jnp.concatenate([zc, up, zc], axis=1)                              # (Ho, (Wo+2)*C)
    zr = jnp.zeros((1, (wo + 2) * c), jnp.float32)
    o_ref[0] = jnp.concatenate([zr, mid, zr], axis=0)                        # (Ho+2, (Wo+2)*C)


def upsample_bilinear_2x_padded(x_flat, n, h, w, c):
    """nn.UpsamplingBilinear2d(scale_factor=2) on lane-dense (N, H, W*C) input.
    Returns the zero-padded, lane-dense activation (N, Ho+2, (Wo+2)*C) for the next conv."""
    ho, wo = 2 * h, 2 * w
    a_mat = jnp.asarray(_interp_matrix(ho, h))                                # (Ho, H)
    bk = jnp.asarray(np.kron(_interp_matrix(wo, w).T,
                             np.eye(c, dtype=np.float32)))                    # (W*C, Wo*C)
    # TODO(synk): tile over output rows (and read NCHW directly) for very large images /
    # batch-1 v7x; at decoder shapes a full image per grid step is tiny.
    return pl.pallas_call(
        functools.partial(_upsample_pad_kernel, c=c, ho=ho, wo=wo),
        out_shape=jax.ShapeDtypeStruct((n, ho + 2, (wo + 2) * c), jnp.float32),
        grid=(n,),
        in_specs=[pl.BlockSpec((ho, h), lambda i: (0, 0)),
                  pl.BlockSpec((w * c, wo * c), lambda i: (0, 0)),
                  pl.BlockSpec((1, h, w * c), lambda i: (i, 0, 0))],
        out_specs=pl.BlockSpec((1, ho + 2, (wo + 2) * c), lambda i: (i, 0, 0)),
        compiler_params=_compiler_params(("parallel",)),
    )(a_mat, bk, x_flat)


# --------------------------------------------------------------------------------------
# Conv3x3 as banded matmuls (+ fused input-BN/ReLU, + BN partial statistics)
# --------------------------------------------------------------------------------------
def _conv_band_bytes(tile_h, w, cin, cout):
    wp = w + 2
    in_b = (tile_h + 2) * wp * cin * 4
    out_b = (tile_h + 2) * wp * cout * 4
    wt_b = 3 * wp * cin * w * cout * 4          # banded weight (scales with W; see TODO below)
    acc_b = tile_h * w * cout * 4
    return 2 * (in_b + out_b + wt_b) + 4 * acc_b


def _pick_tile_h(n, h, w, cin, cout, budget=_CONV_TILE_VMEM_BUDGET):
    # (8,128)-legal candidates: divisors of H that are multiples of 8, or H itself
    legal = [d for d in range(h, 0, -1) if h % d == 0 and (d == h or d % 8 == 0)]
    fits = [d for d in legal if _conv_band_bytes(d, w, cin, cout) <= budget]
    cands = fits if fits else legal[-1:]          # last resort: smallest legal band
    if n == 1:                                    # keep both v7x TensorCores busy at batch 1
        multi = [d for d in cands if h // d >= 2]
        if multi:
            cands = multi
    return cands[0]


def _conv3x3_kernel(x_in_ref, bk_ref, sel_ref, sc_ref, sh_ref,       # inputs
                    y_ref, stats_ref,                                 # outputs
                    *scratch,                                         # (band, sem) if manual
                    tile_h, h_img, w_img, cout,
                    normalize_input, pad_output, manual_fetch):
    wp = w_img + 2

    if manual_fetch:
        # Overlapping halo band fetched straight from HBM (no host-side duplication).
        # TODO(synk): double-buffer this fetch across row bands to hide the DMA latency.
        band, sem = scratch
        i = pl.program_id(0)
        t = pl.program_id(1)
        cp = pltpu.make_async_copy(
            x_in_ref.at[i, pl.ds(t * tile_h, tile_h + 2)], band, sem)
        cp.start()
        cp.wait()
        x = band[...]                                        # (tile_h+2, Wp*Cin)
    else:
        x = x_in_ref[0]                                      # (tile_h+2, Wp*Cin), tile_h == H

    if normalize_input:
        # Previous layer's BatchNorm+ReLU fused onto this layer's input tile.  Border
        # columns are handled by zeroed scale/shift lanes; border rows by an iota mask.
        z = jnp.maximum(x * sc_ref[...] + sh_ref[...], 0.0)
        row = (jax.lax.broadcasted_iota(jnp.int32, z.shape, 0)
               + pl.program_id(1) * tile_h)                  # row index in the padded image
        x = jnp.where((row >= 1) & (row <= h_img), z, 0.0)

    # 3 banded matmuls (one per kh): (tile_h, Wp*Cin) @ (Wp*Cin, W*Cout), lane-dense output.
    acc = jnp.dot(x[0:tile_h, :], bk_ref[0], preferred_element_type=jnp.float32)
    acc += jnp.dot(x[1:tile_h + 1, :], bk_ref[1], preferred_element_type=jnp.float32)
    acc += jnp.dot(x[2:tile_h + 2, :], bk_ref[2], preferred_element_type=jnp.float32)
    # (conv bias intentionally omitted: cancelled exactly by training-mode BatchNorm)

    # Per-tile BatchNorm partial statistics via a (W*Cout, Cout) channel-selector matmul
    # (avoids lane-sparse reshapes); reduced over the whole grid in the wrapper.
    ch = jnp.dot(acc, sel_ref[...], preferred_element_type=jnp.float32)        # (tile_h, Cout)
    ch2 = jnp.dot(acc * acc, sel_ref[...], preferred_element_type=jnp.float32)
    stats_ref[0, 0] = jnp.concatenate(
        [jnp.sum(ch, axis=0, keepdims=True),
         jnp.sum(ch2, axis=0, keepdims=True)], axis=0)                          # (2, Cout)

    if pad_output:
        # Emit the zero-padded lane-dense layout the next conv consumes (no XLA pad pass).
        zc = jnp.zeros((tile_h, cout), jnp.float32)
        mid = jnp.concatenate([zc, acc, zc], axis=1)          # (tile_h, Wp*Cout)
        zr = jnp.zeros((1, wp * cout), jnp.float32)
        y_ref[0] = jnp.concatenate([zr, mid, zr], axis=0)     # (tile_h+2, Wp*Cout)
    else:
        y_ref[0] = acc                                        # (tile_h, W*Cout)


def conv3x3_bn_stats(xp, n, h, w, cin, weight_oihw, in_scale=None, in_shift=None,
                     want_padded_output=False):
    """Bias-free 3x3 'SAME' conv over a (N, row-band) grid.

    xp: zero-padded lane-dense activation (N, H+2, (W+2)*Cin).
    Returns (y, stats_sum) where stats_sum = [sum, sum-of-squares] per channel, and y is
    (N, H+2, (W+2)*Cout) padded (when `want_padded_output` and one band covers the image)
    or (N, H, W*Cout) otherwise."""
    cout = weight_oihw.shape[0]
    wp = w + 2

    tile_h = _pick_tile_h(n, h, w, cin, cout)
    n_t = h // tile_h
    manual_fetch = n_t > 1
    pad_out = want_padded_output and not manual_fetch

    # Block-banded weight: Bk[kh][(w+kw)*Cin+ci, w*Cout+co] = W_hwio[kh, kw, ci, co].
    # TODO(synk): for large W*C the banded weight (O(W^2*Cin*Cout)) should be split per kw.
    w_hwio = jnp.transpose(weight_oihw, (2, 3, 1, 0))                    # (3,3,Cin,Cout)
    eyes = [np.eye(wp, w, -kw, dtype=np.float32) for kw in range(3)]
    bk = jnp.stack([sum(jnp.kron(eyes[kw], w_hwio[kh, kw]) for kw in range(3))
                    for kh in range(3)])                                 # (3, Wp*Cin, W*Cout)
    sel = jnp.asarray(np.tile(np.eye(cout, dtype=np.float32), (w, 1)))   # (W*Cout, Cout)

    normalize = in_scale is not None
    zc = jnp.zeros((cin,), jnp.float32)
    if normalize:
        sc_w = jnp.concatenate([zc, jnp.tile(in_scale, w), zc]).reshape(1, wp * cin)
        sh_w = jnp.concatenate([zc, jnp.tile(in_shift, w), zc]).reshape(1, wp * cin)
    else:
        sc_w = jnp.ones((1, wp * cin), jnp.float32)
        sh_w = jnp.zeros((1, wp * cin), jnp.float32)

    kernel = functools.partial(_conv3x3_kernel, tile_h=tile_h, h_img=h, w_img=w,
                               cout=cout, normalize_input=normalize,
                               pad_output=pad_out, manual_fetch=manual_fetch)

    if manual_fetch:
        x_spec = pl.BlockSpec(memory_space=pl.ANY)
        scratch = [pltpu.VMEM((tile_h + 2, wp * cin), jnp.float32),
                   pltpu.SemaphoreType.DMA]
    else:
        x_spec = pl.BlockSpec((1, h + 2, wp * cin), lambda i, t: (i, 0, 0))
        scratch = []

    if pad_out:
        y_shape = jax.ShapeDtypeStruct((n, h + 2, wp * cout), jnp.float32)
        y_spec = pl.BlockSpec((1, h + 2, wp * cout), lambda i, t: (i, 0, 0))
    else:
        y_shape = jax.ShapeDtypeStruct((n, h, w * cout), jnp.float32)
        y_spec = pl.BlockSpec((1, tile_h, w * cout), lambda i, t: (i, t, 0))

    cost = pl.CostEstimate(
        flops=2 * n * h * w * 9 * cin * cout,
        transcendentals=0,
        bytes_accessed=4 * (xp.size + bk.size + n * (h + 2) * wp * cout + n * n_t * 2 * cout))

    y, stats = pl.pallas_call(
        kernel,
        out_shape=(y_shape, jax.ShapeDtypeStruct((n, n_t, 2, cout), jnp.float32)),
        grid=(n, n_t),
        in_specs=[x_spec,
                  pl.BlockSpec((3, wp * cin, w * cout), lambda i, t: (0, 0, 0)),
                  pl.BlockSpec((w * cout, cout), lambda i, t: (0, 0)),
                  pl.BlockSpec((1, wp * cin), lambda i, t: (0, 0)),
                  pl.BlockSpec((1, wp * cin), lambda i, t: (0, 0))],
        out_specs=(y_spec,
                   pl.BlockSpec((1, 1, 2, cout), lambda i, t: (i, t, 0, 0))),
        scratch_shapes=scratch,
        compiler_params=_compiler_params(("parallel", "parallel")),
        cost_estimate=cost,
    )(xp, bk, sel, sc_w, sh_w)

    if want_padded_output and not pad_out:
        # General multi-band fallback: pad once in XLA (extra HBM pass).
        # TODO(synk): fuse this padding into the conv store for the multi-band path too.
        y = jnp.pad(y, ((0, 0), (1, 1), (cout, cout)))

    return y, jnp.sum(stats, axis=(0, 1))                    # y, (2, Cout)


# --------------------------------------------------------------------------------------
# BatchNorm finalize (glue) + final BN/ReLU kernel
# --------------------------------------------------------------------------------------
def _bn_affine_from_stats(stats_sum, count, gamma, beta):
    # Training-mode BatchNorm: batch mean, biased variance.
    # TODO(synk): switch to centered per-tile partials (Chan) if N*H*W or magnitudes grow.
    mean = stats_sum[0] / count
    var = jnp.maximum(stats_sum[1] / count - mean * mean, 0.0)
    scale = gamma * jax.lax.rsqrt(var + BN_EPS)
    shift = beta - mean * scale
    return scale, shift


def _bn_relu_kernel(x_ref, sc_ref, sh_ref, o_ref):
    o_ref[0] = jnp.maximum(x_ref[0] * sc_ref[...] + sh_ref[...], 0.0)


def bn_relu_apply(y, n, h, w, cout, scale, shift):
    tile_h = _pick_tile_h(n, h, w, cout, cout)
    n_t = h // tile_h
    scw = jnp.tile(scale, w).reshape(1, w * cout)             # lane order = (w, cout)
    shw = jnp.tile(shift, w).reshape(1, w * cout)
    return pl.pallas_call(
        _bn_relu_kernel,
        out_shape=jax.ShapeDtypeStruct((n, h, w * cout), jnp.float32),
        grid=(n, n_t),
        in_specs=[pl.BlockSpec((1, tile_h, w * cout), lambda i, t: (i, t, 0)),
                  pl.BlockSpec((1, w * cout), lambda i, t: (0, 0)),
                  pl.BlockSpec((1, w * cout), lambda i, t: (0, 0))],
        out_specs=pl.BlockSpec((1, tile_h, w * cout), lambda i, t: (i, t, 0)),
        compiler_params=_compiler_params(("parallel", "parallel")),
    )(y, scw, shw)


# --------------------------------------------------------------------------------------
# Full forward
# --------------------------------------------------------------------------------------
@jax.jit
def decoder_without_concat(x_nchw, params):
    """Forward of DecoderWithoutConcat.  Input/output are NCHW like PyTorch."""
    n, c, h, w = x_nchw.shape
    # TODO(synk): fold this boundary transpose into the upsample kernel (read NCHW directly).
    x_flat = jnp.transpose(x_nchw, (0, 2, 3, 1)).reshape(n, h, w * c)

    xp0 = upsample_bilinear_2x_padded(x_flat, n, h, w, c)     # (N, Ho+2, (Wo+2)*C), padded
    ho, wo = 2 * h, 2 * w
    cout = params["w1"].shape[0]

    # conv1 (+ BN1 statistics); output padded + lane-dense, ready for conv2
    y1p, st1 = conv3x3_bn_stats(xp0, n, ho, wo, c, params["w1"],
                                want_padded_output=True)
    sc1, sh1 = _bn_affine_from_stats(st1, n * ho * wo, params["g1"], params["be1"])

    # conv2 applies BN1+ReLU to its input tiles on the fly (+ BN2 statistics)
    y2, st2 = conv3x3_bn_stats(y1p, n, ho, wo, cout, params["w2"],
                               in_scale=sc1, in_shift=sh1)
    sc2, sh2 = _bn_affine_from_stats(st2, n * ho * wo, params["g2"], params["be2"])

    out = bn_relu_apply(y2, n, ho, wo, cout, sc2, sh2)        # (N, Ho, Wo*Cout)
    # TODO(synk): fold this boundary transpose into the BN2/ReLU kernel (channel-major store).
    return jnp.transpose(out.reshape(n, ho, wo, cout), (0, 3, 1, 2))


# --------------------------------------------------------------------------------------
# Parameter init (mirrors module __init__; conv biases kept for the reference path only —
# they are exactly cancelled by training-mode BatchNorm, so the kernel path omits them)
# --------------------------------------------------------------------------------------
def init_params(key, x_in_channel, out_channel, last_in_channel=0):
    cin1 = x_in_channel + last_in_channel
    k1, k2, k3, k4 = jax.random.split(key, 4)
    std = np.sqrt(2.0 / (out_channel * 9))          # kaiming_normal_, fan_out, relu
    w1 = jax.random.normal(k1, (out_channel, cin1, 3, 3), jnp.float32) * std
    w2 = jax.random.normal(k2, (out_channel, out_channel, 3, 3), jnp.float32) * std
    bnd1 = 1.0 / np.sqrt(cin1 * 9)
    bnd2 = 1.0 / np.sqrt(out_channel * 9)
    b1 = jax.random.uniform(k3, (out_channel,), jnp.float32, -bnd1, bnd1)
    b2 = jax.random.uniform(k4, (out_channel,), jnp.float32, -bnd2, bnd2)
    ones = jnp.ones((out_channel,), jnp.float32)
    zeros = jnp.zeros((out_channel,), jnp.float32)
    return dict(w1=w1, b1=b1, g1=ones, be1=zeros,
                w2=w2, b2=b2, g2=ones, be2=zeros)


# --------------------------------------------------------------------------------------
# Pure-JAX reference (independent formulation, includes the conv bias)
# --------------------------------------------------------------------------------------
def _ref_upsample(x_nhwc):
    n, h, w, c = x_nhwc.shape
    ho, wo = 2 * h, 2 * w
    hs = jnp.arange(ho, dtype=jnp.float32) * ((h - 1) / (ho - 1))
    ws = jnp.arange(wo, dtype=jnp.float32) * ((w - 1) / (wo - 1))
    h0 = jnp.floor(hs).astype(jnp.int32); h1 = jnp.minimum(h0 + 1, h - 1)
    w0 = jnp.floor(ws).astype(jnp.int32); w1 = jnp.minimum(w0 + 1, w - 1)
    dh = (hs - h0)[None, :, None, None]
    dw = (ws - w0)[None, None, :, None]
    xh0, xh1 = x_nhwc[:, h0], x_nhwc[:, h1]
    a, b = xh0[:, :, w0], xh0[:, :, w1]
    cc, d = xh1[:, :, w0], xh1[:, :, w1]
    return ((1 - dh) * (1 - dw) * a + (1 - dh) * dw * b +
            dh * (1 - dw) * cc + dh * dw * d)


def _ref_conv_bn_relu(x_nhwc, w_oihw, b, g, be):
    w_hwio = jnp.transpose(w_oihw, (2, 3, 1, 0))
    y = jax.lax.conv_general_dilated(
        x_nhwc, w_hwio, (1, 1), "SAME",
        dimension_numbers=("NHWC", "HWIO", "NHWC"),
        precision=jax.lax.Precision.HIGHEST) + b[None, None, None, :]
    mean = jnp.mean(y, axis=(0, 1, 2), keepdims=True)
    var = jnp.mean(jnp.square(y - mean), axis=(0, 1, 2), keepdims=True)
    y = (y - mean) * jax.lax.rsqrt(var + BN_EPS) * g + be
    return jnp.maximum(y, 0.0)


def ref_forward(x_nchw, p):
    x = jnp.transpose(x_nchw, (0, 2, 3, 1))
    x = _ref_upsample(x)
    x = _ref_conv_bn_relu(x, p["w1"], p["b1"], p["g1"], p["be1"])
    x = _ref_conv_bn_relu(x, p["w2"], p["b2"], p["g2"], p["be2"])
    return jnp.transpose(x, (0, 3, 1, 2))


# --------------------------------------------------------------------------------------
if __name__ == "__main__":
    X_IN_CH, OUT_CH, LAST_IN_CH = 4, 8, 0
    key = jax.random.PRNGKey(0)
    kx, kp = jax.random.split(key)
    x = jax.random.normal(kx, (2, X_IN_CH, 16, 16), jnp.float32)   # NCHW like PyTorch
    params = init_params(kp, X_IN_CH, OUT_CH, LAST_IN_CH)

    out = jax.block_until_ready(decoder_without_concat(x, params))
    assert out.shape == (2, OUT_CH, 32, 32), out.shape

    ref = jax.block_until_ready(ref_forward(x, params))
    np.testing.assert_allclose(np.asarray(out), np.asarray(ref), rtol=5e-3, atol=5e-3)

    print("KERNEL_OK")
</pallas_src>

<mosaic_0001>
module attributes {stable_mosaic.version = 11 : i64} {
  func.func @_upsample_pad_kernel(%arg0: i32, %arg1: memref<32x16xf32, #tpu.memory_space<vmem>>, %arg2: memref<64x128xf32, #tpu.memory_space<vmem>>, %arg3: memref<1x16x64xf32, #tpu.memory_space<vmem>>, %arg4: memref<1x34x136xf32, #tpu.memory_space<vmem>>) attributes {dimension_semantics = [#tpu.dimension_semantics<parallel>], iteration_bounds = array<i64: 2>, scalar_prefetch = 0 : i64, scratch_operands = 0 : i64, tpu.core_type = #tpu.core_type<tc>, window_params = [{pipeline_mode = #tpu.pipeline_mode<synchronous>, transform_indices = @transform_0, window_bounds = array<i64: 32, 16>}, {pipeline_mode = #tpu.pipeline_mode<synchronous>, transform_indices = @transform_1, window_bounds = array<i64: 64, 128>}, {transform_indices = @transform_2, window_bounds = array<i64: 1, 16, 64>}, {transform_indices = @transform_3, window_bounds = array<i64: 1, 34, 136>}]} {
    %c0 = arith.constant 0 : index
    %c0_0 = arith.constant 0 : index
    %0 = vector.load %arg1[%c0, %c0_0] : memref<32x16xf32, #tpu.memory_space<vmem>>, vector<32x16xf32>
    %c0_1 = arith.constant 0 : index
    %c0_2 = arith.constant 0 : index
    %c0_3 = arith.constant 0 : index
    %1 = vector.load %arg3[%c0_1, %c0_2, %c0_3] : memref<1x16x64xf32, #tpu.memory_space<vmem>>, vector<1x16x64xf32>
    %2 = vector.shape_cast %1 : vector<1x16x64xf32> to vector<16x64xf32>
    %cst = arith.constant dense<0.000000e+00> : vector<32x64xf32>
    %3 = tpu.matmul %0, %2, %cst {dimension_numbers = #tpu.dot_dimension_numbers<[1], [0], [0], [1], [0, 0, 1, 1], [], []>} : vector<32x16xf32>, vector<16x64xf32>, vector<32x64xf32> -> vector<32x64xf32>
    %c0_4 = arith.constant 0 : index
    %c0_5 = arith.constant 0 : index
    %4 = vector.load %arg2[%c0_4, %c0_5] : memref<64x128xf32, #tpu.memory_space<vmem>>, vector<64x128xf32>
    %cst_6 = arith.constant dense<0.000000e+00> : vector<32x128xf32>
    %5 = tpu.matmul %3, %4, %cst_6 {dimension_numbers = #tpu.dot_dimension_numbers<[1], [0], [0], [1], [0, 0, 1, 1], [], []>} : vector<32x64xf32>, vector<64x128xf32>, vector<32x128xf32> -> vector<32x128xf32>
    %cst_7 = arith.constant 0.000000e+00 : f32
    %6 = vector.broadcast %cst_7 : f32 to vector<32x4xf32>
    %7 = tpu.concatenate %6, %5, %6 in 1 : vector<32x4xf32>, vector<32x128xf32>, vector<32x4xf32> -> vector<32x136xf32>
    %cst_8 = arith.constant 0.000000e+00 : f32
    %8 = vector.broadcast %cst_8 : f32 to vector<1x136xf32>
    %9 = tpu.concatenate %8, %7, %8 in 0 : vector<1x136xf32>, vector<32x136xf32>, vector<1x136xf32> -> vector<34x136xf32>
    %c0_9 = arith.constant 0 : index
    %c0_10 = arith.constant 0 : index
    %c0_11 = arith.constant 0 : index
    %10 = vector.load %arg4[%c0_9, %c0_10, %c0_11] : memref<1x34x136xf32, #tpu.memory_space<vmem>>, vector<1x34x136xf32>
    %11 = vector.shape_cast %10 : vector<1x34x136xf32> to vector<34x136xf32>
    %12 = vector.shape_cast %9 : vector<34x136xf32> to vector<1x34x136xf32>
    tpu.vector_store %arg4[%c0_9, %c0_10, %c0_11], %12 {strides = array<i32>} : memref<1x34x136xf32, #tpu.memory_space<vmem>>, vector<1x34x136xf32>,
    return
  }
  func.func @transform_0(%arg0: i32) -> (i32, i32) {
    %c0_i32 = arith.constant 0 : i32
    %c0_i32_0 = arith.constant 0 : i32
    %c0_i32_1 = arith.constant 0 : i32
    return %c0_i32, %c0_i32_0 : i32, i32
  }
  func.func @transform_1(%arg0: i32) -> (i32, i32) {
    %c0_i32 = arith.constant 0 : i32
    %c0_i32_0 = arith.constant 0 : i32
    %c0_i32_1 = arith.constant 0 : i32
    return %c0_i32, %c0_i32_0 : i32, i32
  }
  func.func @transform_2(%arg0: i32) -> (i32, i32, i32) {
    %c0_i32 = arith.constant 0 : i32
    %c0_i32_0 = arith.constant 0 : i32
    %c0_i32_1 = arith.constant 0 : i32
    return %arg0, %c0_i32, %c0_i32_0 : i32, i32, i32
  }
  func.func @transform_3(%arg0: i32) -> (i32, i32, i32) {
    %c0_i32 = arith.constant 0 : i32
    %c0_i32_0 = arith.constant 0 : i32
    %c0_i32_1 = arith.constant 0 : i32
    return %arg0, %c0_i32, %c0_i32_0 : i32, i32, i32
  }
}

module attributes {stable_mosaic.version = 11 : i64} {
  func.func @_conv3x3_kernel(%arg0: i32, %arg1: i32, %arg2: memref<1x34x136xf32, #tpu.memory_space<vmem>>, %arg3: memref<3x136x256xf32, #tpu.memory_space<vmem>>, %arg4: memref<256x8xf32, #tpu.memory_space<vmem>>, %arg5: memref<1x136xf32, #tpu.memory_space<vmem>>, %arg6: memref<1x136xf32, #tpu.memory_space<vmem>>, %arg7: memref<1x34x272xf32, #tpu.memory_space<vmem>>, %arg8: memref<1x1x2x8xf32, #tpu.memory_space<vmem>>) attributes {dimension_semantics = [#tpu.dimension_semantics<parallel>, #tpu.dimension_semantics<parallel>], iteration_bounds = array<i64: 2, 1>, scalar_prefetch = 0 : i64, scratch_operands = 0 : i64, tpu.core_type = #tpu.core_type<tc>, window_params = [{transform_indices = @transform_0, window_bounds = array<i64: 1, 34, 136>}, {pipeline_mode = #tpu.pipeline_mode<synchronous>, transform_indices = @transform_1, window_bounds = array<i64: 3, 136, 256>}, {pipeline_mode = #tpu.pipeline_mode<synchronous>, transform_indices = @transform_2, window_bounds = array<i64: 256, 8>}, {pipeline_mode = #tpu.pipeline_mode<synchronous>, transform_indices = @transform_3, window_bounds = array<i64: 1, 136>}, {pipeline_mode = #tpu.pipeline_mode<synchronous>, transform_indices = @transform_4, window_bounds = array<i64: 1, 136>}, {transform_indices = @transform_5, window_bounds = array<i64: 1, 34, 272>}, {transform_indices = @transform_6, window_bounds = array<i64: 1, 1, 2, 8>}]} {
    %c0 = arith.constant 0 : index
    %c0_0 = arith.constant 0 : index
    %c0_1 = arith.constant 0 : index
    %0 = vector.load %arg2[%c0, %c0_0, %c0_1] : memref<1x34x136xf32, #tpu.memory_space<vmem>>, vector<1x34x136xf32>
    %1 = vector.shape_cast %0 : vector<1x34x136xf32> to vector<34x136xf32>
    %2 = vector.extract_strided_slice %1 {offsets = [0, 0], sizes = [32, 136], strides = [1, 1]} : vector<34x136xf32> to vector<32x136xf32>
    %c0_2 = arith.constant 0 : index
    %c0_3 = arith.constant 0 : index
    %c0_4 = arith.constant 0 : index
    %3 = vector.load %arg3[%c0_2, %c0_3, %c0_4] : memref<3x136x256xf32, #tpu.memory_space<vmem>>, vector<1x136x256xf32>
    %4 = vector.shape_cast %3 : vector<1x136x256xf32> to vector<136x256xf32>
    %cst = arith.constant dense<0.000000e+00> : vector<32x256xf32>
    %5 = tpu.matmul %2, %4, %cst {dimension_numbers = #tpu.dot_dimension_numbers<[1], [0], [0], [1], [0, 0, 1, 1], [], []>} : vector<32x136xf32>, vector<136x256xf32>, vector<32x256xf32> -> vector<32x256xf32>
    %6 = vector.extract_strided_slice %1 {offsets = [1, 0], sizes = [32, 136], strides = [1, 1]} : vector<34x136xf32> to vector<32x136xf32>
    %c1 = arith.constant 1 : index
    %c0_5 = arith.constant 0 : index
    %c0_6 = arith.constant 0 : index
    %7 = vector.load %arg3[%c1, %c0_5, %c0_6] : memref<3x136x256xf32, #tpu.memory_space<vmem>>, vector<1x136x256xf32>
    %8 = vector.shape_cast %7 : vector<1x136x256xf32> to vector<136x256xf32>
    %cst_7 = arith.constant dense<0.000000e+00> : vector<32x256xf32>
    %9 = tpu.matmul %6, %8, %cst_7 {dimension_numbers = #tpu.dot_dimension_numbers<[1], [0], [0], [1], [0, 0, 1, 1], [], []>} : vector<32x136xf32>, vector<136x256xf32>, vector<32x256xf32> -> vector<32x256xf32>
    %10 = arith.addf %5, %9 : vector<32x256xf32>
    %11 = vector.extract_strided_slice %1 {offsets = [2, 0], sizes = [32, 136], strides = [1, 1]} : vector<34x136xf32> to vector<32x136xf32>
    %c2 = arith.constant 2 : index
    %c0_8 = arith.constant 0 : index
    %c0_9 = arith.constant 0 : index
    %12 = vector.load %arg3[%c2, %c0_8, %c0_9] : memref<3x136x256xf32, #tpu.memory_space<vmem>>, vector<1x136x256xf32>
    %13 = vector.shape_cast %12 : vector<1x136x256xf32> to vector<136x256xf32>
    %cst_10 = arith.constant dense<0.000000e+00> : vector<32x256xf32>
    %14 = tpu.matmul %11, %13, %cst_10 {dimension_numbers = #tpu.dot_dimension_numbers<[1], [0], [0], [1], [0, 0, 1, 1], [], []>} : vector<32x136xf32>, vector<136x256xf32>, vector<32x256xf32> -> vector<32x256xf32>
    %15 = arith.addf %10, %14 : vector<32x256xf32>
    %c0_11 = arith.constant 0 : index
    %c0_12 = arith.constant 0 : index
    %16 = vector.load %arg4[%c0_11, %c0_12] : memref<256x8xf32, #tpu.memory_space<vmem>>, vector<256x8xf32>
    %cst_13 = arith.constant dense<0.000000e+00> : vector<32x8xf32>
    %17 = tpu.matmul %15, %16, %cst_13 {dimension_numbers = #tpu.dot_dimension_numbers<[1], [0], [0], [1], [0, 0, 1, 1], [], []>} : vector<32x256xf32>, vector<256x8xf32>, vector<32x8xf32> -> vector<32x8xf32>
    %18 = arith.mulf %15, %15 : vector<32x256xf32>
    %c0_14 = arith.constant 0 : index
    %c0_15 = arith.constant 0 : index
    %19 = vector.load %arg4[%c0_14, %c0_15] : memref<256x8xf32, #tpu.memory_space<vmem>>, vector<256x8xf32>
    %cst_16 = arith.constant dense<0.000000e+00> : vector<32x8xf32>
    %20 = tpu.matmul %18, %19, %cst_16 {dimension_numbers = #tpu.dot_dimension_numbers<[1], [0], [0], [1], [0, 0, 1, 1], [], []>} : vector<32x256xf32>, vector<256x8xf32>, vector<32x8xf32> -> vector<32x8xf32>
    %cst_17 = arith.constant dense<0.000000e+00> : vector<8xf32>
    %21 = vector.multi_reduction <add>, %17, %cst_17 [0] : vector<32x8xf32> to vector<8xf32>
    %22 = vector.shape_cast %21 : vector<8xf32> to vector<1x8xf32>
    %cst_18 = arith.constant dense<0.000000e+00> : vector<8xf32>
    %23 = vector.multi_reduction <add>, %20, %cst_18 [0] : vector<32x8xf32> to vector<8xf32>
    %24 = vector.shape_cast %23 : vector<8xf32> to vector<1x8xf32>
    %25 = tpu.concatenate %22, %24 in 0 : vector<1x8xf32>, vector<1x8xf32> -> vector<2x8xf32>
    %c0_19 = arith.constant 0 : index
    %c0_20 = arith.constant 0 : index
    %c0_21 = arith.constant 0 : index
    %c0_22 = arith.constant 0 : index
    %26 = vector.load %arg8[%c0_19, %c0_20, %c0_21, %c0_22] : memref<1x1x2x8xf32, #tpu.memory_space<vmem>>, vector<1x1x2x8xf32>
    %27 = vector.shape_cast %26 : vector<1x1x2x8xf32> to vector<2x8xf32>
    %28 = vector.shape_cast %25 : vector<2x8xf32> to vector<1x1x2x8xf32>
    tpu.vector_store %arg8[%c0_19, %c0_20, %c0_21, %c0_22], %28 {strides = array<i32>} : memref<1x1x2x8xf32, #tpu.memory_space<vmem>>, vector<1x1x2x8xf32>,
    %cst_23 = arith.constant 0.000000e+00 : f32
    %29 = vector.broadcast %cst_23 : f32 to vector<32x8xf32>
    %30 = tpu.concatenate %29, %15, %29 in 1 : vector<32x8xf32>, vector<32x256xf32>, vector<32x8xf32> -> vector<32x272xf32>
    %cst_24 = arith.constant 0.000000e+00 : f32
    %31 = vector.broadcast %cst_24 : f32 to vector<1x272xf32>
    %32 = tpu.concatenate %31, %30, %31 in 0 : vector<1x272xf32>, vector<32x272xf32>, vector<1x272xf32> -> vector<34x272xf32>
    %c0_25 = arith.constant 0 : index
    %c0_26 = arith.constant 0 : index
    %c0_27 = arith.constant 0 : index
    %33 = vector.load %arg7[%c0_25, %c0_26, %c0_27] : memref<1x34x272xf32, #tpu.memory_space<vmem>>, vector<1x34x272xf32>
    %34 = vector.shape_cast %33 : vector<1x34x272xf32> to vector<34x272xf32>
    %35 = vector.shape_cast %32 : vector<34x272xf32> to vector<1x34x272xf32>
    tpu.vector_store %arg7[%c0_25, %c0_26, %c0_27], %35 {strides = array<i32>} : memref<1x34x272xf32, #tpu.memory_space<vmem>>, vector<1x34x272xf32>,
    return
  }
  func.func @transform_0(%arg0: i32, %arg1: i32) -> (i32, i32, i32) {
    %c0_i32 = arith.constant 0 : i32
    %c0_i32_0 = arith.constant 0 : i32
    %c0_i32_1 = arith.constant 0 : i32
    return %arg0, %c0_i32, %c0_i32_0 : i32, i32, i32
  }
  func.func @transform_1(%arg0: i32, %arg1: i32) -> (i32, i32, i32) {
    %c0_i32 = arith.constant 0 : i32
    %c0_i32_0 = arith.constant 0 : i32
    %c0_i32_1 = arith.constant 0 : i32
    %c0_i32_2 = arith.constant 0 : i32
    return %c0_i32, %c0_i32_0, %c0_i32_1 : i32, i32, i32
  }
  func.func @transform_2(%arg0: i32, %arg1: i32) -> (i32, i32) {
    %c0_i32 = arith.constant 0 : i32
    %c0_i32_0 = arith.constant 0 : i32
    %c0_i32_1 = arith.constant 0 : i32
    return %c0_i32, %c0_i32_0 : i32, i32
  }
  func.func @transform_3(%arg0: i32, %arg1: i32) -> (i32, i32) {
    %c0_i32 = arith.constant 0 : i32
    %c0_i32_0 = arith.constant 0 : i32
    %c0_i32_1 = arith.constant 0 : i32
    return %c0_i32, %c0_i32_0 : i32, i32
  }
  func.func @transform_4(%arg0: i32, %arg1: i32) -> (i32, i32) {
    %c0_i32 = arith.constant 0 : i32
    %c0_i32_0 = arith.constant 0 : i32
    %c0_i32_1 = arith.constant 0 : i32
    return %c0_i32, %c0_i32_0 : i32, i32
  }
  func.func @transform_5(%arg0: i32, %arg1: i32) -> (i32, i32, i32) {
    %c0_i32 = arith.constant 0 : i32
    %c0_i32_0 = arith.constant 0 : i32
    %c0_i32_1 = arith.constant 0 : i32
    return %arg0, %c0_i32, %c0_i32_0 : i32, i32, i32
  }
  func.func @transform_6(%arg0: i32, %arg1: i32) -> (i32, i32, i32, i32) {
    %c0_i32 = arith.constant 0 : i32
    %c0_i32_0 = arith.constant 0 : i32
    %c0_i32_1 = arith.constant 0 : i32
    return %arg0, %arg1, %c0_i32, %c0_i32_0 : i32, i32, i32, i32
  }
}

module attributes {stable_mosaic.version = 11 : i64} {
  func.func @_conv3x3_kernel(%arg0: i32, %arg1: i32, %arg2: memref<1x34x272xf32, #tpu.memory_space<vmem>>, %arg3: memref<3x272x256xf32, #tpu.memory_space<vmem>>, %arg4: memref<256x8xf32, #tpu.memory_space<vmem>>, %arg5: memref<1x272xf32, #tpu.memory_space<vmem>>, %arg6: memref<1x272xf32, #tpu.memory_space<vmem>>, %arg7: memref<1x32x256xf32, #tpu.memory_space<vmem>>, %arg8: memref<1x1x2x8xf32, #tpu.memory_space<vmem>>) attributes {dimension_semantics = [#tpu.dimension_semantics<parallel>, #tpu.dimension_semantics<parallel>], iteration_bounds = array<i64: 2, 1>, scalar_prefetch = 0 : i64, scratch_operands = 0 : i64, tpu.core_type = #tpu.core_type<tc>, window_params = [{transform_indices = @transform_0, window_bounds = array<i64: 1, 34, 272>}, {pipeline_mode = #tpu.pipeline_mode<synchronous>, transform_indices = @transform_1, window_bounds = array<i64: 3, 272, 256>}, {pipeline_mode = #tpu.pipeline_mode<synchronous>, transform_indices = @transform_2, window_bounds = array<i64: 256, 8>}, {pipeline_mode = #tpu.pipeline_mode<synchronous>, transform_indices = @transform_3, window_bounds = array<i64: 1, 272>}, {pipeline_mode = #tpu.pipeline_mode<synchronous>, transform_indices = @transform_4, window_bounds = array<i64: 1, 272>}, {transform_indices = @transform_5, window_bounds = array<i64: 1, 32, 256>}, {transform_indices = @transform_6, window_bounds = array<i64: 1, 1, 2, 8>}]} {
    %c0 = arith.constant 0 : index
    %c0_0 = arith.constant 0 : index
    %c0_1 = arith.constant 0 : index
    %0 = vector.load %arg2[%c0, %c0_0, %c0_1] : memref<1x34x272xf32, #tpu.memory_space<vmem>>, vector<1x34x272xf32>
    %1 = vector.shape_cast %0 : vector<1x34x272xf32> to vector<34x272xf32>
    %c0_2 = arith.constant 0 : index
    %c0_3 = arith.constant 0 : index
    %2 = vector.load %arg5[%c0_2, %c0_3] : memref<1x272xf32, #tpu.memory_space<vmem>>, vector<1x272xf32>
    %3 = vector.broadcast %2 : vector<1x272xf32> to vector<34x272xf32>
    %4 = arith.mulf %1, %3 : vector<34x272xf32>
    %c0_4 = arith.constant 0 : index
    %c0_5 = arith.constant 0 : index
    %5 = vector.load %arg6[%c0_4, %c0_5] : memref<1x272xf32, #tpu.memory_space<vmem>>, vector<1x272xf32>
    %6 = vector.broadcast %5 : vector<1x272xf32> to vector<34x272xf32>
    %7 = arith.addf %4, %6 : vector<34x272xf32>
    %cst = arith.constant 0.000000e+00 : f32
    %8 = vector.broadcast %cst : f32 to vector<34x272xf32>
    %9 = arith.maximumf %7, %8 : vector<34x272xf32>
    %10 = tpu.iota {dimensions = array<i32: 0>} : vector<34x272xi32>
    %c32_i32 = arith.constant 32 : i32
    %11 = arith.muli %arg1, %c32_i32 : i32
    %12 = vector.broadcast %11 : i32 to vector<34x272xi32>
    %13 = arith.addi %10, %12 : vector<34x272xi32>
    %c1_i32 = arith.constant 1 : i32
    %14 = vector.broadcast %c1_i32 : i32 to vector<34x272xi32>
    %15 = arith.cmpi sge, %13, %14 : vector<34x272xi32>
    %c32_i32_6 = arith.constant 32 : i32
    %16 = vector.broadcast %c32_i32_6 : i32 to vector<34x272xi32>
    %17 = arith.cmpi sle, %13, %16 : vector<34x272xi32>
    %18 = arith.andi %15, %17 : vector<34x272xi1>
    %cst_7 = arith.constant 0.000000e+00 : f32
    %19 = vector.broadcast %cst_7 : f32 to vector<34x272xf32>
    %20 = arith.select %18, %9, %19 : vector<34x272xi1>, vector<34x272xf32>
    %21 = vector.extract_strided_slice %20 {offsets = [0, 0], sizes = [32, 272], strides = [1, 1]} : vector<34x272xf32> to vector<32x272xf32>
    %c0_8 = arith.constant 0 : index
    %c0_9 = arith.constant 0 : index
    %c0_10 = arith.constant 0 : index
    %22 = vector.load %arg3[%c0_8, %c0_9, %c0_10] : memref<3x272x256xf32, #tpu.memory_space<vmem>>, vector<1x272x256xf32>
    %23 = vector.shape_cast %22 : vector<1x272x256xf32> to vector<272x256xf32>
    %cst_11 = arith.constant dense<0.000000e+00> : vector<32x256xf32>
    %24 = tpu.matmul %21, %23, %cst_11 {dimension_numbers = #tpu.dot_dimension_numbers<[1], [0], [0], [1], [0, 0, 1, 1], [], []>} : vector<32x272xf32>, vector<272x256xf32>, vector<32x256xf32> -> vector<32x256xf32>
    %25 = vector.extract_strided_slice %20 {offsets = [1, 0], sizes = [32, 272], strides = [1, 1]} : vector<34x272xf32> to vector<32x272xf32>
    %c1 = arith.constant 1 : index
    %c0_12 = arith.constant 0 : index
    %c0_13 = arith.constant 0 : index
    %26 = vector.load %arg3[%c1, %c0_12, %c0_13] : memref<3x272x256xf32, #tpu.memory_space<vmem>>, vector<1x272x256xf32>
    %27 = vector.shape_cast %26 : vector<1x272x256xf32> to vector<272x256xf32>
    %cst_14 = arith.constant dense<0.000000e+00> : vector<32x256xf32>
    %28 = tpu.matmul %25, %27, %cst_14 {dimension_numbers = #tpu.dot_dimension_numbers<[1], [0], [0], [1], [0, 0, 1, 1], [], []>} : vector<32x272xf32>, vector<272x256xf32>, vector<32x256xf32> -> vector<32x256xf32>
    %29 = arith.addf %24, %28 : vector<32x256xf32>
    %30 = vector.extract_strided_slice %20 {offsets = [2, 0], sizes = [32, 272], strides = [1, 1]} : vector<34x272xf32> to vector<32x272xf32>
    %c2 = arith.constant 2 : index
    %c0_15 = arith.constant 0 : index
    %c0_16 = arith.constant 0 : index
    %31 = vector.load %arg3[%c2, %c0_15, %c0_16] : memref<3x272x256xf32, #tpu.memory_space<vmem>>, vector<1x272x256xf32>
    %32 = vector.shape_cast %31 : vector<1x272x256xf32> to vector<272x256xf32>
    %cst_17 = arith.constant dense<0.000000e+00> : vector<32x256xf32>
    %33 = tpu.matmul %30, %32, %cst_17 {dimension_numbers = #tpu.dot_dimension_numbers<[1], [0], [0], [1], [0, 0, 1, 1], [], []>} : vector<32x272xf32>, vector<272x256xf32>, vector<32x256xf32> -> vector<32x256xf32>
    %34 = arith.addf %29, %33 : vector<32x256xf32>
    %c0_18 = arith.constant 0 : index
    %c0_19 = arith.constant 0 : index
    %35 = vector.load %arg4[%c0_18, %c0_19] : memref<256x8xf32, #tpu.memory_space<vmem>>, vector<256x8xf32>
    %cst_20 = arith.constant dense<0.000000e+00> : vector<32x8xf32>
    %36 = tpu.matmul %34, %35, %cst_20 {dimension_numbers = #tpu.dot_dimension_numbers<[1], [0], [0], [1], [0, 0, 1, 1], [], []>} : vector<32x256xf32>, vector<256x8xf32>, vector<32x8xf32> -> vector<32x8xf32>
    %37 = arith.mulf %34, %34 : vector<32x256xf32>
    %c0_21 = arith.constant 0 : index
    %c0_22 = arith.constant 0 : index
    %38 = vector.load %arg4[%c0_21, %c0_22] : memref<256x8xf32, #tpu.memory_space<vmem>>, vector<256x8xf32>
    %cst_23 = arith.constant dense<0.000000e+00> : vector<32x8xf32>
    %39 = tpu.matmul %37, %38, %cst_23 {dimension_numbers = #tpu.dot_dimension_numbers<[1], [0], [0], [1], [0, 0, 1, 1], [], []>} : vector<32x256xf32>, vector<256x8xf32>, vector<32x8xf32> -> vector<32x8xf32>
    %cst_24 = arith.constant dense<0.000000e+00> : vector<8xf32>
    %40 = vector.multi_reduction <add>, %36, %cst_24 [0] : vector<32x8xf32> to vector<8xf32>
    %41 = vector.shape_cast %40 : vector<8xf32> to vector<1x8xf32>
    %cst_25 = arith.constant dense<0.000000e+00> : vector<8xf32>
    %42 = vector.multi_reduction <add>, %39, %cst_25 [0] : vector<32x8xf32> to vector<8xf32>
    %43 = vector.shape_cast %42 : vector<8xf32> to vector<1x8xf32>
    %44 = tpu.concatenate %41, %43 in 0 : vector<1x8xf32>, vector<1x8xf32> -> vector<2x8xf32>
    %c0_26 = arith.constant 0 : index
    %c0_27 = arith.constant 0 : index
    %c0_28 = arith.constant 0 : index
    %c0_29 = arith.constant 0 : index
    %45 = vector.load %arg8[%c0_26, %c0_27, %c0_28, %c0_29] : memref<1x1x2x8xf32, #tpu.memory_space<vmem>>, vector<1x1x2x8xf32>
    %46 = vector.shape_cast %45 : vector<1x1x2x8xf32> to vector<2x8xf32>
    %47 = vector.shape_cast %44 : vector<2x8xf32> to vector<1x1x2x8xf32>
    tpu.vector_store %arg8[%c0_26, %c0_27, %c0_28, %c0_29], %47 {strides = array<i32>} : memref<1x1x2x8xf32, #tpu.memory_space<vmem>>, vector<1x1x2x8xf32>,
    %c0_30 = arith.constant 0 : index
    %c0_31 = arith.constant 0 : index
    %c0_32 = arith.constant 0 : index
    %48 = vector.load %arg7[%c0_30, %c0_31, %c0_32] : memref<1x32x256xf32, #tpu.memory_space<vmem>>, vector<1x32x256xf32>
    %49 = vector.shape_cast %48 : vector<1x32x256xf32> to vector<32x256xf32>
    %50 = vector.shape_cast %34 : vector<32x256xf32> to vector<1x32x256xf32>
    tpu.vector_store %arg7[%c0_30, %c0_31, %c0_32], %50 {strides = array<i32>} : memref<1x32x256xf32, #tpu.memory_space<vmem>>, vector<1x32x256xf32>,
    return
  }
  func.func @transform_0(%arg0: i32, %arg1: i32) -> (i32, i32, i32) {
    %c0_i32 = arith.constant 0 : i32
    %c0_i32_0 = arith.constant 0 : i32
    %c0_i32_1 = arith.constant 0 : i32
    return %arg0, %c0_i32, %c0_i32_0 : i32, i32, i32
  }
  func.func @transform_1(%arg0: i32, %arg1: i32) -> (i32, i32, i32) {
    %c0_i32 = arith.constant 0 : i32
    %c0_i32_0 = arith.constant 0 : i32
    %c0_i32_1 = arith.constant 0 : i32
    %c0_i32_2 = arith.constant 0 : i32
    return %c0_i32, %c0_i32_0, %c0_i32_1 : i32, i32, i32
  }
  func.func @transform_2(%arg0: i32, %arg1: i32) -> (i32, i32) {
    %c0_i32 = arith.constant 0 : i32
    %c0_i32_0 = arith.constant 0 : i32
    %c0_i32_1 = arith.constant 0 : i32
    return %c0_i32, %c0_i32_0 : i32, i32
  }
  func.func @transform_3(%arg0: i32, %arg1: i32) -> (i32, i32) {
    %c0_i32 = arith.constant 0 : i32
    %c0_i32_0 = arith.constant 0 : i32
    %c0_i32_1 = arith.constant 0 : i32
    return %c0_i32, %c0_i32_0 : i32, i32
  }
  func.func @transform_4(%arg0: i32, %arg1: i32) -> (i32, i32) {
    %c0_i32 = arith.constant 0 : i32
    %c0_i32_0 = arith.constant 0 : i32
    %c0_i32_1 = arith.constant 0 : i32
    return %c0_i32, %c0_i32_0 : i32, i32
  }
  func.func @transform_5(%arg0: i32, %arg1: i32) -> (i32, i32, i32) {
    %c0_i32 = arith.constant 0 : i32
    %c0_i32_0 = arith.constant 0 : i32
    return %arg0, %arg1, %c0_i32 : i32, i32, i32
  }
  func.func @transform_6(%arg0: i32, %arg1: i32) -> (i32, i32, i32, i32) {
    %c0_i32 = arith.constant 0 : i32
    %c0_i32_0 = arith.constant 0 : i32
    %c0_i32_1 = arith.constant 0 : i32
    return %arg0, %arg1, %c0_i32, %c0_i32_0 : i32, i32, i32, i32
  }
}

module attributes {stable_mosaic.version = 11 : i64} {
  func.func @_bn_relu_kernel(%arg0: i32, %arg1: i32, %arg2: memref<1x32x256xf32, #tpu.memory_space<vmem>>, %arg3: memref<1x256xf32, #tpu.memory_space<vmem>>, %arg4: memref<1x256xf32, #tpu.memory_space<vmem>>, %arg5: memref<1x32x256xf32, #tpu.memory_space<vmem>>) attributes {dimension_semantics = [#tpu.dimension_semantics<parallel>, #tpu.dimension_semantics<parallel>], iteration_bounds = array<i64: 2, 1>, scalar_prefetch = 0 : i64, scratch_operands = 0 : i64, tpu.core_type = #tpu.core_type<tc>, window_params = [{transform_indices = @transform_0, window_bounds = array<i64: 1, 32, 256>}, {pipeline_mode = #tpu.pipeline_mode<synchronous>, transform_indices = @transform_1, window_bounds = array<i64: 1, 256>}, {pipeline_mode = #tpu.pipeline_mode<synchronous>, transform_indices = @transform_2, window_bounds = array<i64: 1, 256>}, {transform_indices = @transform_3, window_bounds = array<i64: 1, 32, 256>}]} {
    %c0 = arith.constant 0 : index
    %c0_0 = arith.constant 0 : index
    %c0_1 = arith.constant 0 : index
    %0 = vector.load %arg2[%c0, %c0_0, %c0_1] : memref<1x32x256xf32, #tpu.memory_space<vmem>>, vector<1x32x256xf32>
    %1 = vector.shape_cast %0 : vector<1x32x256xf32> to vector<32x256xf32>
    %c0_2 = arith.constant 0 : index
    %c0_3 = arith.constant 0 : index
    %2 = vector.load %arg3[%c0_2, %c0_3] : memref<1x256xf32, #tpu.memory_space<vmem>>, vector<1x256xf32>
    %3 = vector.broadcast %2 : vector<1x256xf32> to vector<32x256xf32>
    %4 = arith.mulf %1, %3 : vector<32x256xf32>
    %c0_4 = arith.constant 0 : index
    %c0_5 = arith.constant 0 : index
    %5 = vector.load %arg4[%c0_4, %c0_5] : memref<1x256xf32, #tpu.memory_space<vmem>>, vector<1x256xf32>
    %6 = vector.broadcast %5 : vector<1x256xf32> to vector<32x256xf32>
    %7 = arith.addf %4, %6 : vector<32x256xf32>
    %cst = arith.constant 0.000000e+00 : f32
    %8 = vector.broadcast %cst : f32 to vector<32x256xf32>
    %9 = arith.maximumf %7, %8 : vector<32x256xf32>
    %c0_6 = arith.constant 0 : index
    %c0_7 = arith.constant 0 : index
    %c0_8 = arith.constant 0 : index
    %10 = vector.load %arg5[%c0_6, %c0_7, %c0_8] : memref<1x32x256xf32, #tpu.memory_space<vmem>>, vector<1x32x256xf32>
    %11 = vector.shape_cast %10 : vector<1x32x256xf32> to vector<32x256xf32>
    %12 = vector.shape_cast %9 : vector<32x256xf32> to vector<1x32x256xf32>
    tpu.vector_store %arg5[%c0_6, %c0_7, %c0_8], %12 {strides = array<i32>} : memref<1x32x256xf32, #tpu.memory_space<vmem>>, vector<1x32x256xf32>,
    return
  }
  func.func @transform_0(%arg0: i32, %arg1: i32) -> (i32, i32, i32) {
    %c0_i32 = arith.constant 0 : i32
    %c0_i32_0 = arith.constant 0 : i32
    return %arg0, %arg1, %c0_i32 : i32, i32, i32
  }
  func.func @transform_1(%arg0: i32, %arg1: i32) -> (i32, i32) {
    %c0_i32 = arith.constant 0 : i32
    %c0_i32_0 = arith.constant 0 : i32
    %c0_i32_1 = arith.constant 0 : i32
    return %c0_i32, %c0_i32_0 : i32, i32
  }
  func.func @transform_2(%arg0: i32, %arg1: i32) -> (i32, i32) {
    %c0_i32 = arith.constant 0 : i32
    %c0_i32_0 = arith.constant 0 : i32
    %c0_i32_1 = arith.constant 0 : i32
    return %c0_i32, %c0_i32_0 : i32, i32
  }
  func.func @transform_3(%arg0: i32, %arg1: i32) -> (i32, i32, i32) {
    %c0_i32 = arith.constant 0 : i32
    %c0_i32_0 = arith.constant 0 : i32
    return %arg0, %arg1, %c0_i32 : i32, i32, i32
  }
}

</mosaic_0001>

<bundles_post_ra>
// kernel: decoder_without_concat.4
= control target key start
LH: loop header
LB: loop body
LE: loop exit
PB: predicated region body
PF: predicated region fallthrough
CT: control target
= control target key end

     0   :  { %s638_s12 = smov 0   ;;  %s733_s0 = inlined_call_operand.vmem [shape: f32[32,16], index: 0, kind: input, shape index: {}]   ;;  %s734_s1 = inlined_call_operand.vmem [shape: f32[64,128], index: 1, kind: input, shape index: {}]   ;;  %s735_s2 = inlined_call_operand.vmem [shape: f32[2,16,64], index: 2, kind: input, shape index: {}]   ;;  %s736_s3 = inlined_call_operand.vmem [shape: f32[2,34,136], index: 3, kind: output, shape index: {}]  }
   0x1 LB: > { %s510_s13 = sadd.s32 4294967295, %s615_s12   ;;  %p514_p0 = scmp.ge.s32.totalorder %s615_s12, 1  ;;  %s615_s12 = sphi %s638_s12, %s13_s12  }
   0x2   : > { %p137_p1 = scmp.lt.s32.totalorder %s615_s12, 3 }
   0x4   : > { %p138_p2 = pnand %p514_p0, %p137_p1 }
   0x5   : > { %p161_p3 = scmp.lt.s32.totalorder (!%p138_p2), %s510_s13, 1  ;;  %v171_v0 = vld [vmem:[%s733_s0] sm:$0xff] (!%p138_p2)  ;;  %vm177_vm0 = vcmask (!%p138_p2), 130048   ;;  %v276_v2 = vld [vmem:[%s734_s1 + $0x8] sm:$0xff] (!%p138_p2)  ;;  %v277_v4 = vld [vmem:[%s734_s1 + $0x10] sm:$0xff] (!%p138_p2)  ;;  %vm283_vm1 = vcmask (!%p138_p2), 523264  }
   0x6   : > { %141 = sbr.rel (%p138_p2) target bundleno = 579 (0x243), region = 32  ;;  %551 = vmatprep.mubr.msk.f32.mxu0 (!%p138_p2), %vm177_vm0, %v171_v0  ;;  %v275_v1 = vld [vmem:[%s734_s1] sm:$0xff] (!%p138_p2)  ;;  %v278_v5 = vld [vmem:[%s734_s1 + $0x18] sm:$0xff] (!%p138_p2)  ;;  %v280_v8 = vld [vmem:[%s734_s1 + $0x28] sm:$0xff] (!%p138_p2)  ;;  %s617_s17 = smov (!%p138_p2), 4   ;;  %vm397_vm2 = vcmask (!%p138_p2), 31744  }
   0x7   : > { %v583_v3 = vpack.c.bf16 (!%p138_p2), %v276_v2, %v275_v1  ;;  %v587_v6 = vpack.c.bf16 (!%p138_p2), %v278_v5, %v277_v4  ;;  %v279_v7 = vld [vmem:[%s734_s1 + $0x20] sm:$0xff] (!%p138_p2)  ;;  %v281_v13 = vld [vmem:[%s734_s1 + $0x30] sm:$0xff] (!%p138_p2)  ;;  %v282_v14 = vld [vmem:[%s734_s1 + $0x38] sm:$0xff] (!%p138_p2)  ;;  %vm414_vm3 = vcmask (!%p138_p2), 1040384   ;;  %vm444_vm4 = vcmask (!%p138_p2), 64512  }
   0x8   : > { %v591_v11 = vpack.c.bf16 (!%p138_p2), %v280_v8, %v279_v7  ;;  %v172_v15 = vld [vmem:[%s733_s0 + $0x8] sm:$0xff] (!%p138_p2)  ;;  %v595_v16 = vpack.c.bf16 (!%p138_p2), %v282_v14, %v281_v13  ;;  %v173_v17 = vld [vmem:[%s733_s0 + $0x10] sm:$0xff] (!%p138_p2)  ;;  %v174_v18 = vld [vmem:[%s733_s0 + $0x18] sm:$0xff] (!%p138_p2)  ;;  %vm453_vm5 = vcmask (!%p138_p2), 58368  }
   0x9   : > { %584 = vmatprep.subr.bf16.mxu1 (!%p138_p2), %v583_v3 }
   0xa   : > { %586 = vmatpush3.bf16.msra.mxu1 (!%p138_p2), %v583_v3 }
   0xb   : > { %588 = vmatprep.subr.bf16.mxu1 (!%p138_p2), %v587_v6 }
   0xd   : > { %s738_s13 = smov (!%p161_p3, %s510_s13), 1 }
   0xe   : > { %s528_s28 = sshll.u32 %s738_s13, 4  ;;  %590 = vmatpush3.bf16.msra.mxu1 %v587_v6  ;;  %s599_s18 = smul.u32 80, %s738_s13 }
   0xf   : > { %s165_s4 = scalar_lea.vmem %s735_s2, %s528_s28  ;;  %592 = vmatprep.subr.bf16.mxu1 %v591_v11 }
  0x10   : > { %v175_v9 = vld [vmem:[%s165_s4] sm:$0xff]  ;;  %v176_v10 = vld [vmem:[%s165_s4 + $0x8] sm:$0xff]  ;;  %s698_s21 = scalar_lea.vmem %s736_s3, %s599_s18 }
  0x11   : > { %v579_v12 = vpack.c.bf16 %v176_v10, %v175_v9 }
  0x12   : > { %594 = vmatpush3.bf16.msra.mxu1 %v591_v11 }
  0x13   : > { %580 = vmatprep.subr.bf16.mxu0 %v579_v12  ;;  %596 = vmatprep.subr.bf16.mxu1 %v595_v16 }
  0x14   : > { %582 = vmatpush3.bf16.msra.mxu0 %v579_v12 }
  0x16   : > { %598 = vmatpush3.bf16.msra.mxu1 %v595_v16 }
  0x17   : > { %552 = vmatmul.mubr.msk.f32.vlgmr.msra.gmra.mrb[0].mxu0 %vm177_vm0, %v172_v15 }
  0x18   : > { %554 = vmatprep.mubr.msk.f32.mxu0 %vm177_vm0, %v173_v17 }
  0x1b   : > { %555 = vmatmul.mubr.msk.f32.gmra.mrb[2].mxu0 %vm177_vm0, %v174_v18 }
  0xea   : > { %v553_v19 = vpop.f32.mrb[0].mxu0 }
  0xeb   : > { %v256_v20 = vpop.f32.mrb[1].mxu0 }
  0xec   : > { %573 = vmatprep.mubr.msk.f32.mxu1 %vm283_vm1, %v256_v20 }
  0xed   : > { %574 = vmatmul.mubr.msk.f32.vlgmr.msra.gmra.mrb[0].mxu1 %vm283_vm1, %v553_v19 }
  0xee   : > { %v556_v21 = vpop.f32.mrb[2].mxu0 }
  0xef   : > { %v266_v22 = vpop.f32.mrb[3].mxu0 }
  0xf0   : > { %576 = vmatprep.mubr.msk.f32.mxu1 %vm283_vm1, %v266_v22 }
  0xf1   : > { %577 = vmatmul.mubr.msk.f32.gmra.mrb[2].mxu1 %vm283_vm1, %v556_v21 }
 0x1c0   : > { %v575_v23 = vpop.f32.mrb[0].mxu1 }
 0x1c1   : > { %v362_v24 = vpop.f32.mrb[1].mxu1 }
 0x1c2   : > { %385 = vrot.lane.b32.xlu0 %v362_v24, %s617_s17 }
 0x1c4   : > { %v578_v25 = vpop.f32.mrb[2].mxu1 }
 0x1c5   : > { %v372_v26 = vpop.f32.mrb[3].mxu1 }
 0x1c6   : > { %387 = vrot.lane.b32.xlu0 %v575_v23, %s617_s17  ;;  %389 = vrot.lane.b32.xlu1 %v372_v26, %s617_s17 }
 0x1ca   : > { %391 = vrot.lane.b32.xlu1 %v578_v25, %s617_s17 }
 0x234   : > { %v386_v27 = vpop.permute.xlu0 %385 }
 0x235   : > { %v398_v28 = vsel %vm397_vm2, 0.0, %v386_v27  ;;  %v402_v29 = vsel %vm397_vm2, %v386_v27, 0.0 }
 0x236   : > { %v415_v30 = vrot.slane %v398_v28, 7  ;;  %v416_v31 = vrot.slane %v402_v29, 7 }
 0x238   : > { %v439_v32 = vsel %vm414_vm3, 0.0, %v415_v30  ;;  %v440_v33 = vsel %vm414_vm3, 0.0, %v416_v31  ;;  %v388_v34 = vpop.permute.xlu0 %387  ;;  %v390_v35 = vpop.permute.xlu1 %389 }
 0x239   : > { %443 = vst [vmem:[%s698_s21] sm:$0xff] %v439_v32  ;;  %445 = vst.msk [vmem:[%s698_s21 + $0x8] sm:$0xff] %vm444_vm4, %v440_v33  ;;  %v399_v36 = vsel %vm397_vm2, 0.0, %v388_v34  ;;  %v403_v37 = vsel %vm397_vm2, %v388_v34, 0.0  ;;  %v400_v38 = vsel %vm397_vm2, 0.0, %v390_v35  ;;  %v404_v39 = vsel %vm397_vm2, %v390_v35, 0.0 }
 0x23a   : > { %v417_v40 = vrot.slane %v399_v36, 7  ;;  %v419_v41 = vrot.slane %v403_v37, 7  ;;  %v421_v42 = vrot.slane %v400_v38, 7  ;;  %v423_v43 = vrot.slane %v404_v39, 7 }
 0x23c   : > { %v418_v44 = vsel %vm414_vm3, %v415_v30, %v417_v40  ;;  %v420_v45 = vsel %vm414_vm3, %v416_v31, %v419_v41  ;;  %v422_v46 = vsel %vm414_vm3, %v417_v40, %v421_v42  ;;  %v424_v47 = vsel %vm414_vm3, %v419_v41, %v423_v43  ;;  %v392_v48 = vpop.permute.xlu1 %391 }
 0x23d   : > { %446 = vst [vmem:[%s698_s21 + $0x10] sm:$0xff] %v418_v44  ;;  %447 = vst.msk [vmem:[%s698_s21 + $0x18] sm:$0xff] %vm444_vm4, %v420_v45  ;;  %v401_v49 = vsel %vm397_vm2, 0.0, %v392_v48  ;;  %v405_v50 = vsel %vm397_vm2, %v392_v48, 0.0 }
 0x23e   : > { %448 = vst [vmem:[%s698_s21 + $0x20] sm:$0xff] %v422_v46  ;;  %449 = vst.msk [vmem:[%s698_s21 + $0x28] sm:$0xff] %vm444_vm4, %v424_v47  ;;  %v425_v51 = vrot.slane %v401_v49, 7  ;;  %v427_v52 = vrot.slane %v405_v50, 7 }
 0x240   : > { %v426_v53 = vsel %vm414_vm3, %v421_v42, %v425_v51  ;;  %v428_v54 = vsel %vm414_vm3, %v423_v43, %v427_v52  ;;  %v441_v55 = vsel %vm414_vm3, %v425_v51, 0.0  ;;  %v442_v56 = vsel %vm414_vm3, %v427_v52, 0.0 }
 0x241   : > { %450 = vst [vmem:[%s698_s21 + $0x30] sm:$0xff] %v426_v53  ;;  %451 = vst.msk [vmem:[%s698_s21 + $0x38] sm:$0xff] %vm444_vm4, %v428_v54 }
 0x242   : > { %452 = vst [vmem:[%s698_s21 + $0x40] sm:$0x3] %v441_v55  ;;  %454 = vst.msk [vmem:[%s698_s21 + $0x48] sm:$0x3] %vm453_vm5, %v442_v56 }
 0x243 PF: > { %s13_s12 = sadd.s32 1, %s615_s12  }
 0x244   : > { %p10_p4 = scmp.ge.s32.totalorder %s13_s12, 4  }
 0x246   :  { %12 = sbr.rel (!%p10_p4) target bundleno = 1 (0x1), region = 62 }

// kernel: decoder_without_concat.5
= control target key start
LH: loop header
LB: loop body
LE: loop exit
PB: predicated region body
PF: predicated region fallthrough
CT: control target
= control target key end

     0   :  { %s1665_s21 = smov 0   ;;  %s1667_s22 = smov 0   ;;  %s2349_s0 = inlined_call_operand.vmem [shape: f32[2,34,136], index: 0, kind: input, shape index: {}]   ;;  %s2350_s1 = inlined_call_operand.vmem [shape: f32[3,136,256], index: 1, kind: input, shape index: {}]   ;;  %s2351_s2 = inlined_call_operand.vmem [shape: f32[256,8], index: 2, kind: input, shape index: {}]   ;;  %s2352_s3 = inlined_call_operand.vmem [shape: f32[1,136], index: 3, kind: input, shape index: {}]   ;;  %s2353_s4 = inlined_call_operand.vmem [shape: f32[1,136], index: 4, kind: input, shape index: {}]   ;;  %s2354_s5 = inlined_call_operand.vmem [shape: f32[2,34,272], index: 5, kind: output, shape index: {0}]   ;;  %s2355_s6 = inlined_call_operand.vmem [shape: f32[2,1,2,8], index: 6, kind: output, shape index: {1}]  }
   0x1   :  { %s1669_s23 = smov 0  }
   0x2 LB: > { %s29_s3 = sadd.s32 1, %s1623_s22  ;;  %p1212_p0 = scmp.ge.s32.totalorder %s1627_s23, 1  ;;  %s1627_s23 = sphi %s1669_s23, %s17_s23   ;;  %s1623_s22 = sphi %s1667_s22, %s2357_s22   ;;  %s1619_s21 = sphi %s1665_s21, %s2356_s21  }
   0x3   : > { %p31_p1 = scmp.ge.s32.totalorder %s29_s3, 2  ;;  %p229_p2 = scmp.lt.s32.totalorder %s1627_s23, 3 }
   0x5   : > { %s2359_s3 = smov (%p31_p1, %s29_s3), 0  ;;  %p230_p3 = pnand %p1212_p0, %p229_p2 }
   0x6   : > { %v294_v0 = vld [vmem:[%s2350_s1 + $0x8] sm:$0xff] (!%p230_p3)  ;;  %v296_v1 = vld [vmem:[%s2350_s1 + $0x18] sm:$0xff] (!%p230_p3)  ;;  %v293_v2 = vld [vmem:[%s2350_s1] sm:$0xff] (!%p230_p3)  ;;  %p266_p4 = scmp.lt.s32.totalorder (!%p230_p3), %s1619_s21, 1  ;;  %vm395_vm0 = vcmask (!%p230_p3), 64512   ;;  %vm372_vm1 = vcmask (!%p230_p3), 1046528  }
   0x7   : > { %233 = sbr.rel (%p230_p3) target bundleno = 565 (0x235), region = 40  ;;  %v1418_v3 = vpack.c.bf16 (!%p230_p3), %v296_v1, %v294_v0  ;;  %v295_v4 = vld [vmem:[%s2350_s1 + $0x10] sm:$0xff] (!%p230_p3)  ;;  %v298_v5 = vld [vmem:[%s2350_s1 + $0x28] sm:$0xff] (!%p230_p3)  ;;  %v300_v6 = vld [vmem:[%s2350_s1 + $0x38] sm:$0xff] (!%p230_p3)  ;;  %vm625_vm2 = vcmask (!%p230_p3), 1045504   ;;  %s1629_s15 = smov (!%p230_p3), 8  }
   0x8   : > { %v1420_v7 = vpack.c.bf16 (!%p230_p3), %v295_v4, %v293_v2  ;;  %v1422_v8 = vpack.c.bf16 (!%p230_p3), %v300_v6, %v298_v5  ;;  %v297_v9 = vld [vmem:[%s2350_s1 + $0x20] sm:$0xff] (!%p230_p3)  ;;  %v299_v10 = vld [vmem:[%s2350_s1 + $0x30] sm:$0xff] (!%p230_p3)  ;;  %v302_v11 = vld [vmem:[%s2350_s1 + $0x48] sm:$0xff] (!%p230_p3)  ;;  %vm989_vm3 = vcmask (!%p230_p3), 1040384   ;;  %vm1089_vm4 = vcmask (!%p230_p3), 130048  }
   0x9   : > { %1419 = vmatprep.subr.bf16.mxu0 (!%p230_p3), %v1418_v3  ;;  %v304_v12 = vld [vmem:[%s2350_s1 + $0x58] sm:$0xff] (!%p230_p3)  ;;  %v1424_v13 = vpack.c.bf16 (!%p230_p3), %v299_v10, %v297_v9  ;;  %v301_v15 = vld [vmem:[%s2350_s1 + $0x40] sm:$0xff] (!%p230_p3)  ;;  %v303_v16 = vld [vmem:[%s2350_s1 + $0x50] sm:$0xff] (!%p230_p3)  ;;  %vm1102_vm5 = vcmask (!%p230_p3), 123904   ;;  %vm991_vm6 = vcmask (!%p230_p3), 58368  }
   0xa   : > { %1421 = vmatpush1.bf16.msra.mxu0 (!%p230_p3), %v1420_v7  ;;  %v1426_v14 = vpack.c.bf16 (!%p230_p3), %v304_v12, %v302_v11  ;;  %v306_v17 = vld [vmem:[%s2350_s1 + $0x68] sm:$0xff] (!%p230_p3)  ;;  %v308_v18 = vld [vmem:[%s2350_s1 + $0x78] sm:$0xff] (!%p230_p3)  ;;  %v1428_v19 = vpack.c.bf16 (!%p230_p3), %v303_v16, %v301_v15  ;;  %v305_v21 = vld [vmem:[%s2350_s1 + $0x60] sm:$0xff] (!%p230_p3) }
   0xb   : > { %1423 = vmatprep.subr.bf16.mxu0 (!%p230_p3), %v1422_v8  ;;  %v1430_v20 = vpack.c.bf16 (!%p230_p3), %v308_v18, %v306_v17  ;;  %v307_v22 = vld [vmem:[%s2350_s1 + $0x70] sm:$0xff] (!%p230_p3)  ;;  %v310_v23 = vld [vmem:[%s2350_s1 + $0x88] sm:$0xff] (!%p230_p3)  ;;  %v312_v24 = vld [vmem:[%s2350_s1 + $0x98] sm:$0xff] (!%p230_p3) }
   0xc   : > { %v1217_v25 = vld [vmem:[%s2350_s1 + $0x118] sm:$0xff] (!%p230_p3)  ;;  %v1219_v26 = vld [vmem:[%s2350_s1 + $0x128] sm:$0xff] (!%p230_p3)  ;;  %v1432_v27 = vpack.c.bf16 (!%p230_p3), %v307_v22, %v305_v21  ;;  %v1216_v29 = vld [vmem:[%s2350_s1 + $0x110] sm:$0xff] (!%p230_p3)  ;;  %v1434_v32 = vpack.c.bf16 (!%p230_p3), %v312_v24, %v310_v23 }
   0xd   : > { %v1386_v28 = vpack.c.bf16 (!%p230_p3), %v1219_v26, %v1217_v25  ;;  %v1218_v30 = vld [vmem:[%s2350_s1 + $0x120] sm:$0xff] (!%p230_p3)  ;;  %v311_v34 = vld [vmem:[%s2350_s1 + $0x90] sm:$0xff] (!%p230_p3)  ;;  %v314_v36 = vld [vmem:[%s2350_s1 + $0xa8] sm:$0xff] (!%p230_p3) }
   0xe   : > { %s2361_s21 = smov (!%p266_p4, %s1619_s21), 1  ;;  %1425 = vmatpush1.bf16.msra.mxu0 %v1424_v13  ;;  %v309_v33 = vld [vmem:[%s2350_s1 + $0x80] sm:$0xff]  ;;  %v1388_v35 = vpack.c.bf16 %v1218_v30, %v1216_v29  ;;  %v316_v37 = vld [vmem:[%s2350_s1 + $0xb8] sm:$0xff]  ;;  %v1223_v39 = vld [vmem:[%s2350_s1 + $0x148] sm:$0xff] }
   0xf   : > { %s1578_s25 = smul.u32 80, %s2361_s21  ;;  %1427 = vmatprep.subr.bf16.mxu0 %v1426_v14  ;;  %1387 = vmatprep.subr.bf16.mxu1 %v1386_v28  ;;  %v1221_v38 = vld [vmem:[%s2350_s1 + $0x138] sm:$0xff]  ;;  %v1220_v40 = vld [vmem:[%s2350_s1 + $0x130] sm:$0xff]  ;;  %v1222_v41 = vld [vmem:[%s2350_s1 + $0x140] sm:$0xff]  ;;  %v1436_v42 = vpack.c.bf16 %v311_v34, %v309_v33  ;;  %v1438_v47 = vpack.c.bf16 %v316_v37, %v314_v36  ;;  %s1215_s19 = sshll.u32 %s2361_s21, 1 }
  0x10   : > { %1389 = vmatpush1.bf16.msra.mxu1 %v1388_v35  ;;  %v313_v43 = vld [vmem:[%s2350_s1 + $0xa0] sm:$0xff]  ;;  %v315_v44 = vld [vmem:[%s2350_s1 + $0xb0] sm:$0xff]  ;;  %v1390_v45 = vpack.c.bf16 %v1223_v39, %v1221_v38  ;;  %v1392_v46 = vpack.c.bf16 %v1222_v41, %v1220_v40  ;;  %v318_v48 = vld [vmem:[%s2350_s1 + $0xc8] sm:$0xff]  ;;  %s1579_s16 = smul.u32 120, %s2361_s21  ;;  %s282_s24 = scalar_lea.vmem %s2355_s6, %s1215_s19 }
  0x11   : > { %s1737_s12 = scalar_lea.vmem %s2349_s0, %s1578_s25  ;;  %v1225_v49 = vld [vmem:[%s2350_s1 + $0x158] sm:$0xff]  ;;  %v1227_v50 = vld [vmem:[%s2350_s1 + $0x168] sm:$0xff]  ;;  %v1224_v53 = vld [vmem:[%s2350_s1 + $0x150] sm:$0xff]  ;;  %v1440_v56 = vpack.c.bf16 %v315_v44, %v313_v43 }
  0x12   : > { %1429 = vmatpush1.bf16.msra.mxu0 %v1428_v19  ;;  %v1758_v31 = vld [vmem:[%s1737_s12 + $0x8] sm:$0xff]  ;;  %v320_v51 = vld [vmem:[%s2350_s1 + $0xd8] sm:$0xff]  ;;  %1391 = vmatprep.subr.bf16.mxu1 %v1390_v45  ;;  %v1394_v52 = vpack.c.bf16 %v1227_v50, %v1225_v49  ;;  %v1226_v54 = vld [vmem:[%s2350_s1 + $0x160] sm:$0xff] }
  0x13   : > { %1431 = vmatprep.subr.bf16.mxu0 %v1430_v20  ;;  %1254 = vmatprep.mubr.msk.f32.mxu0 %vm395_vm0, %v1758_v31  ;;  %v1396_v55 = vpack.c.bf16 %v1226_v54, %v1224_v53  ;;  %v1229_v57 = vld [vmem:[%s2350_s1 + $0x178] sm:$0xff]  ;;  %v1231_v58 = vld [vmem:[%s2350_s1 + $0x188] sm:$0xff]  ;;  %v1228_v59 = vld [vmem:[%s2350_s1 + $0x170] sm:$0xff]  ;;  %v1442_v60 = vpack.c.bf16 %v320_v51, %v318_v48  ;;  %v376_v15 = vrot.slane %v1758_v31, 1 }
  0x14   : > { %1393 = vmatpush1.bf16.msra.mxu1 %v1392_v46  ;;  %v317_v61 = vld [vmem:[%s2350_s1 + $0xc0] sm:$0xff]  ;;  %v319_v62 = vld [vmem:[%s2350_s1 + $0xd0] sm:$0xff]  ;;  %v1398_v63 = vpack.c.bf16 %v1231_v58, %v1229_v57  ;;  %v322_v1 = vld [vmem:[%s2350_s1 + $0xe8] sm:$0xff] }
  0x15   : > { %1395 = vmatprep.subr.bf16.mxu1 %v1394_v52  ;;  %v1230_v0 = vld [vmem:[%s2350_s1 + $0x180] sm:$0xff]  ;;  %v324_v2 = vld [vmem:[%s2350_s1 + $0xf8] sm:$0xff]  ;;  %v1235_v5 = vld [vmem:[%s2350_s1 + $0x1a8] sm:$0xff]  ;;  %v1444_v6 = vpack.c.bf16 %v319_v62, %v317_v61 }
  0x16   : > { %1433 = vmatpush1.bf16.msra.mxu0 %v1432_v27  ;;  %v1233_v3 = vld [vmem:[%s2350_s1 + $0x198] sm:$0xff]  ;;  %v1400_v4 = vpack.c.bf16 %v1230_v0, %v1228_v59  ;;  %v321_v7 = vld [vmem:[%s2350_s1 + $0xe0] sm:$0xff]  ;;  %v1232_v9 = vld [vmem:[%s2350_s1 + $0x190] sm:$0xff]  ;;  %v1446_v11 = vpack.c.bf16 %v324_v2, %v322_v1 }
  0x17   : > { %1435 = vmatprep.subr.bf16.mxu0 %v1434_v32  ;;  %v1402_v8 = vpack.c.bf16 %v1235_v5, %v1233_v3  ;;  %v1234_v10 = vld [vmem:[%s2350_s1 + $0x1a0] sm:$0xff]  ;;  %v323_v12 = vld [vmem:[%s2350_s1 + $0xf0] sm:$0xff]  ;;  %v1237_v13 = vld [vmem:[%s2350_s1 + $0x1b8] sm:$0xff] }
  0x18   : > { %1397 = vmatpush1.bf16.msra.mxu1 %v1396_v55  ;;  %v1239_v14 = vld [vmem:[%s2350_s1 + $0x1c8] sm:$0xff]  ;;  %v1404_v16 = vpack.c.bf16 %v1234_v10, %v1232_v9  ;;  %v1860_v17 = vld [vmem:[%s1737_s12 + $0x18] sm:$0xff]  ;;  %v1448_v18 = vpack.c.bf16 %v323_v12, %v321_v7  ;;  %v1236_v20 = vld [vmem:[%s2350_s1 + $0x1b0] sm:$0xff] }
  0x19   : > { %1399 = vmatprep.subr.bf16.mxu1 %v1398_v63  ;;  %v1406_v19 = vpack.c.bf16 %v1239_v14, %v1237_v13  ;;  %v1238_v21 = vld [vmem:[%s2350_s1 + $0x1c0] sm:$0xff]  ;;  %v377_v22 = vrot.slane %v1860_v17, 1  ;;  %v1241_v23 = vld [vmem:[%s2350_s1 + $0x1d8] sm:$0xff]  ;;  %v1243_v24 = vld [vmem:[%s2350_s1 + $0x1e8] sm:$0xff]  ;;  %v630_v12 = vrot.slane %v1860_v17, 2 }
  0x1a   : > { %1437 = vmatpush1.bf16.msra.mxu0 %v1436_v42  ;;  %v326_v25 = vld [vmem:[%s2350_s1 + $0x108] sm:$0xff]  ;;  %v1261_v27 = vld [vmem:[%s2350_s1 + $0x238] sm:$0xff]  ;;  %v1258_v29 = vld [vmem:[%s2350_s1 + $0x220] sm:$0xff]  ;;  %v1408_v33 = vpack.c.bf16 %v1238_v21, %v1236_v20  ;;  %v1410_v35 = vpack.c.bf16 %v1243_v24, %v1241_v23 }
  0x1b   : > { %1439 = vmatprep.subr.bf16.mxu0 %v1438_v47  ;;  %v1259_v26 = vld [vmem:[%s2350_s1 + $0x228] sm:$0xff]  ;;  %v378_v28 = vsel %vm372_vm1, %v376_v15, %v377_v22  ;;  %v1260_v30 = vld [vmem:[%s2350_s1 + $0x230] sm:$0xff]  ;;  %v1265_v34 = vld [vmem:[%s2350_s1 + $0x258] sm:$0xff] }
  0x1c   : > { %1401 = vmatpush1.bf16.msra.mxu1 %v1400_v4  ;;  %v1263_v32 = vld [vmem:[%s2350_s1 + $0x248] sm:$0xff]  ;;  %1250 = vmatprep.mubr.msk.f32.mxu1 %vm395_vm0, %v378_v28  ;;  %v1240_v36 = vld [vmem:[%s2350_s1 + $0x1d0] sm:$0xff]  ;;  %v1242_v37 = vld [vmem:[%s2350_s1 + $0x1e0] sm:$0xff]  ;;  %v1450_v39 = vpack.c.bf16 %v1261_v27, %v1259_v26  ;;  %v1452_v43 = vpack.c.bf16 %v1260_v30, %v1258_v29 }
  0x1d   : > { %1403 = vmatprep.subr.bf16.mxu1 %v1402_v8  ;;  %v325_v38 = vld [vmem:[%s2350_s1 + $0x100] sm:$0xff]  ;;  %v1245_v40 = vld [vmem:[%s2350_s1 + $0x1f8] sm:$0xff]  ;;  %v1247_v41 = vld [vmem:[%s2350_s1 + $0x208] sm:$0xff]  ;;  %v1454_v44 = vpack.c.bf16 %v1265_v34, %v1263_v32  ;;  %v1412_v48 = vpack.c.bf16 %v1242_v37, %v1240_v36  ;;  %v629_v8 = vrot.slane %v1758_v31, 2 }
  0x1e   : > { %1441 = vmatpush1.bf16.msra.mxu0 %v1440_v56  ;;  %v1916_v42 = vld [vmem:[%s1737_s12] sm:$0xff]  ;;  %v1264_v46 = vld [vmem:[%s2350_s1 + $0x250] sm:$0xff]  ;;  %v1267_v47 = vld [vmem:[%s2350_s1 + $0x268] sm:$0xff]  ;;  %v1414_v50 = vpack.c.bf16 %v1247_v41, %v1245_v40 }
  0x1f   : > { %1443 = vmatprep.subr.bf16.mxu0 %v1442_v60  ;;  %v1262_v45 = vld [vmem:[%s2350_s1 + $0x240] sm:$0xff]  ;;  %v1269_v49 = vld [vmem:[%s2350_s1 + $0x278] sm:$0xff]  ;;  %v1244_v51 = vld [vmem:[%s2350_s1 + $0x1f0] sm:$0xff]  ;;  %v373_v62 = vrot.slane %v1916_v42, 1  ;;  %v631_v32 = vsel %vm625_vm2, %v629_v8, %v630_v12 }
  0x20   : > { %1405 = vmatpush1.bf16.msra.mxu1 %v1404_v16  ;;  %v1246_v52 = vld [vmem:[%s2350_s1 + $0x200] sm:$0xff]  ;;  %v1456_v53 = vpack.c.bf16 %v1264_v46, %v1262_v45  ;;  %v1940_v54 = vld [vmem:[%s1737_s12 + $0x10] sm:$0xff]  ;;  %v1458_v55 = vpack.c.bf16 %v1269_v49, %v1267_v47  ;;  %v1949_v58 = vld [vmem:[%s1737_s12 + $0x28] sm:$0xff] }
  0x21   : > { %1407 = vmatprep.subr.bf16.mxu1 %v1406_v19  ;;  %v1266_v56 = vld [vmem:[%s2350_s1 + $0x260] sm:$0xff]  ;;  %v1268_v57 = vld [vmem:[%s2350_s1 + $0x270] sm:$0xff]  ;;  %v1416_v59 = vpack.c.bf16 %v1246_v52, %v1244_v51  ;;  %v1271_v60 = vld [vmem:[%s2350_s1 + $0x288] sm:$0xff]  ;;  %v374_v63 = vrot.slane %v1940_v54, 1 }
  0x22   : > { %1445 = vmatpush1.bf16.msra.mxu0 %v1444_v6  ;;  %v1273_v61 = vld [vmem:[%s2350_s1 + $0x298] sm:$0xff]  ;;  %v769_v1 = vld [vmem:[%s2351_s2 + $0x80] sm:$0xff]  ;;  %v770_v2 = vld [vmem:[%s2351_s2 + $0x88] sm:$0xff]  ;;  %v1460_v3 = vpack.c.bf16 %v1268_v57, %v1266_v56  ;;  %v381_v6 = vrot.slane %v1949_v58, 1 }
  0x23   : > { %1447 = vmatprep.subr.bf16.mxu0 %v1446_v11  ;;  %v1249_v0 = vld [vmem:[%s2350_s1 + $0x218] sm:$0xff]  ;;  %v1270_v4 = vld [vmem:[%s2350_s1 + $0x280] sm:$0xff]  ;;  %v1272_v5 = vld [vmem:[%s2350_s1 + $0x290] sm:$0xff]  ;;  %v1462_v9 = vpack.c.bf16 %v1273_v61, %v1271_v60  ;;  %v1995_v14 = vpack.c.bf16 %v770_v2, %v769_v1  ;;  %v375_v19 = vsel %vm372_vm1, %v373_v62, %v374_v63 }
  0x24   : > { %1409 = vmatpush1.bf16.msra.mxu1 %v1408_v33  ;;  %v1979_v7 = vld [vmem:[%s1737_s12 + $0x20] sm:$0xff]  ;;  %v1275_v10 = vld [vmem:[%s2350_s1 + $0x2a8] sm:$0xff]  ;;  %v1277_v11 = vld [vmem:[%s2350_s1 + $0x2b8] sm:$0xff]  ;;  %v1464_v23 = vpack.c.bf16 %v1272_v5, %v1270_v4  ;;  %v382_v27 = vsel %vm372_vm1, %v377_v22, %v381_v6 }
  0x25   : > { %1411 = vmatprep.subr.bf16.mxu1 %v1410_v35  ;;  %v1990_v13 = vld [vmem:[%s1737_s12 + $0x38] sm:$0xff]  ;;  %v1248_v31 = vld [vmem:[%s2350_s1 + $0x210] sm:$0xff]  ;;  %v753_v15 = vld [vmem:[%s2351_s2] sm:$0xff]  ;;  %v1466_v28 = vpack.c.bf16 %v1277_v11, %v1275_v10 }
  0x26   : > { %1449 = vmatpush1.bf16.msra.mxu0 %v1448_v18  ;;  %v754_v16 = vld [vmem:[%s2351_s2 + $0x8] sm:$0xff]  ;;  %v379_v18 = vrot.slane %v1979_v7, 1  ;;  %v771_v20 = vld [vmem:[%s2351_s2 + $0x90] sm:$0xff]  ;;  %v772_v21 = vld [vmem:[%s2351_s2 + $0x98] sm:$0xff] }
  0x27   : > { %533 = vmatprep.subr.mxu0 %v326_v25  ;;  %v1274_v24 = vld [vmem:[%s2350_s1 + $0x2a0] sm:$0xff]  ;;  %v385_v25 = vrot.slane %v1990_v13, 1  ;;  %v2019_v26 = vld [vmem:[%s1737_s12 + $0x30] sm:$0xff]  ;;  %v1279_v30 = vld [vmem:[%s2350_s1 + $0x2c8] sm:$0xff]  ;;  %v2036_v34 = vpack.c.bf16 %v754_v16, %v753_v15  ;;  %v2042_v35 = vpack.c.bf16 %v772_v21, %v771_v20 }
  0x28   : > { %1413 = vmatpush1.bf16.msra.mxu1 %v1412_v48  ;;  %v1276_v29 = vld [vmem:[%s2350_s1 + $0x2b0] sm:$0xff]  ;;  %v2034_v33 = vld [vmem:[%s1737_s12 + $0x48] sm:$0x3]  ;;  %v1281_v22 = vld [vmem:[%s2350_s1 + $0x2d8] sm:$0xff] }
  0x29   : > { %1415 = vmatprep.subr.bf16.mxu1 %v1414_v50  ;;  %v755_v36 = vld [vmem:[%s2351_s2 + $0x10] sm:$0xff]  ;;  %v756_v37 = vld [vmem:[%s2351_s2 + $0x18] sm:$0xff]  ;;  %v773_v40 = vld [vmem:[%s2351_s2 + $0xa0] sm:$0xff]  ;;  %v389_v45 = vrot.slane %v2034_v33, 1  ;;  %v1470_v47 = vpack.c.bf16 %v1281_v22, %v1279_v30  ;;  %v626_v30 = vrot.slane %v1916_v42, 2 }
  0x2a   : > { %534 = vmatpush1.msra.mxu0 %v325_v38  ;;  %v383_v38 = vrot.slane %v2019_v26, 1  ;;  %v774_v41 = vld [vmem:[%s2351_s2 + $0xa8] sm:$0xff]  ;;  %v2064_v46 = vld [vmem:[%s1737_s12 + $0x40] sm:$0x3]  ;;  %v1280_v49 = vld [vmem:[%s2350_s1 + $0x2d0] sm:$0xff]  ;;  %v2076_v51 = vpack.c.bf16 %v756_v37, %v755_v36  ;;  %v634_v37 = vrot.slane %v1949_v58, 2  ;;  %s2280_s12 = scalar_lea.vmem %s2354_s5, %s1579_s16 }
  0x2b   : > { %1451 = vmatprep.subr.bf16.mxu0 %v1450_v39  ;;  %566 = vmatmul.mubr.f32.vlgmr.msra.gmra.mrb[0].mxu0 %v1916_v42  ;;  %v380_v39 = vsel %vm372_vm1, %v374_v63, %v379_v18  ;;  %v1278_v48 = vld [vmem:[%s2350_s1 + $0x2c0] sm:$0xff]  ;;  %v1283_v50 = vld [vmem:[%s2350_s1 + $0x2e8] sm:$0xff]  ;;  %v1285_v52 = vld [vmem:[%s2350_s1 + $0x2f8] sm:$0xff]  ;;  %v390_v63 = vsel %vm372_vm1, %v385_v25, %v389_v45 }
  0x2c   : > { %1453 = vmatpush1.bf16.msra.mxu0 %v1452_v43  ;;  %1255 = vmatprep.mubr.msk.f32.mxu0 %vm395_vm0, %v1860_v17  ;;  %v1468_v43 = vpack.c.bf16 %v1276_v29, %v1274_v24  ;;  %v758_v56 = vld [vmem:[%s2351_s2 + $0x28] sm:$0xff]  ;;  %v384_v57 = vsel %vm372_vm1, %v379_v18, %v383_v38  ;;  %v775_v60 = vld [vmem:[%s2351_s2 + $0xb0] sm:$0xff]  ;;  %v776_v61 = vld [vmem:[%s2351_s2 + $0xb8] sm:$0xff]  ;;  %v1472_v62 = vpack.c.bf16 %v1280_v49, %v1278_v48  ;;  %v636_v17 = vrot.slane %v2019_v26, 2 }
  0x2d   : > { %1455 = vmatprep.subr.bf16.mxu0 %v1454_v44  ;;  %1417 = vmatpush1.bf16.msra.mxu1 %v1416_v59  ;;  %v386_v44 = vsel %vm372_vm1, %v381_v6, %v385_v25  ;;  %v387_v59 = vrot.slane %v2064_v46, 1  ;;  %v1282_v1 = vld [vmem:[%s2350_s1 + $0x2e0] sm:$0xff]  ;;  %v1284_v2 = vld [vmem:[%s2350_s1 + $0x2f0] sm:$0xff]  ;;  %v1289_v5 = vld [vmem:[%s2350_s1 + $0x318] sm:$0xff]  ;;  %v2116_v6 = vpack.c.bf16 %v776_v61, %v775_v60  ;;  %v642_v49 = vrot.slane %v2034_v33, 2 }
  0x2e   : > { %436 = vmatprep.subr.mxu1 %v1249_v0  ;;  %v1474_v0 = vpack.c.bf16 %v1285_v52, %v1283_v50  ;;  %v759_v8 = vld [vmem:[%s2351_s2 + $0x30] sm:$0xff]  ;;  %v777_v11 = vld [vmem:[%s2351_s2 + $0xc0] sm:$0xff]  ;;  %v1476_v15 = vpack.c.bf16 %v1284_v2, %v1282_v1  ;;  %v762_v24 = vld [vmem:[%s2351_s2 + $0x48] sm:$0xff]  ;;  %v640_v52 = vrot.slane %v2064_v46, 2 }
  0x2f   : > { %572 = vmatmul.mubr.f32.gmra.mrb[2].mxu0 %v1940_v54  ;;  %v388_v10 = vsel %vm372_vm1, %v383_v38, %v387_v59  ;;  %v1286_v18 = vld [vmem:[%s2350_s1 + $0x300] sm:$0xff]  ;;  %v779_v25 = vld [vmem:[%s2351_s2 + $0xd0] sm:$0xff]  ;;  %v1291_v22 = vld [vmem:[%s2350_s1 + $0x328] sm:$0xff] }
  0x30   : > { %1457 = vmatpush1.bf16.msra.mxu0 %v1456_v53  ;;  %1256 = vmatprep.mubr.msk.f32.mxu0 %vm395_vm0, %v1949_v58  ;;  %v2082_v53 = vpack.c.bf16 %v774_v41, %v773_v40  ;;  %v763_v38 = vld [vmem:[%s2351_s2 + $0x50] sm:$0xff]  ;;  %v764_v42 = vld [vmem:[%s2351_s2 + $0x58] sm:$0xff]  ;;  %v781_v58 = vld [vmem:[%s2351_s2 + $0xe0] sm:$0xff]  ;;  %v632_v40 = vrot.slane %v1979_v7, 2  ;;  %v641_v33 = vsel %vm625_vm2, %v636_v17, %v640_v52 }
  0x31   : > { %1459 = vmatprep.subr.bf16.mxu0 %v1458_v55  ;;  %437 = vmatpush1.msra.mxu1 %v1248_v31  ;;  %v757_v55 = vld [vmem:[%s2351_s2 + $0x20] sm:$0xff]  ;;  %v778_v31 = vld [vmem:[%s2351_s2 + $0xc8] sm:$0xff]  ;;  %v2191_v45 = vpack.c.bf16 %v764_v42, %v763_v38  ;;  %v783_v46 = vld [vmem:[%s2351_s2 + $0xf0] sm:$0xff] }
  0x32   : > { %469 = vmatmul.mubr.f32.vlgmr.msra.gmra.mrb[0].mxu1 %v375_v19  ;;  %1483 = vmatprep.subr.bf16.mxu1 %v1995_v14  ;;  %v2110_v4 = vpack.c.bf16 %v758_v56, %v757_v55  ;;  %v1288_v19 = vld [vmem:[%s2350_s1 + $0x310] sm:$0xff]  ;;  %v2142_v21 = vpack.c.bf16 %v778_v31, %v777_v11  ;;  %v765_v48 = vld [vmem:[%s2351_s2 + $0x60] sm:$0xff]  ;;  %v784_v56 = vld [vmem:[%s2351_s2 + $0xf8] sm:$0xff] }
  0x33   : > { %578 = vmatmul.mubr.f32.gmra.mrb[4].mxu0 %v1979_v7  ;;  %1251 = vmatprep.mubr.msk.f32.mxu1 %vm395_vm0, %v382_v27  ;;  %v780_v27 = vld [vmem:[%s2351_s2 + $0xd8] sm:$0xff]  ;;  %v766_v7 = vld [vmem:[%s2351_s2 + $0x68] sm:$0xff]  ;;  %v767_v59 = vld [vmem:[%s2351_s2 + $0x70] sm:$0xff] }
  0x34   : > { %1461 = vmatpush1.bf16.msra.mxu0 %v1460_v3  ;;  %1257 = vmatprep.mubr.msk.f32.mxu0 %vm395_vm0, %v1990_v13  ;;  %v1287_v3 = vld [vmem:[%s2350_s1 + $0x308] sm:$0xff]  ;;  %v2165_v36 = vpack.c.bf16 %v780_v27, %v779_v25  ;;  %v2210_v50 = vpack.c.bf16 %v766_v7, %v765_v48  ;;  %v768_v60 = vld [vmem:[%s2351_s2 + $0x78] sm:$0xff] }
  0x35   : > { %1463 = vmatprep.subr.bf16.mxu0 %v1462_v9  ;;  %1485 = vmatpush3.bf16.msra.mxu1 %v2036_v34  ;;  %v760_v9 = vld [vmem:[%s2351_s2 + $0x38] sm:$0xff]  ;;  %v1478_v16 = vpack.c.bf16 %v1289_v5, %v1287_v3  ;;  %v2245_v61 = vpack.c.bf16 %v768_v60, %v767_v59 }
  0x36   : > { %475 = vmatmul.mubr.f32.gmra.mrb[2].mxu1 %v380_v39  ;;  %1487 = vmatprep.subr.bf16.mxu1 %v2042_v35  ;;  %v2139_v20 = vpack.c.bf16 %v760_v9, %v759_v8  ;;  %v782_v39 = vld [vmem:[%s2351_s2 + $0xe8] sm:$0xff] }
  0x37   : > { %584 = vmatmul.mubr.f32.gmra.mrb[6].mxu0 %v2019_v26  ;;  %1252 = vmatprep.mubr.msk.f32.mxu1 %vm395_vm0, %v386_v44  ;;  %v635_v44 = vsel %vm625_vm2, %v630_v12, %v634_v37  ;;  %v637_v26 = vsel %vm625_vm2, %v632_v40, %v636_v17 }
  0x38   : > { %1465 = vmatpush1.bf16.msra.mxu0 %v1464_v23  ;;  %1292 = vmatprep.mubr.msk.f32.mxu0 %vm395_vm0, %v631_v32  ;;  %v761_v23 = vld [vmem:[%s2351_s2 + $0x40] sm:$0xff]  ;;  %v627_v32 = vrot.slane %v1940_v54, 2 }
  0x39   : > { %1467 = vmatprep.subr.bf16.mxu0 %v1466_v28  ;;  %1489 = vmatpush3.bf16.msra.mxu1 %v2076_v51  ;;  %v1480_v28 = vpack.c.bf16 %v1288_v19, %v1286_v18  ;;  %v2157_v29 = vpack.c.bf16 %v762_v24, %v761_v23  ;;  %v1290_v54 = vld [vmem:[%s2350_s1 + $0x320] sm:$0xff] }
  0x3a   : > { %481 = vmatmul.mubr.f32.gmra.mrb[4].mxu1 %v384_v57  ;;  %1491 = vmatprep.subr.bf16.mxu1 %v2082_v53  ;;  %v628_v41 = vsel %vm625_vm2, %v626_v30, %v627_v32  ;;  %v633_v12 = vsel %vm625_vm2, %v627_v32, %v632_v40  ;;  %v2237_v57 = vpack.c.bf16 %v784_v56, %v783_v46 }
  0x3b   : > { %1253 = vmatprep.mubr.msk.f32.mxu1 %vm395_vm0, %v390_v63 }
  0x3c   : > { %1469 = vmatpush1.bf16.msra.mxu0 %v1468_v43  ;;  %v638_v43 = vrot.slane %v1990_v13, 2 }
  0x3d   : > { %1471 = vmatprep.subr.bf16.mxu0 %v1470_v47  ;;  %1493 = vmatpush3.bf16.msra.mxu1 %v2110_v4  ;;  %v2193_v47 = vpack.c.bf16 %v782_v39, %v781_v58 }
  0x3e   : > { %487 = vmatmul.mubr.f32.gmra.mrb[6].mxu1 %v388_v10  ;;  %1495 = vmatprep.subr.bf16.mxu1 %v2116_v6  ;;  %v639_v13 = vsel %vm625_vm2, %v634_v37, %v638_v43  ;;  %v643_v55 = vsel %vm625_vm2, %v638_v43, %v642_v49 }
  0x40   : > { %1473 = vmatpush1.bf16.msra.mxu0 %v1472_v62 }
  0x41   : > { %1475 = vmatprep.subr.bf16.mxu0 %v1474_v0  ;;  %1497 = vmatpush3.bf16.msra.mxu1 %v2139_v20 }
  0x42   : > { %1499 = vmatprep.subr.bf16.mxu1 %v2142_v21 }
  0x44   : > { %1477 = vmatpush1.bf16.msra.mxu0 %v1476_v15 }
  0x45   : > { %1479 = vmatprep.subr.bf16.mxu0 %v1478_v16  ;;  %1501 = vmatpush3.bf16.msra.mxu1 %v2157_v29 }
  0x46   : > { %1503 = vmatprep.subr.bf16.mxu1 %v2165_v36 }
  0x48   : > { %1481 = vmatpush1.bf16.msra.mxu0 %v1480_v28 }
  0x49   : > { %688 = vmatprep.subr.mxu0 %v1291_v22  ;;  %1505 = vmatpush3.bf16.msra.mxu1 %v2191_v45 }
  0x4a   : > { %1507 = vmatprep.subr.bf16.mxu1 %v2193_v47 }
  0x4c   : > { %689 = vmatpush1.msra.mxu0 %v1290_v54 }
  0x4d   : > { %721 = vmatmul.mubr.f32.vlgmr.msra.gmra.mrb[0].mxu0 %v628_v41  ;;  %1515 = vmatprep.subr.bf16.mxu0 %v1995_v14 }
  0x4e   : > { %1293 = vmatprep.mubr.msk.f32.mxu0 %vm395_vm0, %v635_v44  ;;  %1517 = vmatpush3.bf16.msra.mxu0 %v2036_v34 }
  0x4f   : > { %1519 = vmatprep.subr.bf16.mxu0 %v2042_v35  ;;  %1509 = vmatpush3.bf16.msra.mxu1 %v2210_v50 }
  0x50   : > { %1511 = vmatprep.subr.bf16.mxu1 %v2237_v57 }
  0x51   : > { %727 = vmatmul.mubr.f32.gmra.mrb[2].mxu0 %v633_v12 }
  0x52   : > { %1294 = vmatprep.mubr.msk.f32.mxu0 %vm395_vm0, %v639_v13  ;;  %1521 = vmatpush3.bf16.msra.mxu0 %v2076_v51 }
  0x53   : > { %1523 = vmatprep.subr.bf16.mxu0 %v2082_v53  ;;  %1513 = vmatpush3.bf16.msra.mxu1 %v2245_v61 }
  0x54   : > { %1546 = vmatprep.subr.bf16.mxu1 %v1995_v14 }
  0x55   : > { %733 = vmatmul.mubr.f32.gmra.mrb[4].mxu0 %v637_v26 }
  0x56   : > { %1295 = vmatprep.mubr.msk.f32.mxu0 %vm395_vm0, %v643_v55  ;;  %1525 = vmatpush3.bf16.msra.mxu0 %v2110_v4 }
  0x57   : > { %1527 = vmatprep.subr.bf16.mxu0 %v2116_v6 }
  0x59   : > { %739 = vmatmul.mubr.f32.gmra.mrb[6].mxu0 %v641_v33 }
  0x5a   : > { %1529 = vmatpush3.bf16.msra.mxu0 %v2139_v20 }
  0x5b   : > { %1531 = vmatprep.subr.bf16.mxu0 %v2142_v21 }
  0x5e   : > { %1533 = vmatpush3.bf16.msra.mxu0 %v2157_v29 }
  0x5f   : > { %1535 = vmatprep.subr.bf16.mxu0 %v2165_v36 }
  0x62   : > { %1537 = vmatpush3.bf16.msra.mxu0 %v2191_v45 }
  0x63   : > { %1539 = vmatprep.subr.bf16.mxu0 %v2193_v47 }
  0x66   : > { %1541 = vmatpush3.bf16.msra.mxu0 %v2210_v50 }
  0x67   : > { %1543 = vmatprep.subr.bf16.mxu0 %v2237_v57 }
  0x6a   : > { %1545 = vmatpush3.bf16.msra.mxu0 %v2245_v61 }
 0x105   : > { %v470_v62 = vpop.f32.mrb[0].mxu1 }
 0x106   : > { %v472_v63 = vpop.f32.mrb[1].mxu1 }
 0x109   : > { %v476_v0 = vpop.f32.mrb[2].mxu1 }
 0x10a   : > { %v478_v1 = vpop.f32.mrb[3].mxu1 }
 0x10d   : > { %v482_v2 = vpop.f32.mrb[4].mxu1 }
 0x10e   : > { %v484_v3 = vpop.f32.mrb[5].mxu1 }
 0x111   : > { %v488_v5 = vpop.f32.mrb[6].mxu1 }
 0x112   : > { %v490_v8 = vpop.f32.mrb[7].mxu1 }
 0x120   : > { %v722_v9 = vpop.f32.mrb[0].mxu0 }
 0x121   : > { %v1562_v10 = vadd.f32 %v722_v9, %v470_v62  ;;  %v724_v11 = vpop.f32.mrb[1].mxu0 }
 0x122   : > { %v1563_v31 = vadd.f32 %v724_v11, %v472_v63 }
 0x123   : > { %1001 = vrot.lane.b32.xlu0 %v1562_v10, %s1629_s15  ;;  %v870_v18 = vmul.f32 %v1562_v10, %v1562_v10 }
 0x124   : > { %v728_v15 = vpop.f32.mrb[2].mxu0  ;;  %849 = vmatprep.mubr.f32.mxu1 %v1563_v31  ;;  %v871_v16 = vmul.f32 %v1563_v31, %v1563_v31 }
 0x125   : > { %v1564_v14 = vadd.f32 %v728_v15, %v476_v0  ;;  %v730_v19 = vpop.f32.mrb[3].mxu0  ;;  %850 = vmatmul.mubr.f32.vlgmr.msra.gmra.mrb[8].mxu1 %v1562_v10 }
 0x126   : > { %v1565_v23 = vadd.f32 %v730_v19, %v478_v1  ;;  %1554 = vmatpush3.bf16.msra.mxu1 %v2036_v34  ;;  %942 = vmatprep.mubr.f32.mxu0 %v871_v16 }
 0x127   : > { %1003 = vrot.lane.b32.xlu0 %v1563_v31, %s1629_s15  ;;  %943 = vmatmul.mubr.f32.vlgmr.msra.gmra.mrb[8].mxu0 %v870_v18 }
 0x128   : > { %1005 = vrot.lane.b32.xlu1 %v1564_v14, %s1629_s15  ;;  %v734_v24 = vpop.f32.mrb[4].mxu0  ;;  %854 = vmatprep.mubr.f32.mxu1 %v1565_v23 }
 0x129   : > { %v1566_v25 = vadd.f32 %v734_v24, %v482_v2  ;;  %1547 = vmatprep.subr.bf16.mxu1 %v2042_v35  ;;  %v736_v27 = vpop.f32.mrb[5].mxu0  ;;  %855 = vmatmul.mubr.f32.gmra.mrb[10].mxu1 %v1564_v14  ;;  %v873_v35 = vmul.f32 %v1565_v23, %v1565_v23 }
 0x12a   : > { %v1567_v28 = vadd.f32 %v736_v27, %v484_v3  ;;  %1555 = vmatpush3.bf16.msra.mxu1 %v2076_v51  ;;  %v872_v51 = vmul.f32 %v1564_v14, %v1564_v14 }
 0x12b   : > { %1009 = vrot.lane.b32.xlu0 %v1566_v25, %s1629_s15  ;;  %1548 = vmatprep.subr.bf16.mxu1 %v2082_v53 }
 0x12c   : > { %1007 = vrot.lane.b32.xlu1 %v1565_v23, %s1629_s15  ;;  %v740_v34 = vpop.f32.mrb[6].mxu0  ;;  %859 = vmatprep.mubr.f32.mxu1 %v1567_v28  ;;  %v875_v53 = vmul.f32 %v1567_v28, %v1567_v28 }
 0x12d   : > { %v1568_v30 = vadd.f32 %v740_v34, %v488_v5  ;;  %v742_v32 = vpop.f32.mrb[7].mxu0  ;;  %860 = vmatmul.mubr.f32.gmra.mrb[12].mxu1 %v1566_v25 }
 0x12e   : > { %v1569_v22 = vadd.f32 %v742_v32, %v490_v8  ;;  %1556 = vmatpush3.bf16.msra.mxu1 %v2110_v4  ;;  %v874_v4 = vmul.f32 %v1566_v25, %v1566_v25 }
 0x12f   : > { %1013 = vrot.lane.b32.xlu0 %v1568_v30, %s1629_s15  ;;  %1549 = vmatprep.subr.bf16.mxu1 %v2116_v6 }
 0x130   : > { %1011 = vrot.lane.b32.xlu1 %v1567_v28, %s1629_s15  ;;  %864 = vmatprep.mubr.f32.mxu1 %v1569_v22  ;;  %v877_v6 = vmul.f32 %v1569_v22, %v1569_v22 }
 0x131   : > { %865 = vmatmul.mubr.f32.gmra.mrb[14].mxu1 %v1568_v30 }
 0x132   : > { %1557 = vmatpush3.bf16.msra.mxu1 %v2139_v20  ;;  %947 = vmatprep.mubr.f32.mxu1 %v873_v35  ;;  %v876_v20 = vmul.f32 %v1568_v30, %v1568_v30 }
 0x133   : > { %1550 = vmatprep.subr.bf16.mxu1 %v2142_v21 }
 0x134   : > { %1015 = vrot.lane.b32.xlu1 %v1569_v22, %s1629_s15 }
 0x136   : > { %1558 = vmatpush3.bf16.msra.mxu1 %v2157_v29 }
 0x137   : > { %1551 = vmatprep.subr.bf16.mxu1 %v2165_v36 }
 0x13a   : > { %1559 = vmatpush3.bf16.msra.mxu1 %v2191_v45 }
 0x13b   : > { %1552 = vmatprep.subr.bf16.mxu1 %v2193_v47 }
 0x13e   : > { %1560 = vmatpush3.bf16.msra.mxu1 %v2210_v50 }
 0x13f   : > { %1553 = vmatprep.subr.bf16.mxu1 %v2237_v57 }
 0x142   : > { %1561 = vmatpush3.bf16.msra.mxu1 %v2245_v61 }
 0x145   : > { %948 = vmatmul.mubr.f32.vlgmr.msra.gmra.mrb[16].mxu1 %v872_v51 }
 0x146   : > { %952 = vmatprep.mubr.f32.mxu1 %v875_v53 }
 0x149   : > { %953 = vmatmul.mubr.f32.gmra.mrb[18].mxu1 %v874_v4 }
 0x14a   : > { %957 = vmatprep.mubr.f32.mxu1 %v877_v6 }
 0x14d   : > { %958 = vmatmul.mubr.f32.gmra.mrb[20].mxu1 %v876_v20 }
 0x195   : > { %v1002_v21 = vpop.permute.xlu0 %1001 }
 0x196   : > { %v1029_v29 = vsel %vm395_vm0, 0.0, %v1002_v21 }
 0x197   : > { %v1045_v36 = vrot.slane %v1029_v29, 7 }
 0x199   : > { %v1081_v37 = vsel %vm989_vm3, 0.0, %v1045_v36  ;;  %v1004_v38 = vpop.permute.xlu0 %1003 }
 0x19a   : > { %1087 = vst [vmem:[%s2280_s12] sm:$0xff] %v1081_v37  ;;  %v1017_v42 = vsel %vm395_vm0, %v1002_v21, %v1004_v38  ;;  %v1033_v54 = vsel %vm395_vm0, %v1004_v38, 0.0  ;;  %v1006_v58 = vpop.permute.xlu1 %1005 }
 0x19b   : > { %v1046_v39 = vrot.slane %v1017_v42, 7  ;;  %v1047_v40 = vrot.slane %v1033_v54, 7  ;;  %v1030_v41 = vsel %vm395_vm0, 0.0, %v1006_v58 }
 0x19c   : > { %v1048_v43 = vrot.slane %v1030_v41, 7 }
 0x19d   : > { %v1082_v44 = vsel %vm989_vm3, 0.0, %v1046_v39  ;;  %v1083_v45 = vsel %vm989_vm3, 0.0, %v1047_v40  ;;  %v1010_v47 = vpop.permute.xlu0 %1009 }
 0x19e   : > { %1088 = vst [vmem:[%s2280_s12 + $0x8] sm:$0xff] %v1082_v44  ;;  %1090 = vst.msk [vmem:[%s2280_s12 + $0x10] sm:$0xff] %vm1089_vm4, %v1083_v45  ;;  %v1049_v48 = vsel %vm989_vm3, %v1045_v36, %v1048_v43  ;;  %v1008_v7 = vpop.permute.xlu1 %1007  ;;  %v1031_v17 = vsel %vm395_vm0, 0.0, %v1010_v47 }
 0x19f   : > { %1091 = vst [vmem:[%s2280_s12 + $0x18] sm:$0xff] %v1049_v48  ;;  %v1018_v12 = vsel %vm395_vm0, %v1006_v58, %v1008_v7  ;;  %v1034_v13 = vsel %vm395_vm0, %v1008_v7, 0.0  ;;  %v1054_v49 = vrot.slane %v1031_v17, 7 }
 0x1a0   : > { %v1050_v50 = vrot.slane %v1018_v12, 7  ;;  %v1052_v26 = vrot.slane %v1034_v13, 7 }
 0x1a1   : > { %v1055_v52 = vsel %vm989_vm3, %v1048_v43, %v1054_v49  ;;  %v1014_v55 = vpop.permute.xlu0 %1013 }
 0x1a2   : > { %v1051_v33 = vsel %vm989_vm3, %v1046_v39, %v1050_v50  ;;  %v1053_v46 = vsel %vm989_vm3, %v1047_v40, %v1052_v26  ;;  %1094 = vst [vmem:[%s2280_s12 + $0x30] sm:$0xff] %v1055_v52  ;;  %v1012_v56 = vpop.permute.xlu1 %1011  ;;  %v1032_v57 = vsel %vm395_vm0, 0.0, %v1014_v55 }
 0x1a3   : > { %1092 = vst [vmem:[%s2280_s12 + $0x20] sm:$0xff] %v1051_v33  ;;  %1093 = vst.msk [vmem:[%s2280_s12 + $0x28] sm:$0xff] %vm1089_vm4, %v1053_v46  ;;  %v1019_v59 = vsel %vm395_vm0, %v1010_v47, %v1012_v56  ;;  %v1035_v60 = vsel %vm395_vm0, %v1012_v56, 0.0  ;;  %v1060_v61 = vrot.slane %v1032_v57, 7 }
 0x1a4   : > { %v1056_v62 = vrot.slane %v1019_v59, 7  ;;  %v1058_v63 = vrot.slane %v1035_v60, 7 }
 0x1a5   : > { %v1061_v0 = vsel %vm989_vm3, %v1054_v49, %v1060_v61  ;;  %v1084_v1 = vsel %vm989_vm3, %v1060_v61, 0.0 }
 0x1a6   : > { %v1057_v2 = vsel %vm989_vm3, %v1050_v50, %v1056_v62  ;;  %v1059_v3 = vsel %vm989_vm3, %v1052_v26, %v1058_v63  ;;  %1097 = vst [vmem:[%s2280_s12 + $0x48] sm:$0xff] %v1061_v0  ;;  %1100 = vst [vmem:[%s2280_s12 + $0x60] sm:$0x3] %v1084_v1  ;;  %v1016_v5 = vpop.permute.xlu1 %1015 }
 0x1a7   : > { %1095 = vst [vmem:[%s2280_s12 + $0x38] sm:$0xff] %v1057_v2  ;;  %1096 = vst.msk [vmem:[%s2280_s12 + $0x40] sm:$0xff] %vm1089_vm4, %v1059_v3  ;;  %v1020_v8 = vsel %vm395_vm0, %v1014_v55, %v1016_v5  ;;  %v1036_v9 = vsel %vm395_vm0, %v1016_v5, 0.0 }
 0x1a8   : > { %v1062_v10 = vrot.slane %v1020_v8, 7  ;;  %v1064_v11 = vrot.slane %v1036_v9, 7 }
 0x1aa   : > { %v1063_v31 = vsel %vm989_vm3, %v1056_v62, %v1062_v10  ;;  %v1065_v15 = vsel %vm989_vm3, %v1058_v63, %v1064_v11  ;;  %v1085_v16 = vsel %vm989_vm3, %v1062_v10, 0.0  ;;  %v1086_v18 = vsel %vm989_vm3, %v1064_v11, 0.0 }
 0x1ab   : > { %1098 = vst [vmem:[%s2280_s12 + $0x50] sm:$0xff] %v1063_v31  ;;  %1099 = vst.msk [vmem:[%s2280_s12 + $0x58] sm:$0xff] %vm1089_vm4, %v1065_v15 }
 0x1ac   : > { %1101 = vst [vmem:[%s2280_s12 + $0x68] sm:$0x3] %v1085_v16  ;;  %1103 = vst.msk [vmem:[%s2280_s12 + $0x70] sm:$0x3] %vm1102_vm5, %v1086_v18 }
 0x1f8   : > { %v1330_v14 = vpop.f32.mrb[8].mxu1 }
 0x1f9   : > { %v1331_v19 = vpop.f32.mrb[9].mxu1 }
 0x1fa   : > { %v1332_v23 = vadd.f32 %v1331_v19, %v1330_v14  ;;  %v1374_v24 = vpop.f32.mrb[8].mxu0 }
 0x1fb   : > { %v1375_v25 = vpop.f32.mrb[9].mxu0 }
 0x1fc   : > { %v1376_v27 = vadd.f32 %v1375_v25, %v1374_v24  ;;  %v1333_v28 = vpop.f32.mrb[10].mxu1  ;;  %v963_v32 = vsel %vm395_vm0, %v1332_v23, 0.0 }
 0x1fd   : > { %v1334_v34 = vpop.f32.mrb[11].mxu1 }
 0x1fe   : > { %v1335_v30 = vadd.f32 %v1334_v34, %v1333_v28  ;;  %v976_v39 = vsel %vm395_vm0, %v1376_v27, 0.0 }
 0x200   : > { %v964_v22 = vsel %vm395_vm0, %v1335_v30, 0.0  ;;  %v1336_v35 = vpop.f32.mrb[12].mxu1 }
 0x201   : > { %v965_v51 = vadd.f32 %v964_v22, %v963_v32  ;;  %v1337_v53 = vpop.f32.mrb[13].mxu1 }
 0x202   : > { %v1338_v4 = vadd.f32 %v1337_v53, %v1336_v35 }
 0x204   : > { %v966_v6 = vsel %vm395_vm0, %v1338_v4, 0.0  ;;  %v1339_v20 = vpop.f32.mrb[14].mxu1 }
 0x205   : > { %v967_v21 = vadd.f32 %v966_v6, %v965_v51  ;;  %v1340_v29 = vpop.f32.mrb[15].mxu1 }
 0x206   : > { %v1341_v36 = vadd.f32 %v1340_v29, %v1339_v20 }
 0x208   : > { %v968_v37 = vsel %vm395_vm0, %v1341_v36, 0.0 }
 0x209   : > { %v969_v38 = vadd.f32 %v968_v37, %v967_v21 }
 0x20b   : > { %v970_v43 = vrot.slane %v969_v38, 4 }
 0x20d   : > { %v971_v17 = vadd.f32 %v970_v43, %v969_v38 }
 0x20f   : > { %v972_v26 = vrot.slane %v971_v17, 2 }
 0x211   : > { %v973_v33 = vadd.f32 %v972_v26, %v971_v17 }
 0x213   : > { %v974_v57 = vrot.slane %v973_v33, 1 }
 0x215   : > { %v975_v61 = vadd.f32 %v974_v57, %v973_v33 }
 0x218   : > { %v1377_v42 = vpop.f32.mrb[16].mxu1 }
 0x219   : > { %v1378_v54 = vpop.f32.mrb[17].mxu1 }
 0x21a   : > { %v1379_v58 = vadd.f32 %v1378_v54, %v1377_v42 }
 0x21c   : > { %v977_v40 = vsel %vm395_vm0, %v1379_v58, 0.0  ;;  %v1380_v41 = vpop.f32.mrb[18].mxu1 }
 0x21d   : > { %v978_v44 = vadd.f32 %v977_v40, %v976_v39  ;;  %v1381_v45 = vpop.f32.mrb[19].mxu1 }
 0x21e   : > { %v1382_v47 = vadd.f32 %v1381_v45, %v1380_v41 }
 0x220   : > { %v979_v48 = vsel %vm395_vm0, %v1382_v47, 0.0  ;;  %v1383_v7 = vpop.f32.mrb[20].mxu1 }
 0x221   : > { %v980_v12 = vadd.f32 %v979_v48, %v978_v44  ;;  %v1384_v13 = vpop.f32.mrb[21].mxu1 }
 0x222   : > { %v1385_v49 = vadd.f32 %v1384_v13, %v1383_v7 }
 0x224   : > { %v981_v50 = vsel %vm395_vm0, %v1385_v49, 0.0 }
 0x225   : > { %v982_v52 = vadd.f32 %v981_v50, %v980_v12 }
 0x227   : > { %v983_v55 = vrot.slane %v982_v52, 4 }
 0x229   : > { %v984_v46 = vadd.f32 %v983_v55, %v982_v52 }
 0x22b   : > { %v985_v56 = vrot.slane %v984_v46, 2 }
 0x22d   : > { %v986_v59 = vadd.f32 %v985_v56, %v984_v46 }
 0x22f   : > { %v987_v60 = vrot.slane %v986_v59, 1 }
 0x231   : > { %v988_v62 = vadd.f32 %v987_v60, %v986_v59 }
 0x233   : > { %v990_v63 = vsel %vm989_vm3, %v975_v61, %v988_v62 }
 0x234   : > { %992 = vst.msk [vmem:[%s282_s24] sm:$0x3] %vm991_vm6, %v990_v63 }
 0x235 PF: > { %s17_s23 = sadd.s32 1, %s1627_s23   ;;  %s2356_s21 = smov %s1623_s22 }
 0x236   : > { %p14_p5 = scmp.ge.s32.totalorder %s17_s23, 4   ;;  %s2357_s22 = smov %s2359_s3 }
 0x238   :  { %16 = sbr.rel (!%p14_p5) target bundleno = 2 (0x2), region = 84 }

// kernel: tile.23
= control target key start
LH: loop header
LB: loop body
LE: loop exit
PB: predicated region body
PF: predicated region fallthrough
CT: control target
= control target key end

     0   :  { %s40_s0 = inlined_call_operand.vmem [shape: f32[8], index: 0, kind: input, shape index: {}]   ;;  %s41_s1 = inlined_call_operand.vmem [shape: f32[32,8], index: 1, kind: output, shape index: {}]  }
   0x1   :  { %v4_v0 = vld [vmem:[%s40_s0] ss:$0 sm:$0xff] }
   0x2   :  { %5 = vst [vmem:[%s41_s1] sm:$0xff] %v4_v0  ;;  %12 = vst [vmem:[%s41_s1 + $0x8] sm:$0xff] %v4_v0 }
   0x3   :  { %13 = vst [vmem:[%s41_s1 + $0x10] sm:$0xff] %v4_v0  ;;  %14 = vst [vmem:[%s41_s1 + $0x18] sm:$0xff] %v4_v0 }

// kernel: tile.24
= control target key start
LH: loop header
LB: loop body
LE: loop exit
PB: predicated region body
PF: predicated region fallthrough
CT: control target
= control target key end

     0   :  { %s7_s6 = smov 3  ;;  %s21_s9 = smov 3  ;;  %vm4_vm0 = vcmask 64512   ;;  %vm11_vm1 = vcmask 1048512   ;;  %vm18_vm2 = vcmask 982912   ;;  %vm25_vm3 = vcmask 917312   ;;  %s223_s0 = inlined_call_operand.vmem [shape: f32[32,8], index: 0, kind: input, shape index: {}]   ;;  %s224_s1 = inlined_call_operand.vmem [shape: f32[256], index: 1, kind: output, shape index: {}]  }
   0x1   :  { %v117_v0 = vld [vmem:[%s223_s0 + $0xf] ss:$16 sm:%s7_s6]   ;;  %s147_s10 = smov 120   ;;  %v119_v1 = vld [vmem:[%s223_s0 + $0xd] ss:$16 sm:%s21_s9]   ;;  %s14_s13 = smov 3 }
   0x2   :  { %9 = vrot.lane.b32.xlu0 %v117_v0, %s147_s10  ;;  %s148_s14 = smov 104   ;;  %v118_v2 = vld [vmem:[%s223_s0 + $0xe] ss:$16 sm:%s14_s13]   ;;  %s28_s17 = smov 3  ;;  %vm32_vm4 = vcmask 851712   ;;  %vm39_vm5 = vcmask 786112  }
   0x3   :  { %23 = vrot.lane.b32.xlu1 %v119_v1, %s148_s14  ;;  %v120_v3 = vld [vmem:[%s223_s0 + $0xc] ss:$16 sm:%s28_s17]   ;;  %s35_s20 = smov 3  ;;  %s42_s21 = smov 3  ;;  %vm46_vm6 = vcmask 720512   ;;  %vm53_vm7 = vcmask 654912  }
   0x4   :  { %s149_s22 = smov 112   ;;  %s150_s23 = smov 96   ;;  %v121_v4 = vld [vmem:[%s223_s0 + $0xb] ss:$16 sm:%s35_s20]   ;;  %v122_v5 = vld [vmem:[%s223_s0 + $0xa] ss:$16 sm:%s42_s21]  }
   0x5   :  { %s49_s28 = smov 3  ;;  %s56_s29 = smov 3  ;;  %vm60_vm8 = vcmask 589312   ;;  %vm67_vm9 = vcmask 523712   ;;  %vm74_vm10 = vcmask 458112   ;;  %vm81_vm11 = vcmask 392512  }
   0x6   :  { %16 = vrot.lane.b32.xlu0 %v118_v2, %s149_s22  ;;  %s151_s30 = smov 88   ;;  %s152_s2 = smov 80   ;;  %v123_v6 = vld [vmem:[%s223_s0 + $0x9] ss:$16 sm:%s49_s28]   ;;  %vm88_vm12 = vcmask 326912   ;;  %vm95_vm13 = vcmask 261312  }
   0x7   :  { %30 = vrot.lane.b32.xlu1 %v120_v3, %s150_s23  ;;  %v124_v7 = vld [vmem:[%s223_s0 + $0x8] ss:$16 sm:%s56_s29]   ;;  %s63_s7 = smov 3  ;;  %s70_s8 = smov 3  ;;  %vm102_vm14 = vcmask 195712   ;;  %vm109_vm15 = vcmask 130112  }
   0x8   :  { %s153_s9 = smov 72   ;;  %s154_s10 = smov 64   ;;  %v125_v8 = vld [vmem:[%s223_s0 + $0x7] ss:$16 sm:%s63_s7]   ;;  %v126_v9 = vld [vmem:[%s223_s0 + $0x6] ss:$16 sm:%s70_s8]  }
   0x9   :  { %s2_s13 = smov 3  ;;  %s77_s16 = smov 3 }
   0xa   :  { %37 = vrot.lane.b32.xlu0 %v121_v4, %s151_s30  ;;  %v3_v10 = vld [vmem:[%s223_s0] ss:$16 sm:%s2_s13]   ;;  %s84_s19 = smov 3  ;;  %s155_s20 = smov 56  }
   0xb   :  { %44 = vrot.lane.b32.xlu1 %v122_v5, %s152_s2  ;;  %5 = vst.msk [vmem:[#allocation0] sm:$0x3] %vm4_vm0, %v3_v10   ;;  %s156_s21 = smov 48   ;;  %v127_v11 = vld [vmem:[%s223_s0 + $0x5] ss:$16 sm:%s77_s16]   ;;  %s91_s26 = smov 3 }
   0xc   :  { %v128_v12 = vld [vmem:[%s223_s0 + $0x4] ss:$16 sm:%s84_s19]   ;;  %s98_s27 = smov 3  ;;  %s157_s28 = smov 40   ;;  %v129_v13 = vld [vmem:[%s223_s0 + $0x3] ss:$16 sm:%s91_s26]  }
   0xd   :  { %s158_s29 = smov 32   ;;  %v130_v14 = vld [vmem:[%s223_s0 + $0x2] ss:$16 sm:%s98_s27]   ;;  %s105_s5 = smov 3 }
   0xe   :  { %51 = vrot.lane.b32.xlu0 %v123_v6, %s153_s9  ;;  %s159_s6 = smov 24   ;;  %s160_s7 = smov 16   ;;  %v131_v15 = vld [vmem:[%s223_s0 + $0x1] ss:$16 sm:%s105_s5]  }
   0xf   :  { %58 = vrot.lane.b32.xlu1 %v124_v7, %s154_s10  ;;  %s161_s0 = smov 8  }
  0x12   :  { %65 = vrot.lane.b32.xlu0 %v125_v8, %s155_s20 }
  0x13   :  { %72 = vrot.lane.b32.xlu1 %v126_v9, %s156_s21 }
  0x16   :  { %79 = vrot.lane.b32.xlu0 %v127_v11, %s157_s28 }
  0x17   :  { %86 = vrot.lane.b32.xlu1 %v128_v12, %s158_s29 }
  0x1a   :  { %93 = vrot.lane.b32.xlu0 %v129_v13, %s159_s6 }
  0x1b   :  { %100 = vrot.lane.b32.xlu1 %v130_v14, %s160_s7 }
  0x1e   :  { %107 = vrot.lane.b32.xlu0 %v131_v15, %s161_s0 }
  0x74   :  { %v10_v16 = vpop.permute.xlu0 %9  }
  0x75   :  { %12 = vst.msk [vmem:[#allocation0] sm:$0x3] %vm11_vm1, %v10_v16   ;;  %v24_v17 = vpop.permute.xlu1 %23  }
  0x78   :  { %v17_v18 = vpop.permute.xlu0 %16  }
  0x79   :  { %19 = vst.msk [vmem:[#allocation0] sm:$0x3] %vm18_vm2, %v17_v18   ;;  %v31_v19 = vpop.permute.xlu1 %30  }
  0x7a   :  { %26 = vst.msk [vmem:[#allocation0] sm:$0x3] %vm25_vm3, %v24_v17  }
  0x7b   :  { %33 = vst.msk [vmem:[#allocation0] sm:$0x3] %vm32_vm4, %v31_v19  }
  0x7c   :  { %v38_v20 = vpop.permute.xlu0 %37  }
  0x7d   :  { %40 = vst.msk [vmem:[#allocation0] sm:$0x3] %vm39_vm5, %v38_v20   ;;  %v45_v21 = vpop.permute.xlu1 %44  }
  0x7e   :  { %47 = vst.msk [vmem:[#allocation0] sm:$0x3] %vm46_vm6, %v45_v21  }
  0x80   :  { %v52_v22 = vpop.permute.xlu0 %51  }
  0x81   :  { %54 = vst.msk [vmem:[#allocation0] sm:$0x3] %vm53_vm7, %v52_v22   ;;  %v59_v23 = vpop.permute.xlu1 %58  }
  0x82   :  { %61 = vst.msk [vmem:[#allocation0] sm:$0x3] %vm60_vm8, %v59_v23  }
  0x84   :  { %v66_v24 = vpop.permute.xlu0 %65  }
  0x85   :  { %68 = vst.msk [vmem:[#allocation0] sm:$0x3] %vm67_vm9, %v66_v24   ;;  %v73_v25 = vpop.permute.xlu1 %72  }
  0x86   :  { %75 = vst.msk [vmem:[#allocation0] sm:$0x3] %vm74_vm10, %v73_v25  }
  0x88   :  { %v80_v26 = vpop.permute.xlu0 %79  }
  0x89   :  { %82 = vst.msk [vmem:[#allocation0] sm:$0x3] %vm81_vm11, %v80_v26   ;;  %v87_v27 = vpop.permute.xlu1 %86  }
  0x8a   :  { %89 = vst.msk [vmem:[#allocation0] sm:$0x3] %vm88_vm12, %v87_v27  }
  0x8c   :  { %v94_v28 = vpop.permute.xlu0 %93  }
  0x8d   :  { %96 = vst.msk [vmem:[#allocation0] sm:$0x3] %vm95_vm13, %v94_v28   ;;  %v101_v29 = vpop.permute.xlu1 %100  }
  0x8e   :  { %103 = vst.msk [vmem:[#allocation0] sm:$0x3] %vm102_vm14, %v101_v29  }
  0x90   :  { %v108_v30 = vpop.permute.xlu0 %107  }
  0x91   :  { %110 = vst.msk [vmem:[#allocation0] sm:$0x3] %vm109_vm15, %v108_v30  }
  0x98   :  { %v114_v31 = vld [vmem:[#allocation0] sm:$0x3] }
  0x99   :  { %116 = vst [vmem:[%s224_s1] sm:$0x3] %v114_v31 }

// kernel: decoder_without_concat.6
= control target key start
LH: loop header
LB: loop body
LE: loop exit
PB: predicated region body
PF: predicated region fallthrough
CT: control target
= control target key end

     0   :  { %s2314_s21 = smov 0   ;;  %s2316_s22 = smov 0   ;;  %s3425_s0 = inlined_call_operand.vmem [shape: f32[2,34,272], index: 0, kind: input, shape index: {}]   ;;  %s3426_s1 = inlined_call_operand.vmem [shape: f32[3,272,256], index: 1, kind: input, shape index: {}]   ;;  %s3427_s2 = inlined_call_operand.vmem [shape: f32[256,8], index: 2, kind: input, shape index: {}]   ;;  %s3428_s3 = inlined_call_operand.vmem [shape: f32[1,272], index: 3, kind: input, shape index: {}]   ;;  %s3429_s4 = inlined_call_operand.vmem [shape: f32[1,272], index: 4, kind: input, shape index: {}]   ;;  %s3430_s5 = inlined_call_operand.vmem [shape: f32[2,32,256], index: 5, kind: output, shape index: {0}]   ;;  %s3431_s6 = inlined_call_operand.vmem [shape: f32[2,1,2,8], index: 6, kind: output, shape index: {1}]  }
   0x1   :  { %s2318_s23 = smov 0  }
   0x2 LB: > { %s29_s24 = sadd.s32 1, %s2272_s22  ;;  %p1674_p0 = scmp.ge.s32.totalorder %s2276_s23, 1  ;;  %s2276_s23 = sphi %s2318_s23, %s17_s23   ;;  %s2272_s22 = sphi %s2316_s22, %s3433_s22   ;;  %s2268_s21 = sphi %s2314_s21, %s3432_s21  }
   0x3   : > { %p31_p1 = scmp.ge.s32.totalorder %s29_s24, 2  ;;  %p231_p2 = scmp.lt.s32.totalorder %s2276_s23, 3 }
   0x5   : > { %s3435_s24 = smov (%p31_p1, %s29_s24), 0  ;;  %p232_p3 = pnand %p1674_p0, %p231_p2 }
   0x6   : > { %v1680_v0 = vld [vmem:[%s3426_s1 + $0x228] sm:$0xff] (!%p232_p3)  ;;  %v1682_v1 = vld [vmem:[%s3426_s1 + $0x238] sm:$0xff] (!%p232_p3)  ;;  %v1679_v2 = vld [vmem:[%s3426_s1 + $0x220] sm:$0xff] (!%p232_p3)  ;;  %p273_p4 = scmp.lt.s32.totalorder (!%p232_p3), %s2268_s21, 1  ;;  %v313_v3 = vlaneseq (!%p232_p3)  ;;  %v2278_v8 = vmov (!%p232_p3), 0.0   ;;  %vm585_vm1 = vcmask (!%p232_p3), 1046528  }
   0x7   : > { %235 = sbr.rel (%p232_p3) target bundleno = 665 (0x299), region = 40  ;;  %v1920_v4 = vpack.c.bf16 (!%p232_p3), %v1682_v1, %v1680_v0  ;;  %v1681_v5 = vld [vmem:[%s3426_s1 + $0x230] sm:$0xff] (!%p232_p3)  ;;  %v1684_v6 = vld [vmem:[%s3426_s1 + $0x248] sm:$0xff] (!%p232_p3)  ;;  %v1686_v7 = vld [vmem:[%s3426_s1 + $0x258] sm:$0xff] (!%p232_p3)  ;;  %783 = vmatprep.mubr.f32.mxu0 (!%p232_p3), %v2278_v8  ;;  %vm621_vm2 = vcmask (!%p232_p3), 130048   ;;  %vm1063_vm4 = vcmask (!%p232_p3), 1045504  }
   0x8   : > { %v1922_v9 = vpack.c.bf16 (!%p232_p3), %v1681_v5, %v1679_v2  ;;  %v1924_v10 = vpack.c.bf16 (!%p232_p3), %v1686_v7, %v1684_v6  ;;  %v1683_v11 = vld [vmem:[%s3426_s1 + $0x240] sm:$0xff] (!%p232_p3)  ;;  %v1685_v12 = vld [vmem:[%s3426_s1 + $0x250] sm:$0xff] (!%p232_p3)  ;;  %v1688_v13 = vld [vmem:[%s3426_s1 + $0x268] sm:$0xff] (!%p232_p3)  ;;  %v2362_v14 = vshrl.u32 (!%p232_p3), %v313_v3, 7  ;;  %vm1503_vm5 = vcmask (!%p232_p3), 64512  }
   0x9   : > { %1921 = vmatprep.subr.bf16.mxu1 (!%p232_p3), %v1920_v4  ;;  %v1690_v15 = vld [vmem:[%s3426_s1 + $0x278] sm:$0xff] (!%p232_p3)  ;;  %v1926_v16 = vpack.c.bf16 (!%p232_p3), %v1685_v12, %v1683_v11  ;;  %v1744_v17 = vld [vmem:[%s3426_s1 + $0x428] sm:$0xff] (!%p232_p3)  ;;  %v1743_v19 = vld [vmem:[%s3426_s1 + $0x420] sm:$0xff] (!%p232_p3)  ;;  %vm1530_vm6 = vcmask (!%p232_p3), 1040384   ;;  %vm1532_vm7 = vcmask (!%p232_p3), 58368  }
   0xa   : > { %1923 = vmatpush1.bf16.msra.mxu1 (!%p232_p3), %v1922_v9  ;;  %v1746_v18 = vld [vmem:[%s3426_s1 + $0x438] sm:$0xff] (!%p232_p3)  ;;  %v1928_v20 = vpack.c.bf16 (!%p232_p3), %v1690_v15, %v1688_v13  ;;  %v1687_v21 = vld [vmem:[%s3426_s1 + $0x260] sm:$0xff] (!%p232_p3)  ;;  %v1689_v22 = vld [vmem:[%s3426_s1 + $0x270] sm:$0xff] (!%p232_p3)  ;;  %v323_v25 = vsub.s32 (!%p232_p3), 2, %v2362_v14  ;;  %vm403_vm0 = vcmp.ge.s32.totalorder (!%p232_p3), %v2362_v14, 1 }
   0xb   : > { %1925 = vmatprep.subr.bf16.mxu1 (!%p232_p3), %v1924_v10  ;;  %v1984_v23 = vpack.c.bf16 (!%p232_p3), %v1746_v18, %v1744_v17  ;;  %v1745_v24 = vld [vmem:[%s3426_s1 + $0x430] sm:$0xff] (!%p232_p3)  ;;  %v1692_v27 = vld [vmem:[%s3426_s1 + $0x288] sm:$0xff] (!%p232_p3)  ;;  %v1694_v28 = vld [vmem:[%s3426_s1 + $0x298] sm:$0xff] (!%p232_p3)  ;;  %v1930_v32 = vpack.c.bf16 (!%p232_p3), %v1689_v22, %v1687_v21 }
   0xc   : > { %v1986_v26 = vpack.c.bf16 (!%p232_p3), %v1745_v24, %v1743_v19  ;;  %v434_v29 = vld [vmem:[%s3426_s1 + $0x8] sm:$0xff] (!%p232_p3)  ;;  %v436_v30 = vld [vmem:[%s3426_s1 + $0x18] sm:$0xff] (!%p232_p3)  ;;  %v2409_v35 = vld [vmem:[%s3428_s3] sm:$0x7] (!%p232_p3)  ;;  %v1932_v37 = vpack.c.bf16 (!%p232_p3), %v1694_v28, %v1692_v27 }
   0xd   : > { %1985 = vmatprep.subr.bf16.mxu0 (!%p232_p3), %v1984_v23  ;;  %v1988_v33 = vpack.c.bf16 (!%p232_p3), %v436_v30, %v434_v29  ;;  %v2414_v36 = vld [vmem:[%s3429_s4] sm:$0x7] (!%p232_p3)  ;;  %v1693_v39 = vld [vmem:[%s3426_s1 + $0x290] sm:$0xff] (!%p232_p3)  ;;  %v2423_v40 = vrot.slane (!%p232_p3), %v2409_v35, %v323_v25  ;;  %v1696_v42 = vld [vmem:[%s3426_s1 + $0x2a8] sm:$0xff] (!%p232_p3) }
   0xe   : > { %s3437_s21 = smov (!%p273_p4, %s2268_s21), 1  ;;  %1927 = vmatpush1.bf16.msra.mxu1 %v1926_v16  ;;  %1987 = vmatpush1.bf16.msra.mxu0 %v1986_v26  ;;  %v1691_v38 = vld [vmem:[%s3426_s1 + $0x280] sm:$0xff]  ;;  %v2426_v41 = vrot.slane %v2414_v36, %v323_v25  ;;  %v1698_v43 = vld [vmem:[%s3426_s1 + $0x2b8] sm:$0xff]  ;;  %v1697_v51 = vld [vmem:[%s3426_s1 + $0x2b0] sm:$0xff] }
   0xf   : > { %s2228_s7 = smul.u32 120, %s3437_s21  ;;  %1929 = vmatprep.subr.bf16.mxu1 %v1928_v20  ;;  %1989 = vmatprep.subr.bf16.mxu0 %v1988_v33  ;;  %v1934_v46 = vpack.c.bf16 %v1693_v39, %v1691_v38  ;;  %v1936_v49 = vpack.c.bf16 %v1698_v43, %v1696_v42  ;;  %v1695_v50 = vld [vmem:[%s3426_s1 + $0x2a0] sm:$0xff]  ;;  %v1700_v52 = vld [vmem:[%s3426_s1 + $0x2c8] sm:$0xff]  ;;  %v1702_v53 = vld [vmem:[%s3426_s1 + $0x2d8] sm:$0xff]  ;;  %s1831_s10 = sshll.u32 %s3437_s21, 6 }
  0x10   : > { %v433_v56 = vld [vmem:[%s3426_s1] sm:$0xff]  ;;  %v435_v57 = vld [vmem:[%s3426_s1 + $0x10] sm:$0xff]  ;;  %v1938_v58 = vpack.c.bf16 %v1697_v51, %v1695_v50  ;;  %v438_v59 = vld [vmem:[%s3426_s1 + $0x28] sm:$0xff]  ;;  %v1940_v63 = vpack.c.bf16 %v1702_v53, %v1700_v52  ;;  %s3379_s13 = scalar_lea.vmem %s3430_s5, %s1831_s10  ;;  %s1678_s14 = sshll.u32 %s3437_s21, 1 }
  0x11   : > { %s2399_s26 = scalar_lea.vmem %s3425_s0, %s2228_s7  ;;  %v440_v60 = vld [vmem:[%s3426_s1 + $0x38] sm:$0xff]  ;;  %v1699_v0 = vld [vmem:[%s3426_s1 + $0x2c0] sm:$0xff]  ;;  %v1701_v1 = vld [vmem:[%s3426_s1 + $0x2d0] sm:$0xff]  ;;  %v1990_v3 = vpack.c.bf16 %v435_v57, %v433_v56  ;;  %s295_s17 = scalar_lea.vmem %s3431_s6, %s1678_s14 }
  0x12   : > { %v298_v31 = vld [vmem:[%s2399_s26 + $0x10] sm:$0xff]  ;;  %v301_v34 = vld [vmem:[%s2399_s26 + $0x28] sm:$0xff]  ;;  %1931 = vmatpush1.bf16.msra.mxu1 %v1930_v32  ;;  %v1706_v5 = vld [vmem:[%s3426_s1 + $0x2f8] sm:$0xff]  ;;  %v1992_v6 = vpack.c.bf16 %v440_v60, %v438_v59  ;;  %v1942_v11 = vpack.c.bf16 %v1701_v1, %v1699_v0  ;;  %v319_v59 = vsub.s32 1, %v2362_v14 }
  0x13   : > { %v330_v44 = vmul.f32 %v2423_v40, %v298_v31  ;;  %v333_v45 = vmul.f32 %v2423_v40, %v301_v34  ;;  %1933 = vmatprep.subr.bf16.mxu1 %v1932_v37  ;;  %v1704_v4 = vld [vmem:[%s3426_s1 + $0x2e8] sm:$0xff]  ;;  %v437_v7 = vld [vmem:[%s3426_s1 + $0x20] sm:$0xff]  ;;  %v439_v9 = vld [vmem:[%s3426_s1 + $0x30] sm:$0xff] }
  0x14   : > { %v442_v12 = vld [vmem:[%s3426_s1 + $0x48] sm:$0xff]  ;;  %v444_v13 = vld [vmem:[%s3426_s1 + $0x58] sm:$0xff]  ;;  %v1944_v15 = vpack.c.bf16 %v1706_v5, %v1704_v4  ;;  %v1703_v16 = vld [vmem:[%s3426_s1 + $0x2e0] sm:$0xff]  ;;  %v1994_v18 = vpack.c.bf16 %v439_v9, %v437_v7 }
  0x15   : > { %v362_v47 = vadd.f32 %v2426_v41, %v330_v44  ;;  %v365_v48 = vadd.f32 %v2426_v41, %v333_v45  ;;  %v1705_v17 = vld [vmem:[%s3426_s1 + $0x2f0] sm:$0xff]  ;;  %v1708_v19 = vld [vmem:[%s3426_s1 + $0x308] sm:$0xff]  ;;  %v1710_v20 = vld [vmem:[%s3426_s1 + $0x318] sm:$0xff]  ;;  %v1996_v21 = vpack.c.bf16 %v444_v13, %v442_v12  ;;  %v315_v12 = vsub.s32 0, %v2362_v14 }
  0x16   : > { %1935 = vmatpush1.bf16.msra.mxu1 %v1934_v46  ;;  %v441_v22 = vld [vmem:[%s3426_s1 + $0x40] sm:$0xff]  ;;  %v443_v23 = vld [vmem:[%s3426_s1 + $0x50] sm:$0xff]  ;;  %v1946_v24 = vpack.c.bf16 %v1705_v17, %v1703_v16  ;;  %v446_v25 = vld [vmem:[%s3426_s1 + $0x68] sm:$0xff]  ;;  %v1948_v27 = vpack.c.bf16 %v1710_v20, %v1708_v19 }
  0x17   : > { %v377_v54 = vmax.f32 %v362_v47, 0.0  ;;  %v2451_v55 = vmax.f32 %v365_v48, 0.0  ;;  %1937 = vmatprep.subr.bf16.mxu1 %v1936_v49  ;;  %v448_v26 = vld [vmem:[%s3426_s1 + $0x78] sm:$0xff]  ;;  %v1707_v28 = vld [vmem:[%s3426_s1 + $0x300] sm:$0xff]  ;;  %v1709_v29 = vld [vmem:[%s3426_s1 + $0x310] sm:$0xff]  ;;  %v1998_v30 = vpack.c.bf16 %v443_v23, %v441_v22 }
  0x18   : > { %v1712_v31 = vld [vmem:[%s3426_s1 + $0x328] sm:$0xff]  ;;  %v1714_v32 = vld [vmem:[%s3426_s1 + $0x338] sm:$0xff]  ;;  %v2000_v33 = vpack.c.bf16 %v448_v26, %v446_v25  ;;  %v445_v34 = vld [vmem:[%s3426_s1 + $0x60] sm:$0xff]  ;;  %v1950_v38 = vpack.c.bf16 %v1709_v29, %v1707_v28 }
  0x19   : > { %v2467_v61 = vsel %vm403_vm0, %v377_v54, 0.0  ;;  %v593_v62 = vrot.slane %v2451_v55, 1  ;;  %v447_v37 = vld [vmem:[%s3426_s1 + $0x70] sm:$0xff]  ;;  %v450_v39 = vld [vmem:[%s3426_s1 + $0x88] sm:$0xff]  ;;  %v452_v42 = vld [vmem:[%s3426_s1 + $0x98] sm:$0xff]  ;;  %v1952_v43 = vpack.c.bf16 %v1714_v32, %v1712_v31  ;;  %v2641_v31 = vrot.slane %v2409_v35, %v315_v12 }
  0x1a   : > { %v592_v2 = vrot.slane %v2467_v61, 1  ;;  %1939 = vmatpush1.bf16.msra.mxu1 %v1938_v58  ;;  %v1711_v44 = vld [vmem:[%s3426_s1 + $0x320] sm:$0xff]  ;;  %v1713_v45 = vld [vmem:[%s3426_s1 + $0x330] sm:$0xff]  ;;  %v2002_v46 = vpack.c.bf16 %v447_v37, %v445_v34  ;;  %v1716_v47 = vld [vmem:[%s3426_s1 + $0x348] sm:$0xff]  ;;  %v2004_v49 = vpack.c.bf16 %v452_v42, %v450_v39 }
  0x1b   : > { %1941 = vmatprep.subr.bf16.mxu1 %v1940_v63  ;;  %v1718_v48 = vld [vmem:[%s3426_s1 + $0x358] sm:$0xff]  ;;  %v449_v50 = vld [vmem:[%s3426_s1 + $0x80] sm:$0xff]  ;;  %v451_v51 = vld [vmem:[%s3426_s1 + $0x90] sm:$0xff]  ;;  %v1954_v52 = vpack.c.bf16 %v1713_v45, %v1711_v44 }
  0x1c   : > { %v594_v10 = vsel %vm585_vm1, %v592_v2, %v593_v62  ;;  %v454_v53 = vld [vmem:[%s3426_s1 + $0xa8] sm:$0xff]  ;;  %v456_v54 = vld [vmem:[%s3426_s1 + $0xb8] sm:$0xff]  ;;  %v1956_v56 = vpack.c.bf16 %v1718_v48, %v1716_v47  ;;  %v1715_v57 = vld [vmem:[%s3426_s1 + $0x340] sm:$0xff]  ;;  %v2006_v60 = vpack.c.bf16 %v451_v51, %v449_v50  ;;  %v2668_v50 = vrot.slane %v2414_v36, %v315_v12 }
  0x1d   : > { %1747 = vmatmul.mubr.msk.f32.vlgmr.msra.gmra.mrb[0].mxu0 %vm621_vm2, %v594_v10  ;;  %v1717_v58 = vld [vmem:[%s3426_s1 + $0x350] sm:$0xff]  ;;  %v1720_v63 = vld [vmem:[%s3426_s1 + $0x368] sm:$0xff]  ;;  %v1722_v0 = vld [vmem:[%s3426_s1 + $0x378] sm:$0xff]  ;;  %v2008_v1 = vpack.c.bf16 %v456_v54, %v454_v53 }
  0x1e   : > { %1991 = vmatpush1.bf16.msra.mxu0 %v1990_v3  ;;  %789 = vmatprep.mubr.f32.mxu0 %v2278_v8  ;;  %v453_v2 = vld [vmem:[%s3426_s1 + $0xa0] sm:$0xff]  ;;  %v455_v3 = vld [vmem:[%s3426_s1 + $0xb0] sm:$0xff]  ;;  %v1958_v4 = vpack.c.bf16 %v1717_v58, %v1715_v57  ;;  %v458_v5 = vld [vmem:[%s3426_s1 + $0xc8] sm:$0xff]  ;;  %v1960_v7 = vpack.c.bf16 %v1722_v0, %v1720_v63 }
  0x1f   : > { %1993 = vmatprep.subr.bf16.mxu0 %v1992_v6  ;;  %1943 = vmatpush1.bf16.msra.mxu1 %v1942_v11  ;;  %v460_v6 = vld [vmem:[%s3426_s1 + $0xd8] sm:$0xff]  ;;  %v1719_v9 = vld [vmem:[%s3426_s1 + $0x360] sm:$0xff]  ;;  %v1721_v10 = vld [vmem:[%s3426_s1 + $0x370] sm:$0xff]  ;;  %v2604_v11 = vrot.slane %v2409_v35, %v319_v59  ;;  %v2010_v13 = vpack.c.bf16 %v455_v3, %v453_v2  ;;  %v2695_v2 = vadd.s32 32, %v2362_v14 }
  0x20   : > { %1945 = vmatprep.subr.bf16.mxu1 %v1944_v15  ;;  %v1724_v15 = vld [vmem:[%s3426_s1 + $0x388] sm:$0xff]  ;;  %v1726_v16 = vld [vmem:[%s3426_s1 + $0x398] sm:$0xff]  ;;  %v2012_v17 = vpack.c.bf16 %v460_v6, %v458_v5  ;;  %v459_v19 = vld [vmem:[%s3426_s1 + $0xd0] sm:$0xff]  ;;  %v1962_v22 = vpack.c.bf16 %v1721_v10, %v1719_v9 }
  0x21   : > { %v462_v20 = vld [vmem:[%s3426_s1 + $0xe8] sm:$0xff]  ;;  %v464_v23 = vld [vmem:[%s3426_s1 + $0xf8] sm:$0xff]  ;;  %v1964_v26 = vpack.c.bf16 %v1726_v16, %v1724_v15  ;;  %v300_v29 = vld [vmem:[%s2399_s26 + $0x20] sm:$0xff]  ;;  %vm412_vm3 = vcmp.le.s32.totalorder %v2695_v2, 32 }
  0x22   : > { %1995 = vmatpush1.bf16.msra.mxu0 %v1994_v18  ;;  %v457_v18 = vld [vmem:[%s3426_s1 + $0xc0] sm:$0xff]  ;;  %v297_v25 = vld [vmem:[%s2399_s26 + $0x8] sm:$0xff]  ;;  %v332_v34 = vmul.f32 %v2604_v11, %v300_v29  ;;  %v2016_v39 = vpack.c.bf16 %v464_v23, %v462_v20  ;;  %v463_v35 = vld [vmem:[%s3426_s1 + $0xf0] sm:$0xff] }
  0x23   : > { %1997 = vmatprep.subr.bf16.mxu0 %v1996_v21  ;;  %1947 = vmatpush1.bf16.msra.mxu1 %v1946_v24  ;;  %v2623_v21 = vrot.slane %v2414_v36, %v319_v59  ;;  %v1723_v24 = vld [vmem:[%s3426_s1 + $0x380] sm:$0xff]  ;;  %v1728_v28 = vld [vmem:[%s3426_s1 + $0x3a8] sm:$0xff]  ;;  %v2014_v32 = vpack.c.bf16 %v459_v19, %v457_v18  ;;  %v468_v47 = vld [vmem:[%s3426_s1 + $0x118] sm:$0xff] }
  0x24   : > { %1949 = vmatprep.subr.bf16.mxu1 %v1948_v27  ;;  %v1725_v27 = vld [vmem:[%s3426_s1 + $0x390] sm:$0xff]  ;;  %v296_v37 = vld [vmem:[%s2399_s26] sm:$0xff]  ;;  %v303_v58 = vld [vmem:[%s2399_s26 + $0x38] sm:$0xff] }
  0x25   : > { %v461_v42 = vld [vmem:[%s3426_s1 + $0xe0] sm:$0xff]  ;;  %v1966_v45 = vpack.c.bf16 %v1725_v27, %v1723_v24  ;;  %v364_v48 = vadd.f32 %v2623_v21, %v332_v34  ;;  %v1729_v54 = vld [vmem:[%s3426_s1 + $0x3b0] sm:$0xff]  ;;  %v328_v36 = vmul.f32 %v2641_v31, %v296_v37  ;;  %v1734_v63 = vld [vmem:[%s3426_s1 + $0x3d8] sm:$0xff] }
  0x26   : > { %1999 = vmatpush1.bf16.msra.mxu0 %v1998_v30  ;;  %v329_v30 = vmul.f32 %v2604_v11, %v297_v25  ;;  %v2673_v51 = vld [vmem:[%s3426_s1 + $0x100] sm:$0xff]  ;;  %v2018_v59 = vpack.c.bf16 %v463_v35, %v461_v42  ;;  %v470_v5 = vld [vmem:[%s3426_s1 + $0x128] sm:$0xff]  ;;  %v472_v6 = vld [vmem:[%s3426_s1 + $0x138] sm:$0xff] }
  0x27   : > { %2001 = vmatprep.subr.bf16.mxu0 %v2000_v33  ;;  %1951 = vmatpush1.bf16.msra.mxu1 %v1950_v38  ;;  %v1730_v33 = vld [vmem:[%s3426_s1 + $0x3b8] sm:$0xff]  ;;  %v304_v38 = vld [vmem:[%s2399_s26 + $0x40] sm:$0xff]  ;;  %v2691_v0 = vmax.f32 %v364_v48, 0.0  ;;  %v2729_v19 = vld [vmem:[%s3426_s1 + $0x130] sm:$0xff]  ;;  %v2740_v24 = vadd.f32 %v2668_v50, %v328_v36  ;;  %v2024_v29 = vpack.c.bf16 %v472_v6, %v470_v5 }
  0x28   : > { %1953 = vmatprep.subr.bf16.mxu1 %v1952_v43  ;;  %v2656_v43 = vadd.f32 %v2623_v21, %v329_v30  ;;  %v336_v44 = vmul.f32 %v2423_v40, %v304_v38  ;;  %v1727_v53 = vld [vmem:[%s3426_s1 + $0x3a0] sm:$0xff]  ;;  %v2737_v23 = vld [vmem:[%s3426_s1 + $0x148] sm:$0xff]  ;;  %v306_v34 = vld [vmem:[%s2399_s26 + $0x50] sm:$0xff] }
  0x29   : > { %v1970_v12 = vpack.c.bf16 %v1729_v54, %v1727_v53  ;;  %v590_v16 = vrot.slane %v2691_v0, 1  ;;  %v2724_v18 = vld [vmem:[%s3426_s1 + $0x120] sm:$0xff]  ;;  %v1736_v30 = vld [vmem:[%s3426_s1 + $0x3e8] sm:$0xff]  ;;  %v476_v37 = vld [vmem:[%s3426_s1 + $0x158] sm:$0xff]  ;;  %v375_v54 = vmax.f32 %v2740_v24, 0.0 }
  0x2a   : > { %2003 = vmatpush1.bf16.msra.mxu0 %v2002_v46  ;;  %v466_v46 = vld [vmem:[%s3426_s1 + $0x108] sm:$0xff]  ;;  %v368_v57 = vadd.f32 %v2426_v41, %v336_v44  ;;  %v310_v35 = vld [vmem:[%s2399_s26 + $0x70] sm:$0x3]  ;;  %v1742_v53 = vld [vmem:[%s3426_s1 + $0x418] sm:$0xff] }
  0x2b   : > { %2005 = vmatprep.subr.bf16.mxu0 %v2004_v49  ;;  %1955 = vmatpush1.bf16.msra.mxu1 %v1954_v52  ;;  %v299_v49 = vld [vmem:[%s2399_s26 + $0x18] sm:$0xff]  ;;  %v1968_v52 = vpack.c.bf16 %v1730_v33, %v1728_v28  ;;  %v2020_v3 = vpack.c.bf16 %v468_v47, %v466_v46  ;;  %v309_v44 = vld [vmem:[%s2399_s26 + $0x68] sm:$0x3]  ;;  %v1735_v46 = vld [vmem:[%s3426_s1 + $0x3e0] sm:$0xff] }
  0x2c   : > { %1957 = vmatprep.subr.bf16.mxu1 %v1956_v56  ;;  %v376_v56 = vmax.f32 %v2656_v43, 0.0  ;;  %v331_v9 = vmul.f32 %v2641_v31, %v299_v49  ;;  %v2713_v10 = vmax.f32 %v368_v57, 0.0  ;;  %v1737_v47 = vld [vmem:[%s3426_s1 + $0x3f0] sm:$0xff]  ;;  %v305_v49 = vld [vmem:[%s2399_s26 + $0x48] sm:$0xff]  ;;  %v338_v57 = vmul.f32 %v2604_v11, %v306_v34  ;;  %v489_v2 = vld [vmem:[%s3426_s1 + $0x1c0] sm:$0xff] }
  0x2d   : > { %v1978_v5 = vpack.c.bf16 %v1737_v47, %v1735_v46  ;;  %v478_v6 = vld [vmem:[%s3426_s1 + $0x168] sm:$0xff]  ;;  %v487_v43 = vld [vmem:[%s3426_s1 + $0x1b0] sm:$0xff] }
  0x2e   : > { %2007 = vmatpush1.bf16.msra.mxu0 %v2006_v60  ;;  %v1732_v60 = vld [vmem:[%s3426_s1 + $0x3c8] sm:$0xff]  ;;  %v599_v25 = vrot.slane %v2713_v10, 1  ;;  %v363_v38 = vadd.f32 %v2668_v50, %v331_v9  ;;  %v1767_v24 = vld [vmem:[%s3426_s1 + $0x490] sm:$0xff] }
  0x2f   : > { %2009 = vmatprep.subr.bf16.mxu0 %v2008_v1  ;;  %1959 = vmatpush1.bf16.msra.mxu1 %v1958_v4  ;;  %v307_v1 = vld [vmem:[%s2399_s26 + $0x58] sm:$0xff]  ;;  %v467_v4 = vld [vmem:[%s3426_s1 + $0x110] sm:$0xff]  ;;  %v1972_v20 = vpack.c.bf16 %v1734_v63, %v1732_v60  ;;  %v342_v60 = vmul.f32 %v2423_v40, %v310_v35  ;;  %v341_v63 = vmul.f32 %v2604_v11, %v309_v44  ;;  %v1770_v14 = vld [vmem:[%s3426_s1 + $0x4a8] sm:$0xff] }
  0x30   : > { %1961 = vmatprep.subr.bf16.mxu1 %v1960_v7  ;;  %v2710_v7 = vsel %vm403_vm0, %v376_v56, 0.0  ;;  %v339_v27 = vmul.f32 %v2423_v40, %v307_v1  ;;  %v2022_v28 = vpack.c.bf16 %v467_v4, %v2673_v51  ;;  %v308_v1 = vld [vmem:[%s2399_s26 + $0x60] sm:$0x3]  ;;  %v475_v4 = vld [vmem:[%s3426_s1 + $0x150] sm:$0xff]  ;;  %v2803_v9 = vmax.f32 %v363_v38, 0.0  ;;  %v482_v38 = vld [vmem:[%s3426_s1 + $0x188] sm:$0xff] }
  0x31   : > { %v589_v15 = vrot.slane %v2710_v7, 1 }
  0x32   : > { %2011 = vmatpush1.bf16.msra.mxu0 %v2010_v13  ;;  %v1731_v13 = vld [vmem:[%s3426_s1 + $0x3c0] sm:$0xff]  ;;  %v371_v42 = vadd.f32 %v2426_v41, %v339_v27  ;;  %v340_v27 = vmul.f32 %v2641_v31, %v308_v1 }
  0x33   : > { %2013 = vmatprep.subr.bf16.mxu0 %v2012_v17  ;;  %1963 = vmatpush1.bf16.msra.mxu1 %v1962_v22  ;;  %v335_v17 = vmul.f32 %v2604_v11, %v303_v58  ;;  %v1733_v22 = vld [vmem:[%s3426_s1 + $0x3d0] sm:$0xff]  ;;  %v591_v33 = vsel %vm585_vm1, %v589_v15, %v590_v16  ;;  %v2026_v58 = vpack.c.bf16 %v2729_v19, %v2724_v18  ;;  %v1739_v15 = vld [vmem:[%s3426_s1 + $0x400] sm:$0xff] }
  0x34   : > { %1965 = vmatprep.subr.bf16.mxu1 %v1964_v26  ;;  %v302_v26 = vld [vmem:[%s2399_s26 + $0x30] sm:$0xff]  ;;  %694 = vmatprep.mubr.f32.mxu1 %v591_v33  ;;  %v2785_v36 = vmax.f32 %v371_v42, 0.0  ;;  %v337_v11 = vmul.f32 %v2641_v31, %v305_v49  ;;  %v497_v49 = vld [vmem:[%s3426_s1 + $0x200] sm:$0xff] }
  0x35   : > { %v367_v48 = vadd.f32 %v2623_v21, %v335_v17  ;;  %v1741_v17 = vld [vmem:[%s3426_s1 + $0x410] sm:$0xff] }
  0x36   : > { %2015 = vmatpush1.bf16.msra.mxu0 %v2014_v32  ;;  %v1738_v32 = vld [vmem:[%s3426_s1 + $0x3f8] sm:$0xff]  ;;  %v605_v40 = vrot.slane %v2785_v36, 1  ;;  %v1982_v34 = vpack.c.bf16 %v1741_v17, %v1739_v15 }
  0x37   : > { %2017 = vmatprep.subr.bf16.mxu0 %v2016_v39  ;;  %1967 = vmatpush1.bf16.msra.mxu1 %v1966_v45  ;;  %v600_v39 = vsel %vm585_vm1, %v593_v62, %v599_v25  ;;  %v1974_v45 = vpack.c.bf16 %v1733_v22, %v1731_v13  ;;  %v334_v62 = vmul.f32 %v2641_v31, %v302_v26  ;;  %v2816_v18 = vmax.f32 %v367_v48, 0.0  ;;  %v479_v31 = vld [vmem:[%s3426_s1 + $0x170] sm:$0xff] }
  0x38   : > { %1969 = vmatprep.subr.bf16.mxu1 %v1968_v52  ;;  %1748 = vmatmul.mubr.msk.f32.gmra.mrb[2].mxu0 %vm621_vm2, %v600_v39  ;;  %v1976_v51 = vpack.c.bf16 %v1738_v32, %v1736_v30  ;;  %v1740_v52 = vld [vmem:[%s3426_s1 + $0x408] sm:$0xff]  ;;  %v2824_v22 = vsel %vm403_vm0, %v375_v54, 0.0  ;;  %v370_v26 = vadd.f32 %v2623_v21, %v338_v57  ;;  %v373_v30 = vadd.f32 %v2623_v21, %v341_v63  ;;  %v500_v32 = vld [vmem:[%s3426_s1 + $0x218] sm:$0xff] }
  0x39   : > { %795 = vmatprep.mubr.f32.mxu0 %v2278_v8  ;;  %v1980_v13 = vpack.c.bf16 %v1742_v53, %v1740_v52  ;;  %v366_v19 = vadd.f32 %v2668_v50, %v334_v62  ;;  %v587_v21 = vrot.slane %v2803_v9, 1  ;;  %v484_v39 = vld [vmem:[%s3426_s1 + $0x198] sm:$0xff]  ;;  %v586_v42 = vrot.slane %v2824_v22, 1 }
  0x3a   : > { %2019 = vmatpush1.bf16.msra.mxu0 %v2018_v59  ;;  %v2028_v59 = vpack.c.bf16 %v476_v37, %v2737_v23  ;;  %v606_v23 = vsel %vm585_vm1, %v599_v25, %v605_v40  ;;  %v477_v25 = vld [vmem:[%s3426_s1 + $0x160] sm:$0xff]  ;;  %v369_v37 = vadd.f32 %v2668_v50, %v337_v11  ;;  %v597_v35 = vrot.slane %v2816_v18, 1 }
  0x3b   : > { %2021 = vmatprep.subr.bf16.mxu0 %v2020_v3  ;;  %1971 = vmatpush1.bf16.msra.mxu1 %v1970_v12  ;;  %v473_v3 = vld [vmem:[%s3426_s1 + $0x140] sm:$0xff]  ;;  %v480_v12 = vld [vmem:[%s3426_s1 + $0x178] sm:$0xff]  ;;  %v2853_v44 = vmax.f32 %v366_v19, 0.0  ;;  %v2860_v46 = vmax.f32 %v370_v26, 0.0  ;;  %v372_v48 = vadd.f32 %v2668_v50, %v340_v27  ;;  %v2034_v52 = vpack.c.bf16 %v479_v31, %v477_v25  ;;  %v483_v50 = vld [vmem:[%s3426_s1 + $0x190] sm:$0xff] }
  0x3c   : > { %1973 = vmatprep.subr.bf16.mxu1 %v1972_v20  ;;  %v374_v20 = vadd.f32 %v2426_v41, %v342_v60  ;;  %v498_v41 = vld [vmem:[%s3426_s1 + $0x208] sm:$0xff]  ;;  %v2032_v33 = vpack.c.bf16 %v480_v12, %v478_v6  ;;  %1749 = vmatmul.mubr.msk.f32.gmra.mrb[4].mxu0 %vm621_vm2, %v606_v23  ;;  %v388_v53 = vmax.f32 %v373_v30, 0.0  ;;  %v2036_v57 = vpack.c.bf16 %v484_v39, %v482_v38  ;;  %v485_v19 = vld [vmem:[%s3426_s1 + $0x1a0] sm:$0xff]  ;;  %v492_v23 = vld [vmem:[%s3426_s1 + $0x1d8] sm:$0xff] }
  0x3d   : > { %801 = vmatprep.mubr.f32.mxu0 %v2278_v8  ;;  %v2052_v62 = vpack.c.bf16 %v500_v32, %v498_v41  ;;  %v588_v63 = vsel %vm585_vm1, %v586_v42, %v587_v21  ;;  %v1064_v1 = vrot.slane %v2824_v22, 2  ;;  %v603_v11 = vrot.slane %v2860_v46, 1  ;;  %v490_v22 = vld [vmem:[%s3426_s1 + $0x1c8] sm:$0xff] }
  0x3e   : > { %2023 = vmatpush1.bf16.msra.mxu0 %v2022_v28  ;;  %v2030_v28 = vpack.c.bf16 %v475_v4, %v473_v3  ;;  %v486_v3 = vld [vmem:[%s3426_s1 + $0x1a8] sm:$0xff]  ;;  %v488_v4 = vld [vmem:[%s3426_s1 + $0x1b8] sm:$0xff]  ;;  %v387_v12 = vmax.f32 %v372_v48, 0.0  ;;  %v431_v17 = vsel %vm412_vm3, %v388_v53, 0.0  ;;  %v1073_v26 = vrot.slane %v2853_v44, 2 }
  0x3f   : > { %2025 = vmatprep.subr.bf16.mxu0 %v2024_v29  ;;  %1975 = vmatpush1.bf16.msra.mxu1 %v1974_v45  ;;  %v389_v29 = vmax.f32 %v374_v20, 0.0  ;;  %v1071_v27 = vrot.slane %v2451_v55, 2  ;;  %v2042_v32 = vpack.c.bf16 %v487_v43, %v485_v19  ;;  %v1081_v31 = vrot.slane %v2860_v46, 2  ;;  %v494_v42 = vld [vmem:[%s3426_s1 + $0x1e8] sm:$0xff]  ;;  %v1764_v19 = vld [vmem:[%s3426_s1 + $0x478] sm:$0xff] }
  0x40   : > { %1977 = vmatprep.subr.bf16.mxu1 %v1976_v51  ;;  %v499_v51 = vld [vmem:[%s3426_s1 + $0x210] sm:$0xff]  ;;  %v430_v30 = vsel %vm412_vm3, %v387_v12, 0.0  ;;  %v1087_v39 = vrot.slane %v431_v17, 2 }
  0x41   : > { %v2858_v45 = vsel %vm412_vm3, %v389_v29, 0.0  ;;  %v2054_v6 = vpack.c.bf16 %v499_v51, %v497_v49  ;;  %v609_v29 = vrot.slane %v431_v17, 1  ;;  %v1077_v49 = vrot.slane %v2713_v10, 2  ;;  %v1759_v17 = vld [vmem:[%s3426_s1 + $0x450] sm:$0xff] }
  0x42   : > { %2027 = vmatpush1.bf16.msra.mxu0 %v2026_v58  ;;  %v611_v47 = vrot.slane %v2858_v45, 1  ;;  %v481_v58 = vld [vmem:[%s3426_s1 + $0x180] sm:$0xff]  ;;  %v2952_v53 = vsel %vm1063_vm4, %v1081_v31, %v1087_v39 }
  0x43   : > { %2029 = vmatprep.subr.bf16.mxu0 %v2028_v59  ;;  %1979 = vmatpush1.bf16.msra.mxu1 %v1978_v5  ;;  %v2876_v59 = vmax.f32 %v369_v37, 0.0  ;;  %v595_v5 = vrot.slane %v2853_v44, 1  ;;  %v2038_v15 = vpack.c.bf16 %v483_v50, %v481_v58  ;;  %v610_v51 = vsel %vm585_vm1, %v603_v11, %v609_v29  ;;  %v1773_v39 = vld [vmem:[%s3426_s1 + $0x4c0] sm:$0xff] }
  0x44   : > { %1981 = vmatprep.subr.bf16.mxu1 %v1980_v13  ;;  %v612_v60 = vsel %vm585_vm1, %v605_v40, %v611_v47  ;;  %v598_v40 = vsel %vm585_vm1, %v590_v16, %v597_v35  ;;  %v1065_v13 = vrot.slane %v2803_v9, 2  ;;  %v2040_v16 = vpack.c.bf16 %v488_v4, %v486_v3  ;;  %v495_v3 = vld [vmem:[%s3426_s1 + $0x1f0] sm:$0xff] }
  0x45   : > { %1750 = vmatmul.mubr.msk.f32.gmra.mrb[6].mxu0 %vm621_vm2, %v612_v60  ;;  %v596_v20 = vsel %vm585_vm1, %v587_v21, %v595_v5  ;;  %v491_v21 = vld [vmem:[%s3426_s1 + $0x1d0] sm:$0xff]  ;;  %v1079_v38 = vrot.slane %v2876_v59, 2  ;;  %v607_v47 = vrot.slane %v430_v30, 1  ;;  %v2960_v50 = vsel %vm1063_vm4, %v1071_v27, %v1077_v49 }
  0x46   : > { %2031 = vmatpush1.bf16.msra.mxu0 %v2030_v28  ;;  %1751 = vmatprep.mubr.msk.f32.mxu0 %vm403_vm0, %v376_v56  ;;  %v601_v56 = vrot.slane %v2876_v59, 1  ;;  %v604_v28 = vsel %vm585_vm1, %v597_v35, %v603_v11  ;;  %v2920_v41 = vsel %vm1063_vm4, %v1064_v1, %v1065_v13  ;;  %v2924_v25 = vsel %vm1063_vm4, %v1065_v13, %v1073_v26  ;;  %v496_v35 = vld [vmem:[%s3426_s1 + $0x1f8] sm:$0xff]  ;;  %v493_v1 = vld [vmem:[%s3426_s1 + $0x1e0] sm:$0xff] }
  0x47   : > { %2033 = vmatprep.subr.bf16.mxu0 %v2032_v33  ;;  %1983 = vmatpush1.bf16.msra.mxu1 %v1982_v34  ;;  %v1075_v33 = vrot.slane %v2816_v18, 2  ;;  %v2044_v34 = vpack.c.bf16 %v492_v23, %v490_v22  ;;  %v1083_v60 = vrot.slane %v2785_v36, 2  ;;  %v1089_v4 = vrot.slane %v2858_v45, 2  ;;  %v1763_v22 = vld [vmem:[%s3426_s1 + $0x470] sm:$0xff]  ;;  %v1766_v23 = vld [vmem:[%s3426_s1 + $0x488] sm:$0xff] }
  0x48   : > { %2053 = vmatprep.subr.bf16.mxu1 %v2052_v62  ;;  %v602_v37 = vsel %vm585_vm1, %v595_v5, %v601_v56  ;;  %v1085_v62 = vrot.slane %v430_v30, 2  ;;  %v608_v5 = vsel %vm585_vm1, %v601_v56, %v607_v47  ;;  %v2050_v13 = vpack.c.bf16 %v495_v3, %v493_v1  ;;  %v1765_v30 = vld [vmem:[%s3426_s1 + $0x480] sm:$0xff]  ;;  %v1783_v1 = vld [vmem:[%s3426_s1 + $0x510] sm:$0xff]  ;;  %v1786_v3 = vld [vmem:[%s3426_s1 + $0x528] sm:$0xff] }
  0x49   : > { %v2944_v48 = vsel %vm1063_vm4, %v1075_v33, %v1081_v31  ;;  %v2978_v11 = vsel %vm1063_vm4, %v1077_v49, %v1083_v60  ;;  %v2981_v12 = vsel %vm1063_vm4, %v1083_v60, %v1089_v4  ;;  %v1779_v49 = vld [vmem:[%s3426_s1 + $0x4f0] sm:$0xff]  ;;  %v1788_v4 = vld [vmem:[%s3426_s1 + $0x538] sm:$0xff] }
  0x4a   : > { %2035 = vmatpush1.bf16.msra.mxu0 %v2034_v52  ;;  %695 = vmatmul.mubr.f32.vlgmr.msra.gmra.mrb[0].mxu1 %v588_v63  ;;  %v2949_v52 = vsel %vm1063_vm4, %v1073_v26, %v1079_v38  ;;  %v2955_v58 = vsel %vm1063_vm4, %v1079_v38, %v1085_v62  ;;  %v2048_v63 = vpack.c.bf16 %v496_v35, %v494_v42  ;;  %v1768_v26 = vld [vmem:[%s3426_s1 + $0x498] sm:$0xff]  ;;  %v1775_v42 = vld [vmem:[%s3426_s1 + $0x4d0] sm:$0xff]  ;;  %v1777_v62 = vld [vmem:[%s3426_s1 + $0x4e0] sm:$0xff] }
  0x4b   : > { %2037 = vmatprep.subr.bf16.mxu0 %v2036_v57  ;;  %700 = vmatprep.mubr.f32.mxu1 %v598_v40  ;;  %v2046_v57 = vpack.c.bf16 %v491_v21, %v489_v2  ;;  %v1760_v40 = vld [vmem:[%s3426_s1 + $0x458] sm:$0xff]  ;;  %v2064_v29 = vpack.c.bf16 %v1768_v26, %v1766_v23  ;;  %v1771_v2 = vld [vmem:[%s3426_s1 + $0x4b0] sm:$0xff]  ;;  %v1067_v21 = vrot.slane %v2710_v7, 2  ;;  %v2074_v35 = vpack.c.bf16 %v1775_v42, %v1773_v39  ;;  %v1793_v26 = vld [vmem:[%s3426_s1 + $0x560] sm:$0xff] }
  0x4c   : > { %2055 = vmatpush1.bf16.msra.mxu1 %v2054_v6  ;;  %v1758_v6 = vld [vmem:[%s3426_s1 + $0x448] sm:$0xff] }
  0x4d   : > { %v2056_v45 = vpack.c.bf16 %v1760_v40, %v1758_v6  ;;  %v2084_v6 = vpack.c.bf16 %v1788_v4, %v1786_v3  ;;  %v1785_v40 = vld [vmem:[%s3426_s1 + $0x520] sm:$0xff]  ;;  %v1815_v3 = vld [vmem:[%s3426_s1 + $0x610] sm:$0xff]  ;;  %v1818_v4 = vld [vmem:[%s3426_s1 + $0x628] sm:$0xff] }
  0x4e   : > { %2039 = vmatpush1.bf16.msra.mxu0 %v2038_v15  ;;  %701 = vmatmul.mubr.f32.gmra.mrb[2].mxu1 %v596_v20  ;;  %v1757_v15 = vld [vmem:[%s3426_s1 + $0x440] sm:$0xff] }
  0x4f   : > { %2041 = vmatprep.subr.bf16.mxu0 %v2040_v16  ;;  %706 = vmatprep.mubr.f32.mxu1 %v604_v28  ;;  %v1762_v16 = vld [vmem:[%s3426_s1 + $0x468] sm:$0xff]  ;;  %v2058_v43 = vpack.c.bf16 %v1759_v17, %v1757_v15  ;;  %v1761_v20 = vld [vmem:[%s3426_s1 + $0x460] sm:$0xff]  ;;  %v1792_v15 = vld [vmem:[%s3426_s1 + $0x558] sm:$0xff] }
  0x50   : > { %v2060_v56 = vpack.c.bf16 %v1764_v19, %v1762_v16  ;;  %v2062_v28 = vpack.c.bf16 %v1763_v22, %v1761_v20  ;;  %v1789_v19 = vld [vmem:[%s3426_s1 + $0x540] sm:$0xff]  ;;  %v1796_v20 = vld [vmem:[%s3426_s1 + $0x578] sm:$0xff] }
  0x52   : > { %2043 = vmatpush1.bf16.msra.mxu0 %v2042_v32  ;;  %707 = vmatmul.mubr.f32.gmra.mrb[4].mxu1 %v602_v37  ;;  %v2066_v32 = vpack.c.bf16 %v1767_v24, %v1765_v30  ;;  %v1774_v37 = vld [vmem:[%s3426_s1 + $0x4c8] sm:$0xff]  ;;  %v1800_v30 = vld [vmem:[%s3426_s1 + $0x598] sm:$0xff] }
  0x53   : > { %2045 = vmatprep.subr.bf16.mxu0 %v2044_v34  ;;  %712 = vmatprep.mubr.f32.mxu1 %v610_v51  ;;  %v1769_v34 = vld [vmem:[%s3426_s1 + $0x4a0] sm:$0xff]  ;;  %v1782_v51 = vld [vmem:[%s3426_s1 + $0x508] sm:$0xff] }
  0x54   : > { %v2070_v38 = vpack.c.bf16 %v1771_v2, %v1769_v34  ;;  %v1804_v34 = vld [vmem:[%s3426_s1 + $0x5b8] sm:$0xff] }
  0x56   : > { %2047 = vmatpush1.bf16.msra.mxu0 %v2046_v57  ;;  %713 = vmatmul.mubr.f32.gmra.mrb[6].mxu1 %v608_v5  ;;  %v2078_v57 = vpack.c.bf16 %v1779_v49, %v1777_v62  ;;  %v1809_v49 = vld [vmem:[%s3426_s1 + $0x5e0] sm:$0xff] }
  0x57   : > { %2049 = vmatprep.subr.bf16.mxu0 %v2048_v63  ;;  %969 = vmatprep.mubr.f32.mxu1 %v2278_v8  ;;  %v1781_v63 = vld [vmem:[%s3426_s1 + $0x500] sm:$0xff] }
  0x58   : > { %v2082_v5 = vpack.c.bf16 %v1783_v1, %v1781_v63  ;;  %v1813_v1 = vld [vmem:[%s3426_s1 + $0x600] sm:$0xff] }
  0x5a   : > { %2051 = vmatpush1.bf16.msra.mxu0 %v2050_v13  ;;  %1753 = vmatmul.mubr.msk.f32.vlgmr.msra.gmra.mrb[8].mxu1 %vm621_vm2, %v2467_v61  ;;  %v1787_v13 = vld [vmem:[%s3426_s1 + $0x530] sm:$0xff] }
  0x5b   : > { %2057 = vmatprep.subr.bf16.mxu0 %v2056_v45  ;;  %975 = vmatprep.mubr.f32.mxu1 %v2278_v8  ;;  %v1790_v45 = vld [vmem:[%s3426_s1 + $0x548] sm:$0xff]  ;;  %v2086_v17 = vpack.c.bf16 %v1787_v13, %v1785_v40  ;;  %v1817_v13 = vld [vmem:[%s3426_s1 + $0x620] sm:$0xff] }
  0x5c   : > { %v2088_v16 = vpack.c.bf16 %v1792_v15, %v1790_v45  ;;  %v1819_v45 = vld [vmem:[%s3426_s1 + $0x630] sm:$0xff]  ;;  %v1822_v15 = vld [vmem:[%s3426_s1 + $0x648] sm:$0xff] }
  0x5d   : > { %1752 = vmatmul.mubr.msk.f32.vlgmr.msra.gmra.mrb[0].mxu0 %vm403_vm0, %v375_v54  ;;  %v1772_v54 = vld [vmem:[%s3426_s1 + $0x4b8] sm:$0xff] }
  0x5e   : > { %2059 = vmatpush1.bf16.msra.mxu0 %v2058_v43  ;;  %886 = vmatprep.mubr.f32.mxu0 %v2691_v0  ;;  %v2068_v31 = vpack.c.bf16 %v1772_v54, %v1770_v14  ;;  %v1791_v43 = vld [vmem:[%s3426_s1 + $0x550] sm:$0xff]  ;;  %v1797_v54 = vld [vmem:[%s3426_s1 + $0x580] sm:$0xff] }
  0x5f   : > { %2061 = vmatprep.subr.bf16.mxu0 %v2060_v56  ;;  %1754 = vmatmul.mubr.msk.f32.gmra.mrb[10].mxu1 %vm621_vm2, %v2451_v55  ;;  %v1794_v56 = vld [vmem:[%s3426_s1 + $0x568] sm:$0xff]  ;;  %v2090_v22 = vpack.c.bf16 %v1791_v43, %v1789_v19  ;;  %v1821_v43 = vld [vmem:[%s3426_s1 + $0x640] sm:$0xff] }
  0x60   : > { %981 = vmatprep.mubr.f32.mxu1 %v2278_v8  ;;  %v2092_v23 = vpack.c.bf16 %v1796_v20, %v1794_v56  ;;  %v1823_v56 = vld [vmem:[%s3426_s1 + $0x650] sm:$0xff]  ;;  %v1309_v55 = vld [vmem:[%s3427_s2 + $0x80] sm:$0xff] }
  0x61   : > { %887 = vmatmul.mubr.f32.gmra.mrb[2].mxu0 %v2803_v9  ;;  %v1068_v9 = vrot.slane %v2691_v0, 2  ;;  %v2122_v20 = vpack.c.bf16 %v1823_v56, %v1821_v43 }
  0x62   : > { %2063 = vmatpush1.bf16.msra.mxu0 %v2062_v28  ;;  %892 = vmatprep.mubr.f32.mxu0 %v2816_v18  ;;  %v1795_v28 = vld [vmem:[%s3426_s1 + $0x570] sm:$0xff]  ;;  %v1293_v18 = vld [vmem:[%s3427_s2] sm:$0xff] }
  0x63   : > { %2065 = vmatprep.subr.bf16.mxu0 %v2064_v29  ;;  %1755 = vmatmul.mubr.msk.f32.gmra.mrb[12].mxu1 %vm621_vm2, %v2713_v10  ;;  %v1776_v10 = vld [vmem:[%s3426_s1 + $0x4d8] sm:$0xff]  ;;  %v1798_v29 = vld [vmem:[%s3426_s1 + $0x588] sm:$0xff]  ;;  %v2094_v24 = vpack.c.bf16 %v1795_v28, %v1793_v26  ;;  %v1315_v28 = vld [vmem:[%s3427_s2 + $0xb0] sm:$0xff] }
  0x64   : > { %987 = vmatprep.mubr.f32.mxu1 %v2278_v8  ;;  %v2072_v7 = vpack.c.bf16 %v1776_v10, %v1774_v37  ;;  %v2096_v14 = vpack.c.bf16 %v1800_v30, %v1798_v29  ;;  %v1801_v37 = vld [vmem:[%s3426_s1 + $0x5a0] sm:$0xff]  ;;  %v1803_v10 = vld [vmem:[%s3426_s1 + $0x5b0] sm:$0xff]  ;;  %v1298_v26 = vld [vmem:[%s3427_s2 + $0x28] sm:$0xff] }
  0x65   : > { %893 = vmatmul.mubr.f32.gmra.mrb[4].mxu0 %v2853_v44  ;;  %v1069_v44 = vsel %vm1063_vm4, %v1067_v21, %v1068_v9  ;;  %v2102_v39 = vpack.c.bf16 %v1803_v10, %v1801_v37  ;;  %v1316_v29 = vld [vmem:[%s3427_s2 + $0xb8] sm:$0xff]  ;;  %v1302_v37 = vld [vmem:[%s3427_s2 + $0x48] sm:$0xff]  ;;  %v1319_v10 = vld [vmem:[%s3427_s2 + $0xd0] sm:$0xff] }
  0x66   : > { %2067 = vmatpush1.bf16.msra.mxu0 %v2066_v32  ;;  %898 = vmatprep.mubr.f32.mxu0 %v2860_v46  ;;  %v1778_v46 = vld [vmem:[%s3426_s1 + $0x4e8] sm:$0xff]  ;;  %v1799_v32 = vld [vmem:[%s3426_s1 + $0x590] sm:$0xff] }
  0x67   : > { %2069 = vmatprep.subr.bf16.mxu0 %v2068_v31  ;;  %1756 = vmatmul.mubr.msk.f32.gmra.mrb[14].mxu1 %vm621_vm2, %v2785_v36  ;;  %v1780_v36 = vld [vmem:[%s3426_s1 + $0x4f8] sm:$0xff]  ;;  %v1802_v31 = vld [vmem:[%s3426_s1 + $0x5a8] sm:$0xff]  ;;  %v2098_v2 = vpack.c.bf16 %v1799_v32, %v1797_v54  ;;  %v1317_v32 = vld [vmem:[%s3427_s2 + $0xc0] sm:$0xff] }
  0x68   : > { %v2076_v47 = vpack.c.bf16 %v1780_v36, %v1778_v46  ;;  %v2100_v21 = vpack.c.bf16 %v1804_v34, %v1802_v31  ;;  %v1807_v46 = vld [vmem:[%s3426_s1 + $0x5d0] sm:$0xff]  ;;  %v1810_v36 = vld [vmem:[%s3426_s1 + $0x5e8] sm:$0xff]  ;;  %v1300_v54 = vld [vmem:[%s3427_s2 + $0x38] sm:$0xff] }
  0x69   : > { %899 = vmatmul.mubr.f32.gmra.mrb[6].mxu0 %v2876_v59  ;;  %v1784_v59 = vld [vmem:[%s3426_s1 + $0x518] sm:$0xff]  ;;  %v1318_v31 = vld [vmem:[%s3427_s2 + $0xc8] sm:$0xff] }
  0x6a   : > { %2071 = vmatpush1.bf16.msra.mxu0 %v2070_v38  ;;  %1171 = vmatprep.mubr.f32.mxu0 %v1069_v44  ;;  %v2080_v60 = vpack.c.bf16 %v1784_v59, %v1782_v51  ;;  %v1806_v38 = vld [vmem:[%s3426_s1 + $0x5c8] sm:$0xff]  ;;  %v1805_v44 = vld [vmem:[%s3426_s1 + $0x5c0] sm:$0xff]  ;;  %v1811_v51 = vld [vmem:[%s3426_s1 + $0x5f0] sm:$0xff] }
  0x6b   : > { %2073 = vmatprep.subr.bf16.mxu0 %v2072_v7  ;;  %v1808_v7 = vld [vmem:[%s3426_s1 + $0x5d8] sm:$0xff]  ;;  %v1814_v59 = vld [vmem:[%s3426_s1 + $0x608] sm:$0xff] }
  0x6c   : > { %v2104_v42 = vpack.c.bf16 %v1808_v7, %v1806_v38  ;;  %v1320_v38 = vld [vmem:[%s3427_s2 + $0xd8] sm:$0xff] }
  0x6e   : > { %2075 = vmatpush1.bf16.msra.mxu0 %v2074_v35  ;;  %v1812_v35 = vld [vmem:[%s3426_s1 + $0x5f8] sm:$0xff] }
  0x6f   : > { %2077 = vmatprep.subr.bf16.mxu0 %v2076_v47  ;;  %v2106_v47 = vpack.c.bf16 %v1807_v46, %v1805_v44  ;;  %v2108_v62 = vpack.c.bf16 %v1812_v35, %v1810_v36  ;;  %v1304_v44 = vld [vmem:[%s3427_s2 + $0x58] sm:$0xff]  ;;  %v1321_v46 = vld [vmem:[%s3427_s2 + $0xe0] sm:$0xff]  ;;  %v1322_v36 = vld [vmem:[%s3427_s2 + $0xe8] sm:$0xff] }
  0x72   : > { %2079 = vmatpush1.bf16.msra.mxu0 %v2078_v57  ;;  %v1816_v57 = vld [vmem:[%s3426_s1 + $0x618] sm:$0xff] }
  0x73   : > { %2081 = vmatprep.subr.bf16.mxu0 %v2080_v60  ;;  %v2110_v60 = vpack.c.bf16 %v1811_v51, %v1809_v49  ;;  %v2112_v63 = vpack.c.bf16 %v1816_v57, %v1814_v59  ;;  %v1306_v49 = vld [vmem:[%s3427_s2 + $0x68] sm:$0xff]  ;;  %v1323_v59 = vld [vmem:[%s3427_s2 + $0xf0] sm:$0xff]  ;;  %v1324_v57 = vld [vmem:[%s3427_s2 + $0xf8] sm:$0xff] }
  0x76   : > { %2083 = vmatpush1.bf16.msra.mxu0 %v2082_v5  ;;  %v1820_v5 = vld [vmem:[%s3426_s1 + $0x638] sm:$0xff] }
  0x77   : > { %2085 = vmatprep.subr.bf16.mxu0 %v2084_v6  ;;  %v2114_v6 = vpack.c.bf16 %v1815_v3, %v1813_v1  ;;  %v2116_v40 = vpack.c.bf16 %v1820_v5, %v1818_v4  ;;  %v1308_v1 = vld [vmem:[%s3427_s2 + $0x78] sm:$0xff] }
  0x7a   : > { %2087 = vmatpush1.bf16.msra.mxu0 %v2086_v17  ;;  %v1824_v17 = vld [vmem:[%s3426_s1 + $0x658] sm:$0xff] }
  0x7b   : > { %2089 = vmatprep.subr.bf16.mxu0 %v2088_v16  ;;  %v2118_v16 = vpack.c.bf16 %v1819_v45, %v1817_v13  ;;  %v2120_v19 = vpack.c.bf16 %v1824_v17, %v1822_v15 }
  0x7e   : > { %2091 = vmatpush1.bf16.msra.mxu0 %v2090_v22  ;;  %v1076_v22 = vsel %vm1063_vm4, %v1068_v9, %v1075_v33  ;;  %v1312_v33 = vld [vmem:[%s3427_s2 + $0x98] sm:$0xff]  ;;  %v1297_v9 = vld [vmem:[%s3427_s2 + $0x20] sm:$0xff] }
  0x7f   : > { %2093 = vmatprep.subr.bf16.mxu0 %v2092_v23  ;;  %v1070_v23 = vrot.slane %v2467_v61, 2  ;;  %v1310_v61 = vld [vmem:[%s3427_s2 + $0x88] sm:$0xff]  ;;  %v3287_v30 = vpack.c.bf16 %v1298_v26, %v1297_v9 }
  0x81   : > { %v1072_v0 = vsel %vm1063_vm4, %v1070_v23, %v1071_v27  ;;  %v2124_v27 = vpack.c.bf16 %v1310_v61, %v1309_v55 }
  0x82   : > { %2095 = vmatpush1.bf16.msra.mxu0 %v2094_v24  ;;  %v3290_v24 = vpack.c.bf16 %v1316_v29, %v1315_v28 }
  0x83   : > { %2097 = vmatprep.subr.bf16.mxu0 %v2096_v14  ;;  %2125 = vmatprep.subr.bf16.mxu1 %v2124_v27  ;;  %v1299_v14 = vld [vmem:[%s3427_s2 + $0x30] sm:$0xff] }
  0x84   : > { %v3305_v34 = vpack.c.bf16 %v1300_v54, %v1299_v14 }
  0x86   : > { %2099 = vmatpush1.bf16.msra.mxu0 %v2098_v2  ;;  %v3308_v2 = vpack.c.bf16 %v1318_v31, %v1317_v32 }
  0x87   : > { %2101 = vmatprep.subr.bf16.mxu0 %v2100_v21  ;;  %v1301_v21 = vld [vmem:[%s3427_s2 + $0x40] sm:$0xff] }
  0x88   : > { %v3323_v7 = vpack.c.bf16 %v1302_v37, %v1301_v21 }
  0x8a   : > { %2103 = vmatpush1.bf16.msra.mxu0 %v2102_v39  ;;  %v3326_v39 = vpack.c.bf16 %v1320_v38, %v1319_v10 }
  0x8b   : > { %2105 = vmatprep.subr.bf16.mxu0 %v2104_v42  ;;  %v1303_v42 = vld [vmem:[%s3427_s2 + $0x50] sm:$0xff] }
  0x8c   : > { %v3341_v35 = vpack.c.bf16 %v1304_v44, %v1303_v42 }
  0x8e   : > { %2107 = vmatpush1.bf16.msra.mxu0 %v2106_v47  ;;  %v3344_v47 = vpack.c.bf16 %v1322_v36, %v1321_v46 }
  0x8f   : > { %2109 = vmatprep.subr.bf16.mxu0 %v2108_v62  ;;  %v1305_v62 = vld [vmem:[%s3427_s2 + $0x60] sm:$0xff] }
  0x90   : > { %v3353_v51 = vpack.c.bf16 %v1306_v49, %v1305_v62 }
  0x92   : > { %2111 = vmatpush1.bf16.msra.mxu0 %v2110_v60  ;;  %v3363_v60 = vpack.c.bf16 %v1324_v57, %v1323_v59 }
  0x93   : > { %2113 = vmatprep.subr.bf16.mxu0 %v2112_v63  ;;  %v1307_v63 = vld [vmem:[%s3427_s2 + $0x70] sm:$0xff] }
  0x94   : > { %v3371_v3 = vpack.c.bf16 %v1308_v1, %v1307_v63 }
  0x96   : > { %2115 = vmatpush1.bf16.msra.mxu0 %v2114_v6 }
  0x97   : > { %2117 = vmatprep.subr.bf16.mxu0 %v2116_v40 }
  0x9a   : > { %2119 = vmatpush1.bf16.msra.mxu0 %v2118_v16 }
  0x9b   : > { %2121 = vmatprep.subr.bf16.mxu0 %v2120_v19 }
  0x9d   : > { %1172 = vmatmul.mubr.f32.vlgmr.msra.gmra.mrb[8].mxu0 %v2920_v41  ;;  %v1311_v41 = vld [vmem:[%s3427_s2 + $0x90] sm:$0xff] }
  0x9e   : > { %2123 = vmatpush1.bf16.msra.mxu0 %v2122_v20  ;;  %1177 = vmatprep.mubr.f32.mxu0 %v1076_v22 }
  0xa1   : > { %1178 = vmatmul.mubr.f32.gmra.mrb[10].mxu0 %v2924_v25 }
  0xa2   : > { %1183 = vmatprep.mubr.f32.mxu0 %v2944_v48  ;;  %v3254_v48 = vpack.c.bf16 %v1312_v33, %v1311_v41 }
  0xa5   : > { %1184 = vmatmul.mubr.f32.gmra.mrb[12].mxu0 %v2949_v52  ;;  %v1295_v52 = vld [vmem:[%s3427_s2 + $0x10] sm:$0xff] }
  0xa6   : > { %1189 = vmatprep.mubr.f32.mxu0 %v2952_v53  ;;  %v1296_v53 = vld [vmem:[%s3427_s2 + $0x18] sm:$0xff] }
  0xa9   : > { %1190 = vmatmul.mubr.f32.gmra.mrb[14].mxu0 %v2955_v58  ;;  %v1313_v58 = vld [vmem:[%s3427_s2 + $0xa0] sm:$0xff] }
  0xaa   : > { %1260 = vmatprep.mubr.f32.mxu0 %v2278_v8 }
  0xad   : > { %1825 = vmatmul.mubr.msk.f32.vlgmr.msra.gmra.mrb[8].mxu0 %vm621_vm2, %v1072_v0 }
  0xae   : > { %1266 = vmatprep.mubr.f32.mxu0 %v2278_v8 }
  0xb1   : > { %1826 = vmatmul.mubr.msk.f32.gmra.mrb[10].mxu0 %vm621_vm2, %v2960_v50  ;;  %v1314_v50 = vld [vmem:[%s3427_s2 + $0xa8] sm:$0xff] }
  0xb2   : > { %1272 = vmatprep.mubr.f32.mxu0 %v2278_v8 }
  0xb5   : > { %1827 = vmatmul.mubr.msk.f32.gmra.mrb[12].mxu0 %vm621_vm2, %v2978_v11  ;;  %v3269_v11 = vpack.c.bf16 %v1296_v53, %v1295_v52 }
  0xb6   : > { %1278 = vmatprep.mubr.f32.mxu0 %v2278_v8  ;;  %v1294_v8 = vld [vmem:[%s3427_s2 + $0x8] sm:$0xff] }
  0xb7   : > { %v3252_v25 = vpack.c.bf16 %v1294_v8, %v1293_v18 }
  0xb9   : > { %1828 = vmatmul.mubr.msk.f32.gmra.mrb[14].mxu0 %vm621_vm2, %v2981_v12  ;;  %2127 = vmatpush3.bf16.msra.mxu1 %v3252_v25  ;;  %v3272_v12 = vpack.c.bf16 %v1314_v50, %v1313_v58 }
  0xba   : > { %2129 = vmatprep.subr.bf16.mxu1 %v3254_v48 }
  0xbd   : > { %2131 = vmatpush3.bf16.msra.mxu1 %v3269_v11 }
  0xbe   : > { %2133 = vmatprep.subr.bf16.mxu1 %v3272_v12 }
  0xc1   : > { %2135 = vmatpush3.bf16.msra.mxu1 %v3287_v30 }
  0xc2   : > { %2137 = vmatprep.subr.bf16.mxu1 %v3290_v24 }
  0xc5   : > { %2139 = vmatpush3.bf16.msra.mxu1 %v3305_v34 }
  0xc6   : > { %2141 = vmatprep.subr.bf16.mxu1 %v3308_v2 }
  0xc9   : > { %2143 = vmatpush3.bf16.msra.mxu1 %v3323_v7 }
  0xca   : > { %2145 = vmatprep.subr.bf16.mxu1 %v3326_v39 }
  0xcd   : > { %2147 = vmatpush3.bf16.msra.mxu1 %v3341_v35 }
  0xce   : > { %2149 = vmatprep.subr.bf16.mxu1 %v3344_v47 }
  0xd1   : > { %2151 = vmatpush3.bf16.msra.mxu1 %v3353_v51 }
  0xd2   : > { %2153 = vmatprep.subr.bf16.mxu1 %v3363_v60 }
  0xd5   : > { %2155 = vmatpush3.bf16.msra.mxu1 %v3371_v3 }
  0xd6   : > { %2157 = vmatprep.subr.bf16.mxu1 %v2124_v27 }
 0x11d   : > { %v696_v4 = vpop.f32.mrb[0].mxu1 }
 0x11e   : > { %v698_v5 = vpop.f32.mrb[1].mxu1 }
 0x121   : > { %v702_v6 = vpop.f32.mrb[2].mxu1 }
 0x122   : > { %v704_v40 = vpop.f32.mrb[3].mxu1 }
 0x125   : > { %v708_v13 = vpop.f32.mrb[4].mxu1 }
 0x126   : > { %v710_v45 = vpop.f32.mrb[5].mxu1 }
 0x129   : > { %v714_v15 = vpop.f32.mrb[6].mxu1 }
 0x12a   : > { %v716_v17 = vpop.f32.mrb[7].mxu1 }
 0x12d   : > { %v971_v16 = vpop.f32.mrb[8].mxu1 }
 0x12e   : > { %v973_v19 = vpop.f32.mrb[9].mxu1 }
 0x130   : > { %v882_v43 = vpop.f32.mrb[0].mxu0 }
 0x131   : > { %v2188_v56 = vadd.f32 %v882_v43, %v696_v4  ;;  %v884_v20 = vpop.f32.mrb[1].mxu0 }
 0x132   : > { %v2191_v22 = vadd.f32 %v884_v20, %v698_v5  ;;  %v977_v23 = vpop.f32.mrb[10].mxu1 }
 0x133   : > { %v2189_v0 = vadd.f32 %v2188_v56, %v971_v16  ;;  %v979_v55 = vpop.f32.mrb[11].mxu1 }
 0x134   : > { %v2192_v61 = vadd.f32 %v2191_v22, %v973_v19  ;;  %v888_v18 = vpop.f32.mrb[2].mxu0 }
 0x135   : > { %v2194_v27 = vadd.f32 %v888_v18, %v702_v6  ;;  %v890_v8 = vpop.f32.mrb[3].mxu0 }
 0x136   : > { %v2197_v41 = vadd.f32 %v890_v8, %v704_v40  ;;  %v983_v33 = vpop.f32.mrb[12].mxu1 }
 0x137   : > { %v2195_v52 = vadd.f32 %v2194_v27, %v977_v23  ;;  %v985_v53 = vpop.f32.mrb[13].mxu1 }
 0x138   : > { %v2198_v58 = vadd.f32 %v2197_v41, %v979_v55  ;;  %v894_v50 = vpop.f32.mrb[4].mxu0 }
 0x139   : > { %v2200_v9 = vadd.f32 %v894_v50, %v708_v13  ;;  %v896_v26 = vpop.f32.mrb[5].mxu0 }
 0x13a   : > { %v2203_v28 = vadd.f32 %v896_v26, %v710_v45  ;;  %v989_v29 = vpop.f32.mrb[14].mxu1 }
 0x13b   : > { %v2201_v14 = vadd.f32 %v2200_v9, %v983_v33  ;;  %v991_v54 = vpop.f32.mrb[15].mxu1 }
 0x13c   : > { %v2204_v32 = vadd.f32 %v2203_v28, %v985_v53  ;;  %v900_v31 = vpop.f32.mrb[6].mxu0 }
 0x13d   : > { %v2206_v21 = vadd.f32 %v900_v31, %v714_v15  ;;  %v902_v37 = vpop.f32.mrb[7].mxu0 }
 0x13e   : > { %v2209_v10 = vadd.f32 %v902_v37, %v716_v17 }
 0x13f   : > { %v2207_v38 = vadd.f32 %v2206_v21, %v989_v29 }
 0x140   : > { %v2210_v42 = vadd.f32 %v2209_v10, %v991_v54 }
 0x180   : > { %v1262_v44 = vpop.f32.mrb[8].mxu0 }
 0x181   : > { %v2190_v46 = vadd.f32 %v2189_v0, %v1262_v44  ;;  %v1264_v36 = vpop.f32.mrb[9].mxu0 }
 0x182   : > { %v2193_v62 = vadd.f32 %v2192_v61, %v1264_v36 }
 0x183   : > { %1534 = vst [vmem:[%s3379_s13] sm:$0xff] %v2190_v46 }
 0x184   : > { %1535 = vst [vmem:[%s3379_s13 + $0x8] sm:$0xff] %v2193_v62  ;;  %v1268_v49 = vpop.f32.mrb[10].mxu0  ;;  %1389 = vmatprep.mubr.f32.mxu1 %v2193_v62  ;;  %v1411_v45 = vmul.f32 %v2193_v62, %v2193_v62 }
 0x185   : > { %v2196_v59 = vadd.f32 %v2195_v52, %v1268_v49  ;;  %v1270_v57 = vpop.f32.mrb[11].mxu0  ;;  %1390 = vmatmul.mubr.f32.vlgmr.msra.gmra.mrb[16].mxu1 %v2190_v46 }
 0x186   : > { %v2199_v63 = vadd.f32 %v2198_v58, %v1270_v57  ;;  %2159 = vmatpush3.bf16.msra.mxu1 %v3252_v25 }
 0x187   : > { %1536 = vst [vmem:[%s3379_s13 + $0x10] sm:$0xff] %v2196_v59  ;;  %2161 = vmatprep.subr.bf16.mxu1 %v3254_v48 }
 0x188   : > { %1537 = vst [vmem:[%s3379_s13 + $0x18] sm:$0xff] %v2199_v63  ;;  %v1274_v1 = vpop.f32.mrb[12].mxu0  ;;  %1394 = vmatprep.mubr.f32.mxu1 %v2199_v63 }
 0x189   : > { %v2202_v4 = vadd.f32 %v2201_v14, %v1274_v1  ;;  %v1276_v5 = vpop.f32.mrb[13].mxu0  ;;  %1395 = vmatmul.mubr.f32.gmra.mrb[18].mxu1 %v2196_v59 }
 0x18a   : > { %v2205_v6 = vadd.f32 %v2204_v32, %v1276_v5  ;;  %2163 = vmatpush3.bf16.msra.mxu1 %v3269_v11  ;;  %v1410_v11 = vmul.f32 %v2190_v46, %v2190_v46 }
 0x18b   : > { %1538 = vst [vmem:[%s3379_s13 + $0x20] sm:$0xff] %v2202_v4  ;;  %2165 = vmatprep.subr.bf16.mxu1 %v3272_v12  ;;  %v1413_v12 = vmul.f32 %v2199_v63, %v2199_v63 }
 0x18c   : > { %1539 = vst [vmem:[%s3379_s13 + $0x28] sm:$0xff] %v2205_v6  ;;  %v1280_v40 = vpop.f32.mrb[14].mxu0  ;;  %1399 = vmatprep.mubr.f32.mxu1 %v2205_v6 }
 0x18d   : > { %v2208_v25 = vadd.f32 %v2207_v38, %v1280_v40  ;;  %v1282_v13 = vpop.f32.mrb[15].mxu0  ;;  %1400 = vmatmul.mubr.f32.gmra.mrb[20].mxu1 %v2202_v4 }
 0x18e   : > { %v2211_v48 = vadd.f32 %v2210_v42, %v1282_v13  ;;  %2167 = vmatpush3.bf16.msra.mxu1 %v3287_v30  ;;  %v1412_v30 = vmul.f32 %v2196_v59, %v2196_v59 }
 0x18f   : > { %1540 = vst [vmem:[%s3379_s13 + $0x30] sm:$0xff] %v2208_v25  ;;  %2169 = vmatprep.subr.bf16.mxu1 %v3290_v24  ;;  %v1415_v24 = vmul.f32 %v2205_v6, %v2205_v6 }
 0x190   : > { %1541 = vst [vmem:[%s3379_s13 + $0x38] sm:$0xff] %v2211_v48  ;;  %1404 = vmatprep.mubr.f32.mxu1 %v2211_v48 }
 0x191   : > { %1405 = vmatmul.mubr.f32.gmra.mrb[22].mxu1 %v2208_v25 }
 0x192   : > { %2171 = vmatpush3.bf16.msra.mxu1 %v3305_v34  ;;  %1482 = vmatprep.mubr.f32.mxu1 %v1411_v45  ;;  %v1414_v34 = vmul.f32 %v2202_v4, %v2202_v4 }
 0x193   : > { %2173 = vmatprep.subr.bf16.mxu1 %v3308_v2  ;;  %v1417_v2 = vmul.f32 %v2211_v48, %v2211_v48 }
 0x196   : > { %2175 = vmatpush3.bf16.msra.mxu1 %v3323_v7  ;;  %v1416_v7 = vmul.f32 %v2208_v25, %v2208_v25 }
 0x197   : > { %2177 = vmatprep.subr.bf16.mxu1 %v3326_v39 }
 0x19a   : > { %2179 = vmatpush3.bf16.msra.mxu1 %v3341_v35 }
 0x19b   : > { %2181 = vmatprep.subr.bf16.mxu1 %v3344_v47 }
 0x19e   : > { %2183 = vmatpush3.bf16.msra.mxu1 %v3353_v51 }
 0x19f   : > { %2185 = vmatprep.subr.bf16.mxu1 %v3363_v60 }
 0x1a2   : > { %2187 = vmatpush3.bf16.msra.mxu1 %v3371_v3 }
 0x1a5   : > { %1483 = vmatmul.mubr.f32.vlgmr.msra.gmra.mrb[24].mxu1 %v1410_v11 }
 0x1a6   : > { %1487 = vmatprep.mubr.f32.mxu1 %v1413_v12 }
 0x1a9   : > { %1488 = vmatmul.mubr.f32.gmra.mrb[26].mxu1 %v1412_v30 }
 0x1aa   : > { %1492 = vmatprep.mubr.f32.mxu1 %v1415_v24 }
 0x1ad   : > { %1493 = vmatmul.mubr.f32.gmra.mrb[28].mxu1 %v1414_v34 }
 0x1ae   : > { %1497 = vmatprep.mubr.f32.mxu1 %v1417_v2 }
 0x1b1   : > { %1498 = vmatmul.mubr.f32.gmra.mrb[30].mxu1 %v1416_v7 }
 0x258   : > { %v1864_v39 = vpop.f32.mrb[16].mxu1 }
 0x259   : > { %v1865_v35 = vpop.f32.mrb[17].mxu1 }
 0x25a   : > { %v1866_v47 = vadd.f32 %v1865_v35, %v1864_v39 }
 0x25c   : > { %v1867_v51 = vpop.f32.mrb[18].mxu1  ;;  %v1504_v15 = vsel %vm1503_vm5, %v1866_v47, 0.0 }
 0x25d   : > { %v1868_v60 = vpop.f32.mrb[19].mxu1 }
 0x25e   : > { %v1869_v3 = vadd.f32 %v1868_v60, %v1867_v51 }
 0x260   : > { %v1505_v17 = vsel %vm1503_vm5, %v1869_v3, 0.0  ;;  %v1870_v16 = vpop.f32.mrb[20].mxu1 }
 0x261   : > { %v1506_v19 = vadd.f32 %v1505_v17, %v1504_v15  ;;  %v1871_v43 = vpop.f32.mrb[21].mxu1 }
 0x262   : > { %v1872_v56 = vadd.f32 %v1871_v43, %v1870_v16 }
 0x264   : > { %v1507_v20 = vsel %vm1503_vm5, %v1872_v56, 0.0  ;;  %v1873_v22 = vpop.f32.mrb[22].mxu1 }
 0x265   : > { %v1508_v23 = vadd.f32 %v1507_v20, %v1506_v19  ;;  %v1874_v0 = vpop.f32.mrb[23].mxu1 }
 0x266   : > { %v1875_v55 = vadd.f32 %v1874_v0, %v1873_v22 }
 0x268   : > { %v1509_v61 = vsel %vm1503_vm5, %v1875_v55, 0.0 }
 0x269   : > { %v1510_v18 = vadd.f32 %v1509_v61, %v1508_v23 }
 0x26b   : > { %v1511_v26 = vrot.slane %v1510_v18, 4 }
 0x26d   : > { %v1512_v31 = vadd.f32 %v1511_v26, %v1510_v18 }
 0x26f   : > { %v1513_v42 = vrot.slane %v1512_v31, 2 }
 0x271   : > { %v1514_v36 = vadd.f32 %v1513_v42, %v1512_v31 }
 0x273   : > { %v1515_v59 = vrot.slane %v1514_v36, 1 }
 0x275   : > { %v1516_v1 = vadd.f32 %v1515_v59, %v1514_v36 }
 0x278   : > { %v1908_v27 = vpop.f32.mrb[24].mxu1 }
 0x279   : > { %v1909_v8 = vpop.f32.mrb[25].mxu1 }
 0x27a   : > { %v1910_v41 = vadd.f32 %v1909_v8, %v1908_v27 }
 0x27c   : > { %v1911_v33 = vpop.f32.mrb[26].mxu1  ;;  %v1517_v58 = vsel %vm1503_vm5, %v1910_v41, 0.0 }
 0x27d   : > { %v1912_v52 = vpop.f32.mrb[27].mxu1 }
 0x27e   : > { %v1913_v53 = vadd.f32 %v1912_v52, %v1911_v33 }
 0x280   : > { %v1518_v50 = vsel %vm1503_vm5, %v1913_v53, 0.0  ;;  %v1914_v9 = vpop.f32.mrb[28].mxu1 }
 0x281   : > { %v1519_v28 = vadd.f32 %v1518_v50, %v1517_v58  ;;  %v1915_v29 = vpop.f32.mrb[29].mxu1 }
 0x282   : > { %v1916_v14 = vadd.f32 %v1915_v29, %v1914_v9 }
 0x284   : > { %v1520_v54 = vsel %vm1503_vm5, %v1916_v14, 0.0  ;;  %v1917_v32 = vpop.f32.mrb[30].mxu1 }
 0x285   : > { %v1521_v21 = vadd.f32 %v1520_v54, %v1519_v28  ;;  %v1918_v37 = vpop.f32.mrb[31].mxu1 }
 0x286   : > { %v1919_v10 = vadd.f32 %v1918_v37, %v1917_v32 }
 0x288   : > { %v1522_v38 = vsel %vm1503_vm5, %v1919_v10, 0.0 }
 0x289   : > { %v1523_v44 = vadd.f32 %v1522_v38, %v1521_v21 }
 0x28b   : > { %v1524_v46 = vrot.slane %v1523_v44, 4 }
 0x28d   : > { %v1525_v62 = vadd.f32 %v1524_v46, %v1523_v44 }
 0x28f   : > { %v1526_v49 = vrot.slane %v1525_v62, 2 }
 0x291   : > { %v1527_v57 = vadd.f32 %v1526_v49, %v1525_v62 }
 0x293   : > { %v1528_v63 = vrot.slane %v1527_v57, 1 }
 0x295   : > { %v1529_v4 = vadd.f32 %v1528_v63, %v1527_v57 }
 0x297   : > { %v1531_v5 = vsel %vm1530_vm6, %v1516_v1, %v1529_v4 }
 0x298   : > { %1533 = vst.msk [vmem:[%s295_s17] sm:$0x3] %vm1532_vm7, %v1531_v5 }
 0x299 PF: > { %s17_s23 = sadd.s32 1, %s2276_s23   ;;  %s3432_s21 = smov %s2272_s22 }
 0x29a   : > { %p14_p5 = scmp.ge.s32.totalorder %s17_s23, 4   ;;  %s3433_s22 = smov %s3435_s24 }
 0x29c   :  { %16 = sbr.rel (!%p14_p5) target bundleno = 2 (0x2), region = 84 }

// kernel: tile.34
= control target key start
LH: loop header
LB: loop body
LE: loop exit
PB: predicated region body
PF: predicated region fallthrough
CT: control target
= control target key end

     0   :  { %s7_s6 = smov 3  ;;  %s21_s9 = smov 3  ;;  %vm4_vm0 = vcmask 64512   ;;  %vm11_vm1 = vcmask 1048512   ;;  %vm18_vm2 = vcmask 982912   ;;  %vm25_vm3 = vcmask 917312   ;;  %s232_s0 = inlined_call_operand.vmem [shape: f32[32,8], index: 0, kind: input, shape index: {}]   ;;  %s233_s1 = inlined_call_operand.vmem [shape: f32[1,256], index: 1, kind: output, shape index: {}]  }
   0x1   :  { %v122_v0 = vld [vmem:[%s232_s0 + $0xf] ss:$16 sm:%s7_s6]   ;;  %s153_s10 = smov 120   ;;  %v124_v1 = vld [vmem:[%s232_s0 + $0xd] ss:$16 sm:%s21_s9]   ;;  %s14_s13 = smov 3 }
   0x2   :  { %9 = vrot.lane.b32.xlu0 %v122_v0, %s153_s10  ;;  %s154_s14 = smov 104   ;;  %v123_v2 = vld [vmem:[%s232_s0 + $0xe] ss:$16 sm:%s14_s13]   ;;  %s28_s17 = smov 3  ;;  %vm32_vm4 = vcmask 851712   ;;  %vm39_vm5 = vcmask 786112  }
   0x3   :  { %23 = vrot.lane.b32.xlu1 %v124_v1, %s154_s14  ;;  %v125_v3 = vld [vmem:[%s232_s0 + $0xc] ss:$16 sm:%s28_s17]   ;;  %s35_s20 = smov 3  ;;  %s42_s21 = smov 3  ;;  %vm46_vm6 = vcmask 720512   ;;  %vm53_vm7 = vcmask 654912  }
   0x4   :  { %s155_s22 = smov 112   ;;  %s156_s23 = smov 96   ;;  %v126_v4 = vld [vmem:[%s232_s0 + $0xb] ss:$16 sm:%s35_s20]   ;;  %v127_v5 = vld [vmem:[%s232_s0 + $0xa] ss:$16 sm:%s42_s21]  }
   0x5   :  { %s49_s28 = smov 3  ;;  %s56_s29 = smov 3  ;;  %vm60_vm8 = vcmask 589312   ;;  %vm67_vm9 = vcmask 523712   ;;  %vm74_vm10 = vcmask 458112   ;;  %vm81_vm11 = vcmask 392512  }
   0x6   :  { %16 = vrot.lane.b32.xlu0 %v123_v2, %s155_s22  ;;  %s157_s30 = smov 88   ;;  %s158_s2 = smov 80   ;;  %v128_v6 = vld [vmem:[%s232_s0 + $0x9] ss:$16 sm:%s49_s28]   ;;  %vm88_vm12 = vcmask 326912   ;;  %vm95_vm13 = vcmask 261312  }
   0x7   :  { %30 = vrot.lane.b32.xlu1 %v125_v3, %s156_s23  ;;  %v129_v7 = vld [vmem:[%s232_s0 + $0x8] ss:$16 sm:%s56_s29]   ;;  %s63_s7 = smov 3  ;;  %s70_s8 = smov 3  ;;  %vm102_vm14 = vcmask 195712   ;;  %vm109_vm15 = vcmask 130112  }
   0x8   :  { %s159_s9 = smov 72   ;;  %s160_s10 = smov 64   ;;  %v130_v8 = vld [vmem:[%s232_s0 + $0x7] ss:$16 sm:%s63_s7]   ;;  %v131_v9 = vld [vmem:[%s232_s0 + $0x6] ss:$16 sm:%s70_s8]  }
   0x9   :  { %s2_s13 = smov 3  ;;  %s77_s16 = smov 3 }
   0xa   :  { %37 = vrot.lane.b32.xlu0 %v126_v4, %s157_s30  ;;  %v3_v10 = vld [vmem:[%s232_s0] ss:$16 sm:%s2_s13]   ;;  %s84_s19 = smov 3  ;;  %s161_s20 = smov 56  }
   0xb   :  { %44 = vrot.lane.b32.xlu1 %v127_v5, %s158_s2  ;;  %5 = vst.msk [vmem:[#allocation0] ss:$8 sm:$0x3] %vm4_vm0, %v3_v10   ;;  %s162_s21 = smov 48   ;;  %v132_v11 = vld [vmem:[%s232_s0 + $0x5] ss:$16 sm:%s77_s16]  }
   0xc   :  { %v133_v12 = vld [vmem:[%s232_s0 + $0x4] ss:$16 sm:%s84_s19]   ;;  %s91_s26 = smov 3  ;;  %s98_s27 = smov 3 }
   0xd   :  { %s163_s28 = smov 40   ;;  %s164_s29 = smov 32   ;;  %v134_v13 = vld [vmem:[%s232_s0 + $0x3] ss:$16 sm:%s91_s26]   ;;  %v135_v14 = vld [vmem:[%s232_s0 + $0x2] ss:$16 sm:%s98_s27]  }
   0xe   :  { %51 = vrot.lane.b32.xlu0 %v128_v6, %s159_s9  ;;  %s105_s5 = smov 3  ;;  %s165_s6 = smov 24  }
   0xf   :  { %58 = vrot.lane.b32.xlu1 %v129_v7, %s160_s10  ;;  %s166_s7 = smov 16   ;;  %v136_v15 = vld [vmem:[%s232_s0 + $0x1] ss:$16 sm:%s105_s5]   ;;  %s167_s0 = smov 8  }
  0x12   :  { %65 = vrot.lane.b32.xlu0 %v130_v8, %s161_s20 }
  0x13   :  { %72 = vrot.lane.b32.xlu1 %v131_v9, %s162_s21 }
  0x16   :  { %79 = vrot.lane.b32.xlu0 %v132_v11, %s163_s28 }
  0x17   :  { %86 = vrot.lane.b32.xlu1 %v133_v12, %s164_s29 }
  0x1a   :  { %93 = vrot.lane.b32.xlu0 %v134_v13, %s165_s6 }
  0x1b   :  { %100 = vrot.lane.b32.xlu1 %v135_v14, %s166_s7 }
  0x1e   :  { %107 = vrot.lane.b32.xlu0 %v136_v15, %s167_s0 }
  0x74   :  { %v10_v16 = vpop.permute.xlu0 %9  }
  0x75   :  { %12 = vst.msk [vmem:[#allocation0] ss:$8 sm:$0x3] %vm11_vm1, %v10_v16   ;;  %v24_v17 = vpop.permute.xlu1 %23  }
  0x78   :  { %v17_v18 = vpop.permute.xlu0 %16  }
  0x79   :  { %19 = vst.msk [vmem:[#allocation0] ss:$8 sm:$0x3] %vm18_vm2, %v17_v18   ;;  %v31_v19 = vpop.permute.xlu1 %30  }
  0x7a   :  { %26 = vst.msk [vmem:[#allocation0] ss:$8 sm:$0x3] %vm25_vm3, %v24_v17  }
  0x7b   :  { %33 = vst.msk [vmem:[#allocation0] ss:$8 sm:$0x3] %vm32_vm4, %v31_v19  }
  0x7c   :  { %v38_v20 = vpop.permute.xlu0 %37  }
  0x7d   :  { %40 = vst.msk [vmem:[#allocation0] ss:$8 sm:$0x3] %vm39_vm5, %v38_v20   ;;  %v45_v21 = vpop.permute.xlu1 %44  }
  0x7e   :  { %47 = vst.msk [vmem:[#allocation0] ss:$8 sm:$0x3] %vm46_vm6, %v45_v21  }
  0x80   :  { %v52_v22 = vpop.permute.xlu0 %51  }
  0x81   :  { %54 = vst.msk [vmem:[#allocation0] ss:$8 sm:$0x3] %vm53_vm7, %v52_v22   ;;  %v59_v23 = vpop.permute.xlu1 %58  }
  0x82   :  { %61 = vst.msk [vmem:[#allocation0] ss:$8 sm:$0x3] %vm60_vm8, %v59_v23  }
  0x84   :  { %v66_v24 = vpop.permute.xlu0 %65  }
  0x85   :  { %68 = vst.msk [vmem:[#allocation0] ss:$8 sm:$0x3] %vm67_vm9, %v66_v24   ;;  %v73_v25 = vpop.permute.xlu1 %72  }
  0x86   :  { %75 = vst.msk [vmem:[#allocation0] ss:$8 sm:$0x3] %vm74_vm10, %v73_v25  }
  0x88   :  { %v80_v26 = vpop.permute.xlu0 %79  }
  0x89   :  { %82 = vst.msk [vmem:[#allocation0] ss:$8 sm:$0x3] %vm81_vm11, %v80_v26   ;;  %v87_v27 = vpop.permute.xlu1 %86  }
  0x8a   :  { %89 = vst.msk [vmem:[#allocation0] ss:$8 sm:$0x3] %vm88_vm12, %v87_v27  }
  0x8c   :  { %v94_v28 = vpop.permute.xlu0 %93  }
  0x8d   :  { %96 = vst.msk [vmem:[#allocation0] ss:$8 sm:$0x3] %vm95_vm13, %v94_v28   ;;  %v101_v29 = vpop.permute.xlu1 %100  }
  0x8e   :  { %103 = vst.msk [vmem:[#allocation0] ss:$8 sm:$0x3] %vm102_vm14, %v101_v29  }
  0x90   :  { %v108_v30 = vpop.permute.xlu0 %107  }
  0x91   :  { %110 = vst.msk [vmem:[#allocation0] ss:$8 sm:$0x3] %vm109_vm15, %v108_v30  }
  0x98   :  { %v114_v31 = vld [vmem:[#allocation0] sm:$0x1]  ;;  %v118_v32 = vld [vmem:[#allocation0 + $0x8] sm:$0x1] }
  0x99   :  { %116 = vst [vmem:[%s233_s1] sm:$0x1] %v114_v31  ;;  %137 = vst [vmem:[%s233_s1 + $0x1] sm:$0x1] %v118_v32 }

// kernel: decoder_without_concat.7
= control target key start
LH: loop header
LB: loop body
LE: loop exit
PB: predicated region body
PF: predicated region fallthrough
CT: control target
= control target key end

     0   :  { %s456_s12 = smov 0   ;;  %s458_s13 = smov 0   ;;  %s498_s0 = inlined_call_operand.vmem [shape: f32[2,32,256], index: 0, kind: input, shape index: {}]   ;;  %s499_s1 = inlined_call_operand.vmem [shape: f32[1,256], index: 1, kind: input, shape index: {}]   ;;  %s500_s2 = inlined_call_operand.vmem [shape: f32[1,256], index: 2, kind: input, shape index: {}]   ;;  %s501_s3 = inlined_call_operand.vmem [shape: f32[2,32,256], index: 3, kind: output, shape index: {}]  }
   0x1   :  { %s460_s14 = smov 0  }
   0x2 LB: > { %s25_s15 = sadd.s32 1, %s430_s13  ;;  %p379_p0 = scmp.ge.s32.totalorder %s434_s14, 1  ;;  %s434_s14 = sphi %s460_s14, %s13_s14   ;;  %s430_s13 = sphi %s458_s13, %s503_s13   ;;  %s426_s12 = sphi %s456_s12, %s502_s12  }
   0x3   : > { %p27_p1 = scmp.ge.s32.totalorder %s25_s15, 2  ;;  %p159_p2 = scmp.lt.s32.totalorder %s434_s14, 3 }
   0x5   : > { %s505_s15 = smov (%p27_p1, %s25_s15), 0  ;;  %p160_p3 = pnand %p379_p0, %p159_p2 }
   0x6   : > { %p194_p4 = scmp.lt.s32.totalorder (!%p160_p3), %s426_s12, 1  ;;  %v225_v0 = vlaneseq (!%p160_p3)  ;;  %v223_v2 = vld [vmem:[%s499_s1] sm:$0x3] (!%p160_p3) }
   0x7   : > { %163 = sbr.rel (%p160_p3) target bundleno = 28 (0x1c), region = 32  ;;  %v243_v3 = vld [vmem:[%s500_s2] sm:$0x3] (!%p160_p3) }
   0x8   : > { %v226_v1 = vshrl.u32 (!%p160_p3), %v225_v0, 7 }
   0xa   : > { %v227_v4 = vsub.s32 (!%p160_p3), 0, %v226_v1  ;;  %v231_v5 = vsub.s32 (!%p160_p3), 1, %v226_v1 }
   0xc   : > { %v228_v7 = vrot.slane (!%p160_p3), %v223_v2, %v227_v4  ;;  %v248_v8 = vrot.slane (!%p160_p3), %v243_v3, %v227_v4  ;;  %v232_v10 = vrot.slane (!%p160_p3), %v223_v2, %v231_v5  ;;  %v252_v11 = vrot.slane (!%p160_p3), %v243_v3, %v231_v5 }
   0xe   : > { %s507_s12 = smov (!%p194_p4, %s426_s12), 1 }
   0xf   : > { %s386_s20 = sshll.u32 %s507_s12, 6 }
  0x10   : > { %s202_s23 = scalar_lea.vmem %s498_s0, %s386_s20  ;;  %s213_s26 = scalar_lea.vmem %s501_s3, %s386_s20 }
  0x11   : > { %v215_v6 = vld [vmem:[%s202_s23] sm:$0xff]  ;;  %v216_v9 = vld [vmem:[%s202_s23 + $0x8] sm:$0xff]  ;;  %v217_v12 = vld [vmem:[%s202_s23 + $0x10] sm:$0xff] }
  0x12   : > { %v218_v13 = vld [vmem:[%s202_s23 + $0x18] sm:$0xff]  ;;  %v219_v14 = vld [vmem:[%s202_s23 + $0x20] sm:$0xff]  ;;  %v220_v15 = vld [vmem:[%s202_s23 + $0x28] sm:$0xff]  ;;  %v235_v16 = vmul.f32 %v228_v7, %v215_v6  ;;  %v236_v17 = vmul.f32 %v232_v10, %v216_v9  ;;  %v237_v18 = vmul.f32 %v228_v7, %v217_v12 }
  0x13   : > { %v238_v19 = vmul.f32 %v232_v10, %v218_v13  ;;  %v221_v20 = vld [vmem:[%s202_s23 + $0x30] sm:$0xff]  ;;  %v222_v21 = vld [vmem:[%s202_s23 + $0x38] sm:$0xff]  ;;  %v239_v22 = vmul.f32 %v228_v7, %v219_v14  ;;  %v240_v23 = vmul.f32 %v232_v10, %v220_v15 }
  0x14   : > { %v241_v24 = vmul.f32 %v228_v7, %v221_v20  ;;  %v242_v25 = vmul.f32 %v232_v10, %v222_v21  ;;  %v255_v26 = vadd.f32 %v248_v8, %v235_v16  ;;  %v256_v27 = vadd.f32 %v252_v11, %v236_v17 }
  0x15   : > { %v257_v28 = vadd.f32 %v248_v8, %v237_v18  ;;  %v258_v29 = vadd.f32 %v252_v11, %v238_v19  ;;  %v259_v30 = vadd.f32 %v248_v8, %v239_v22  ;;  %v260_v31 = vadd.f32 %v252_v11, %v240_v23 }
  0x16   : > { %v261_v32 = vadd.f32 %v248_v8, %v241_v24  ;;  %v262_v33 = vadd.f32 %v252_v11, %v242_v25  ;;  %v263_v34 = vmax.f32 %v255_v26, 0.0  ;;  %v264_v35 = vmax.f32 %v256_v27, 0.0 }
  0x17   : > { %v265_v36 = vmax.f32 %v257_v28, 0.0  ;;  %v266_v37 = vmax.f32 %v258_v29, 0.0  ;;  %v267_v38 = vmax.f32 %v259_v30, 0.0  ;;  %v268_v39 = vmax.f32 %v260_v31, 0.0 }
  0x18   : > { %v269_v40 = vmax.f32 %v261_v32, 0.0  ;;  %v270_v41 = vmax.f32 %v262_v33, 0.0  ;;  %271 = vst [vmem:[%s213_s26] sm:$0xff] %v263_v34  ;;  %272 = vst [vmem:[%s213_s26 + $0x8] sm:$0xff] %v264_v35 }
  0x19   : > { %273 = vst [vmem:[%s213_s26 + $0x10] sm:$0xff] %v265_v36  ;;  %274 = vst [vmem:[%s213_s26 + $0x18] sm:$0xff] %v266_v37 }
  0x1a   : > { %275 = vst [vmem:[%s213_s26 + $0x20] sm:$0xff] %v267_v38  ;;  %276 = vst [vmem:[%s213_s26 + $0x28] sm:$0xff] %v268_v39 }
  0x1b   : > { %277 = vst [vmem:[%s213_s26 + $0x30] sm:$0xff] %v269_v40  ;;  %278 = vst [vmem:[%s213_s26 + $0x38] sm:$0xff] %v270_v41 }
  0x1c PF: > { %s13_s14 = sadd.s32 1, %s434_s14   ;;  %s502_s12 = smov %s430_s13 }
  0x1d   : > { %p10_p5 = scmp.ge.s32.totalorder %s13_s14, 4   ;;  %s503_s13 = smov %s505_s15 }
  0x1f   :  { %12 = sbr.rel (!%p10_p5) target bundleno = 2 (0x2), region = 62 }

</bundles_post_ra>
